<compile_context>
chip_gen: v6e
topology: v6e:2x2x1
jax: 0.10.0
libtpu: 0.0.40
codegen_flags: <defaults>
</compile_context>

<pallas_src>
import functools

import jax
import jax.numpy as jnp
from jax.experimental import pallas as pl
from jax.experimental.pallas import tpu as pltpu

EPS = 1e-12  # F.normalize default eps


# ----------------------------------------------------------------------------
# One exchange round on a stacked (3*hw_pad, C) f32 feature map.
# Returns (e1, e2, e3), each (hw_pad, C) f32, per-pixel L2-normalized.
# ----------------------------------------------------------------------------
def _round(fstack, lq_col, lj, w, hw, hw_pad):
    fbf = fstack.astype(jnp.bfloat16)                 # shared bf16 cast

    # visual_conv on the whole stack (bf16 operands, f32 accumulation), then
    # reduce keys to attention logits immediately with one MXU matmul so the
    # f32 keys buffer does not stay live alongside vals.
    keys = jnp.maximum(
        jnp.dot(fbf, w["wv"], preferred_element_type=jnp.float32) + w["bv"],
        0.0)
    logits = jnp.dot(keys.astype(jnp.bfloat16), lq_col,
                     preferred_element_type=jnp.float32)          # (3*hw_pad, 1)

    # visual_trans on the whole stack; keep in bf16 (gated + summed into an
    # f32 residual below, so bf16 storage is within tolerance).
    vals = jnp.maximum(
        jnp.dot(fbf, w["wvt"], preferred_element_type=jnp.float32) + w["bvt"],
        0.0).astype(jnp.bfloat16)

    # --- per-exchange attention pooling (softmax over HW, f32, VPU/XLU path) ---
    pooled_rows = []
    for a in range(3):
        la = logits[a * hw_pad:(a + 1) * hw_pad]                  # (hw_pad, 1)
        if hw != hw_pad:  # mask padded rows out of the softmax
            rows = jax.lax.broadcasted_iota(jnp.int32, (hw_pad, 1), 0)
            la = jnp.where(rows < hw, la, -1e30)
        la = la - jnp.max(la, axis=0, keepdims=True)
        p = jnp.exp(la)
        attn = p / jnp.sum(p, axis=0, keepdims=True)
        fa = fstack[a * hw_pad:(a + 1) * hw_pad]
        pooled_rows.append(jnp.sum(attn * fa, axis=0, keepdims=True))   # (1, C)
    pooled = jnp.concatenate(pooled_rows, axis=0)                 # (3, C) f32

    # --- batched gate path: two (3, C) @ (C, C) bf16 matmuls for all exchanges
    gv = jnp.maximum(
        jnp.dot(pooled.astype(jnp.bfloat16), w["wj1"],
                preferred_element_type=jnp.float32) + lj, 0.0)    # joint_conv
    gv = gv / jnp.maximum(
        jnp.sqrt(jnp.sum(gv * gv, axis=1, keepdims=True)), EPS)   # F.normalize
    gates = jax.nn.sigmoid(
        jnp.dot(gv.astype(jnp.bfloat16), w["wlt"],
                preferred_element_type=jnp.float32) + w["blt"])   # (3, C)

    # --- gated residual + per-pixel L2 normalize ---
    outs = []
    for a in range(3):
        b, c = (a + 1) % 3, (a + 2) % 3
        fa = fstack[a * hw_pad:(a + 1) * hw_pad]
        vsum = (vals[b * hw_pad:(b + 1) * hw_pad].astype(jnp.float32)
                + vals[c * hw_pad:(c + 1) * hw_pad].astype(jnp.float32))
        out = fa + vsum * gates[a:a + 1, :]
        inv = 1.0 / jnp.maximum(
            jnp.sqrt(jnp.sum(out * out, axis=1, keepdims=True)), EPS)
        outs.append(out * inv)
    return outs


# ----------------------------------------------------------------------------
# Fused kernel: both rounds + final sum, one batch element per grid step.
# ----------------------------------------------------------------------------
def _tgfe_kernel(hw, hw_pad,
                 fstack_ref, lqT_ref, lj_ref,
                 wv_ref, bv_ref, wvt_ref, bvt_ref, wj1_ref, wlt_ref, blt_ref,
                 out_ref, estack_ref):
    fstack = fstack_ref[0]                         # (3*hw_pad, C) f32
    lq_col = lqT_ref[0].astype(jnp.bfloat16)       # (C, 1) column of relu(lang_conv)
    lj = lj_ref[0]                                 # (1, C) lang half of joint_conv
    w = dict(wv=wv_ref[...], bv=bv_ref[...], wvt=wvt_ref[...], bvt=bvt_ref[...],
             wj1=wj1_ref[...], wlt=wlt_ref[...], blt=blt_ref[...])

    # ---- round 1 (results stay in VMEM scratch, no HBM round-trip) ----
    e1, e2, e3 = _round(fstack, lq_col, lj, w, hw, hw_pad)
    estack_ref[pl.ds(0, hw_pad), :] = e1
    estack_ref[pl.ds(hw_pad, hw_pad), :] = e2
    estack_ref[pl.ds(2 * hw_pad, hw_pad), :] = e3

    # ---- round 2 + fused final sum ----
    o1, o2, o3 = _round(estack_ref[...], lq_col, lj, w, hw, hw_pad)
    out_ref[0] = (o1 + o2 + o3).astype(out_ref.dtype)


# ----------------------------------------------------------------------------
# pallas_call wrapper
# ----------------------------------------------------------------------------
def _vmem_budget_bytes(S, C, hw_pad):
    f32, bf16 = 4, 2
    feat = S * C * f32                              # one stacked f32 feature map
    est = 0
    est += 2 * feat                                 # stacked input block (double-buffered)
    est += 2 * hw_pad * C * f32                     # output block (double-buffered)
    est += feat                                     # estack VMEM scratch
    est += feat // 2                                # bf16 cast of the stack
    est += feat                                     # keys (f32, dies after logits)
    est += feat // 2                                # vals (bf16)
    est += feat                                     # e1/e2/e3 live before scratch store
    est += 2 * (4 * C * C * bf16 + 5 * C * f32)     # weights + biases + lq/lj
    est = int(est * 1.25) + (2 << 20)               # scheduling / epilogue headroom
    try:
        cap = pltpu.get_tpu_info().vmem_capacity_bytes
    except Exception:
        cap = 64 << 20                              # conservative (v7x per-core)
    return max(min(est, int(cap * 0.8)), 16 << 20)


def _tgfe_fused(fstack, lqT, lj, kp, *, hw, hw_pad):
    """fstack: (B, 3*hw_pad, C) f32; lqT: (B, C, 1) f32; lj: (B, 1, C) f32."""
    B, S, C = fstack.shape
    weights = (kp["wv"], kp["bv"], kp["wvt"], kp["bvt"],
               kp["wj1"], kp["wlt"], kp["blt"])

    fstack_spec = pl.BlockSpec((1, S, C), lambda b: (b, 0, 0))
    lq_spec = pl.BlockSpec((1, C, 1), lambda b: (b, 0, 0))
    lj_spec = pl.BlockSpec((1, 1, C), lambda b: (b, 0, 0))
    # Grid-invariant weights: index_map constant -> fetched once by the pipeline.
    w_specs = [pl.BlockSpec(w.shape, lambda b: (0, 0)) for w in weights]
    out_spec = pl.BlockSpec((1, hw_pad, C), lambda b: (b, 0, 0))

    kernel = functools.partial(_tgfe_kernel, hw, hw_pad)

    return pl.pallas_call(
        kernel,
        out_shape=jax.ShapeDtypeStruct((B, hw_pad, C), jnp.float32),
        grid_spec=pltpu.PrefetchScalarGridSpec(
            num_scalar_prefetch=0,
            grid=(B,),
            in_specs=[fstack_spec, lq_spec, lj_spec] + w_specs,
            out_specs=out_spec,
            scratch_shapes=[pltpu.VMEM((S, C), jnp.float32)],
        ),
        compiler_params=pltpu.CompilerParams(
            dimension_semantics=("parallel",),
            vmem_limit_bytes=_vmem_budget_bytes(S, C, hw_pad)),
    )(fstack, lqT, lj, *weights)


# ----------------------------------------------------------------------------
# Full TGFE forward: ONE fused kernel launch
# ----------------------------------------------------------------------------
@jax.jit
def tgfe_forward(feat1, feat2, feat3, lang_feat, params):
    """feat*: (B, C, H, W) NCHW, lang_feat: (B, C, 1, 1).  Returns (B, C, H, W)."""
    B, C, H, W = feat1.shape
    HW = H * W
    hw_pad = -(-HW // 16) * 16                       # bf16 sublane alignment

    def to_flat(x):                                  # NCHW -> (B, hw_pad, C)
        y = jnp.transpose(x, (0, 2, 3, 1)).reshape(B, HW, C)
        if hw_pad != HW:
            y = jnp.pad(y, ((0, 0), (0, hw_pad - HW), (0, 0)))
        return y

    # Pre-stacked feature operand (stacking happens where the transpose already
    # materializes a copy -> no in-kernel concatenate of the big stack).
    fstack = jnp.concatenate([to_flat(feat1), to_flat(feat2), to_flat(feat3)],
                             axis=1)                 # (B, 3*hw_pad, C)
    lang = lang_feat.reshape(B, 1, C)

    # Hoisted lang-only 1x1 convs (identical across all six exchanges).
    lq = jax.nn.relu(lang @ params["wl"] + params["bl"])       # (B, 1, C)
    lqT = jnp.transpose(lq, (0, 2, 1))                         # (B, C, 1) column
    lj = lang @ params["wj2"] + params["bj"]                   # (B, 1, C)

    kp = {
        # all (C, C) weights in bf16 (f32 accumulation in-kernel)
        "wv": params["wv"].astype(jnp.bfloat16),
        "wvt": params["wvt"].astype(jnp.bfloat16),
        "wj1": params["wj1"].astype(jnp.bfloat16),
        "wlt": params["wlt"].astype(jnp.bfloat16),
        "bv": params["bv"], "bvt": params["bvt"], "blt": params["blt"],
    }

    fused = _tgfe_fused(fstack, lqT, lj, kp, hw=HW, hw_pad=hw_pad)
    fused = fused[:, :HW, :]
    return jnp.transpose(fused.reshape(B, H, W, C), (0, 3, 1, 2))


# ----------------------------------------------------------------------------
# Pure-JAX f32 reference (same flat layout) for a correctness sanity check
# ----------------------------------------------------------------------------
def _ge_ref(f1, f2, f3, lang, p):
    vkey = jax.nn.relu(f1 @ p["wv"] + p["bv"])
    lq = jax.nn.relu(lang @ p["wl"] + p["bl"])
    attn = jnp.einsum("bqc,bkc->bqk", vkey, lq)            # (B, HW, 1)
    attn = jax.nn.softmax(attn, axis=1)
    gv_pooled = jnp.einsum("bqk,bqc->bkc", attn, f1)       # (B, 1, C)
    gv = jax.nn.relu(gv_pooled @ p["wj1"] + lang @ p["wj2"] + p["bj"])
    gv = gv / jnp.maximum(jnp.linalg.norm(gv, axis=-1, keepdims=True), EPS)
    gate = jax.nn.sigmoid(gv @ p["wlt"] + p["blt"])
    t2 = jax.nn.relu(f2 @ p["wvt"] + p["bvt"]) * gate
    t3 = jax.nn.relu(f3 @ p["wvt"] + p["bvt"]) * gate
    out = f1 + t2 + t3
    return out / jnp.maximum(jnp.linalg.norm(out, axis=-1, keepdims=True), EPS)


def _tgfe_ref(feat1, feat2, feat3, lang_feat, p):
    B, C, H, W = feat1.shape
    flat = lambda x: jnp.transpose(x, (0, 2, 3, 1)).reshape(B, H * W, C)
    f1, f2, f3 = flat(feat1), flat(feat2), flat(feat3)
    lang = lang_feat.reshape(B, 1, C)
    e1 = _ge_ref(f1, f2, f3, lang, p)
    e2 = _ge_ref(f2, f3, f1, lang, p)
    e3 = _ge_ref(f3, f1, f2, lang, p)
    o1 = _ge_ref(e1, e2, e3, lang, p)
    o2 = _ge_ref(e2, e3, e1, lang, p)
    o3 = _ge_ref(e3, e1, e2, lang, p)
    fused = o1 + o2 + o3
    return jnp.transpose(fused.reshape(B, H, W, C), (0, 3, 1, 2))


# ----------------------------------------------------------------------------
# Deterministic parameter init (shapes from the nn.Module __init__)
# ----------------------------------------------------------------------------
def init_params(key, C):
    ks = jax.random.split(key, 12)
    n = lambda k, shape, s: s * jax.random.normal(k, shape, jnp.float32)
    return {
        # 1x1 conv weights stored pre-transposed: y = x @ W^T, W^T is (C_in, C_out)
        "wv": n(ks[0], (C, C), 0.05), "bv": n(ks[1], (1, C), 0.01),
        "wl": n(ks[2], (C, C), 0.05), "bl": n(ks[3], (1, C), 0.01),
        # joint_conv has 2C input channels: split into the gv half and the lang half
        "wj1": n(ks[4], (C, C), 0.05), "wj2": n(ks[5], (C, C), 0.05),
        "bj": n(ks[6], (1, C), 0.01),
        "wvt": n(ks[7], (C, C), 0.05), "bvt": n(ks[8], (1, C), 0.01),
        "wlt": n(ks[9], (C, C), 0.05), "blt": n(ks[10], (1, C), 0.01),
    }


if __name__ == "__main__":
    B, C, H, W = 2, 128, 8, 8            # channel_dim=128 (small stand-in for 512)
    key = jax.random.PRNGKey(0)
    k1, k2, k3, k4, kp = jax.random.split(key, 5)

    feat1 = jax.random.normal(k1, (B, C, H, W), jnp.float32)
    feat2 = jax.random.normal(k2, (B, C, H, W), jnp.float32)
    feat3 = jax.random.normal(k3, (B, C, H, W), jnp.float32)
    lang_feat = jax.random.normal(k4, (B, C, 1, 1), jnp.float32)
    params = init_params(kp, C)

    out = tgfe_forward(feat1, feat2, feat3, lang_feat, params)
    out = jax.block_until_ready(out)
    assert out.shape == (B, C, H, W)

    ref = jax.block_until_ready(_tgfe_ref(feat1, feat2, feat3, lang_feat, params))
    # Tolerance accounts for bf16 MXU operands / bf16 intermediates vs f32 reference.
    max_err = float(jnp.max(jnp.abs(out - ref)))
    assert jnp.allclose(out, ref, rtol=3e-2, atol=5e-3), max_err

    print("KERNEL_OK")
</pallas_src>

<mosaic_0001>
module attributes {stable_mosaic.version = 11 : i64} {
  func.func @_tgfe_kernel(%arg0: i32, %arg1: memref<1x192x128xf32, #tpu.memory_space<vmem>>, %arg2: memref<1x128x1xf32, #tpu.memory_space<vmem>>, %arg3: memref<1x1x128xf32, #tpu.memory_space<vmem>>, %arg4: memref<128x128xbf16, #tpu.memory_space<vmem>>, %arg5: memref<1x128xf32, #tpu.memory_space<vmem>>, %arg6: memref<128x128xbf16, #tpu.memory_space<vmem>>, %arg7: memref<1x128xf32, #tpu.memory_space<vmem>>, %arg8: memref<128x128xbf16, #tpu.memory_space<vmem>>, %arg9: memref<128x128xbf16, #tpu.memory_space<vmem>>, %arg10: memref<1x128xf32, #tpu.memory_space<vmem>>, %arg11: memref<1x64x128xf32, #tpu.memory_space<vmem>>, %arg12: memref<192x128xf32, #tpu.memory_space<vmem>>) attributes {dimension_semantics = [#tpu.dimension_semantics<parallel>], iteration_bounds = array<i64: 2>, scalar_prefetch = 0 : i64, scratch_operands = 1 : i64, tpu.core_type = #tpu.core_type<tc>, window_params = [{transform_indices = @transform_0, window_bounds = array<i64: 1, 192, 128>}, {transform_indices = @transform_1, window_bounds = array<i64: 1, 128, 1>}, {transform_indices = @transform_2, window_bounds = array<i64: 1, 1, 128>}, {pipeline_mode = #tpu.pipeline_mode<synchronous>, transform_indices = @transform_3, window_bounds = array<i64: 128, 128>}, {pipeline_mode = #tpu.pipeline_mode<synchronous>, transform_indices = @transform_4, window_bounds = array<i64: 1, 128>}, {pipeline_mode = #tpu.pipeline_mode<synchronous>, transform_indices = @transform_5, window_bounds = array<i64: 128, 128>}, {pipeline_mode = #tpu.pipeline_mode<synchronous>, transform_indices = @transform_6, window_bounds = array<i64: 1, 128>}, {pipeline_mode = #tpu.pipeline_mode<synchronous>, transform_indices = @transform_7, window_bounds = array<i64: 128, 128>}, {pipeline_mode = #tpu.pipeline_mode<synchronous>, transform_indices = @transform_8, window_bounds = array<i64: 128, 128>}, {pipeline_mode = #tpu.pipeline_mode<synchronous>, transform_indices = @transform_9, window_bounds = array<i64: 1, 128>}, {transform_indices = @transform_10, window_bounds = array<i64: 1, 64, 128>}]} {
    %c0 = arith.constant 0 : index
    %c0_0 = arith.constant 0 : index
    %c0_1 = arith.constant 0 : index
    %0 = vector.load %arg1[%c0, %c0_0, %c0_1] : memref<1x192x128xf32, #tpu.memory_space<vmem>>, vector<1x192x128xf32>
    %1 = vector.shape_cast %0 : vector<1x192x128xf32> to vector<192x128xf32>
    %c0_2 = arith.constant 0 : index
    %c0_3 = arith.constant 0 : index
    %c0_4 = arith.constant 0 : index
    %2 = vector.load %arg2[%c0_2, %c0_3, %c0_4] : memref<1x128x1xf32, #tpu.memory_space<vmem>>, vector<1x128x1xf32>
    %3 = vector.shape_cast %2 : vector<1x128x1xf32> to vector<128x1xf32>
    %4 = arith.truncf %3 : vector<128x1xf32> to vector<128x1xbf16>
    %c0_5 = arith.constant 0 : index
    %c0_6 = arith.constant 0 : index
    %c0_7 = arith.constant 0 : index
    %5 = vector.load %arg3[%c0_5, %c0_6, %c0_7] : memref<1x1x128xf32, #tpu.memory_space<vmem>>, vector<1x1x128xf32>
    %6 = vector.shape_cast %5 : vector<1x1x128xf32> to vector<1x128xf32>
    %c0_8 = arith.constant 0 : index
    %c0_9 = arith.constant 0 : index
    %7 = vector.load %arg4[%c0_8, %c0_9] : memref<128x128xbf16, #tpu.memory_space<vmem>>, vector<128x128xbf16>
    %c0_10 = arith.constant 0 : index
    %c0_11 = arith.constant 0 : index
    %8 = vector.load %arg5[%c0_10, %c0_11] : memref<1x128xf32, #tpu.memory_space<vmem>>, vector<1x128xf32>
    %c0_12 = arith.constant 0 : index
    %c0_13 = arith.constant 0 : index
    %9 = vector.load %arg6[%c0_12, %c0_13] : memref<128x128xbf16, #tpu.memory_space<vmem>>, vector<128x128xbf16>
    %c0_14 = arith.constant 0 : index
    %c0_15 = arith.constant 0 : index
    %10 = vector.load %arg7[%c0_14, %c0_15] : memref<1x128xf32, #tpu.memory_space<vmem>>, vector<1x128xf32>
    %c0_16 = arith.constant 0 : index
    %c0_17 = arith.constant 0 : index
    %11 = vector.load %arg8[%c0_16, %c0_17] : memref<128x128xbf16, #tpu.memory_space<vmem>>, vector<128x128xbf16>
    %c0_18 = arith.constant 0 : index
    %c0_19 = arith.constant 0 : index
    %12 = vector.load %arg9[%c0_18, %c0_19] : memref<128x128xbf16, #tpu.memory_space<vmem>>, vector<128x128xbf16>
    %c0_20 = arith.constant 0 : index
    %c0_21 = arith.constant 0 : index
    %13 = vector.load %arg10[%c0_20, %c0_21] : memref<1x128xf32, #tpu.memory_space<vmem>>, vector<1x128xf32>
    %14 = arith.truncf %1 : vector<192x128xf32> to vector<192x128xbf16>
    %cst = arith.constant dense<0.000000e+00> : vector<192x128xf32>
    %15 = tpu.matmul %14, %7, %cst {dimension_numbers = #tpu.dot_dimension_numbers<[1], [0], [0], [1], [0, 0, 1, 1], [], []>} : vector<192x128xbf16>, vector<128x128xbf16>, vector<192x128xf32> -> vector<192x128xf32>
    %16 = vector.broadcast %8 : vector<1x128xf32> to vector<192x128xf32>
    %17 = arith.addf %15, %16 : vector<192x128xf32>
    %cst_22 = arith.constant 0.000000e+00 : f32
    %18 = vector.broadcast %cst_22 : f32 to vector<192x128xf32>
    %19 = arith.maximumf %17, %18 : vector<192x128xf32>
    %20 = arith.truncf %19 : vector<192x128xf32> to vector<192x128xbf16>
    %cst_23 = arith.constant dense<0.000000e+00> : vector<192x1xf32>
    %21 = tpu.matmul %20, %4, %cst_23 {dimension_numbers = #tpu.dot_dimension_numbers<[1], [0], [0], [1], [0, 0, 1, 1], [], []>} : vector<192x128xbf16>, vector<128x1xbf16>, vector<192x1xf32> -> vector<192x1xf32>
    %cst_24 = arith.constant dense<0.000000e+00> : vector<192x128xf32>
    %22 = tpu.matmul %14, %9, %cst_24 {dimension_numbers = #tpu.dot_dimension_numbers<[1], [0], [0], [1], [0, 0, 1, 1], [], []>} : vector<192x128xbf16>, vector<128x128xbf16>, vector<192x128xf32> -> vector<192x128xf32>
    %23 = vector.broadcast %10 : vector<1x128xf32> to vector<192x128xf32>
    %24 = arith.addf %22, %23 : vector<192x128xf32>
    %cst_25 = arith.constant 0.000000e+00 : f32
    %25 = vector.broadcast %cst_25 : f32 to vector<192x128xf32>
    %26 = arith.maximumf %24, %25 : vector<192x128xf32>
    %27 = arith.truncf %26 : vector<192x128xf32> to vector<192x128xbf16>
    %28 = vector.extract_strided_slice %21 {offsets = [0, 0], sizes = [64, 1], strides = [1, 1]} : vector<192x1xf32> to vector<64x1xf32>
    %cst_26 = arith.constant dense<0xFF800000> : vector<1xf32>
    %29 = vector.multi_reduction <maximumf>, %28, %cst_26 [0] : vector<64x1xf32> to vector<1xf32>
    %30 = vector.shape_cast %29 : vector<1xf32> to vector<1x1xf32>
    %31 = vector.broadcast %30 : vector<1x1xf32> to vector<64x1xf32>
    %32 = arith.subf %28, %31 : vector<64x1xf32>
    %33 = math.exp %32 : vector<64x1xf32>
    %cst_27 = arith.constant dense<0.000000e+00> : vector<1xf32>
    %34 = vector.multi_reduction <add>, %33, %cst_27 [0] : vector<64x1xf32> to vector<1xf32>
    %35 = vector.shape_cast %34 : vector<1xf32> to vector<1x1xf32>
    %36 = vector.broadcast %35 : vector<1x1xf32> to vector<64x1xf32>
    %37 = arith.divf %33, %36 : vector<64x1xf32>
    %38 = vector.extract_strided_slice %1 {offsets = [0, 0], sizes = [64, 128], strides = [1, 1]} : vector<192x128xf32> to vector<64x128xf32>
    %39 = vector.broadcast %37 : vector<64x1xf32> to vector<64x128xf32>
    %40 = arith.mulf %39, %38 : vector<64x128xf32>
    %cst_28 = arith.constant dense<0.000000e+00> : vector<128xf32>
    %41 = vector.multi_reduction <add>, %40, %cst_28 [0] : vector<64x128xf32> to vector<128xf32>
    %42 = vector.shape_cast %41 : vector<128xf32> to vector<1x128xf32>
    %43 = vector.extract_strided_slice %21 {offsets = [64, 0], sizes = [64, 1], strides = [1, 1]} : vector<192x1xf32> to vector<64x1xf32>
    %cst_29 = arith.constant dense<0xFF800000> : vector<1xf32>
    %44 = vector.multi_reduction <maximumf>, %43, %cst_29 [0] : vector<64x1xf32> to vector<1xf32>
    %45 = vector.shape_cast %44 : vector<1xf32> to vector<1x1xf32>
    %46 = vector.broadcast %45 : vector<1x1xf32> to vector<64x1xf32>
    %47 = arith.subf %43, %46 : vector<64x1xf32>
    %48 = math.exp %47 : vector<64x1xf32>
    %cst_30 = arith.constant dense<0.000000e+00> : vector<1xf32>
    %49 = vector.multi_reduction <add>, %48, %cst_30 [0] : vector<64x1xf32> to vector<1xf32>
    %50 = vector.shape_cast %49 : vector<1xf32> to vector<1x1xf32>
    %51 = vector.broadcast %50 : vector<1x1xf32> to vector<64x1xf32>
    %52 = arith.divf %48, %51 : vector<64x1xf32>
    %53 = vector.extract_strided_slice %1 {offsets = [64, 0], sizes = [64, 128], strides = [1, 1]} : vector<192x128xf32> to vector<64x128xf32>
    %54 = vector.broadcast %52 : vector<64x1xf32> to vector<64x128xf32>
    %55 = arith.mulf %54, %53 : vector<64x128xf32>
    %cst_31 = arith.constant dense<0.000000e+00> : vector<128xf32>
    %56 = vector.multi_reduction <add>, %55, %cst_31 [0] : vector<64x128xf32> to vector<128xf32>
    %57 = vector.shape_cast %56 : vector<128xf32> to vector<1x128xf32>
    %58 = vector.extract_strided_slice %21 {offsets = [128, 0], sizes = [64, 1], strides = [1, 1]} : vector<192x1xf32> to vector<64x1xf32>
    %cst_32 = arith.constant dense<0xFF800000> : vector<1xf32>
    %59 = vector.multi_reduction <maximumf>, %58, %cst_32 [0] : vector<64x1xf32> to vector<1xf32>
    %60 = vector.shape_cast %59 : vector<1xf32> to vector<1x1xf32>
    %61 = vector.broadcast %60 : vector<1x1xf32> to vector<64x1xf32>
    %62 = arith.subf %58, %61 : vector<64x1xf32>
    %63 = math.exp %62 : vector<64x1xf32>
    %cst_33 = arith.constant dense<0.000000e+00> : vector<1xf32>
    %64 = vector.multi_reduction <add>, %63, %cst_33 [0] : vector<64x1xf32> to vector<1xf32>
    %65 = vector.shape_cast %64 : vector<1xf32> to vector<1x1xf32>
    %66 = vector.broadcast %65 : vector<1x1xf32> to vector<64x1xf32>
    %67 = arith.divf %63, %66 : vector<64x1xf32>
    %68 = vector.extract_strided_slice %1 {offsets = [128, 0], sizes = [64, 128], strides = [1, 1]} : vector<192x128xf32> to vector<64x128xf32>
    %69 = vector.broadcast %67 : vector<64x1xf32> to vector<64x128xf32>
    %70 = arith.mulf %69, %68 : vector<64x128xf32>
    %cst_34 = arith.constant dense<0.000000e+00> : vector<128xf32>
    %71 = vector.multi_reduction <add>, %70, %cst_34 [0] : vector<64x128xf32> to vector<128xf32>
    %72 = vector.shape_cast %71 : vector<128xf32> to vector<1x128xf32>
    %73 = tpu.concatenate %42, %57, %72 in 0 : vector<1x128xf32>, vector<1x128xf32>, vector<1x128xf32> -> vector<3x128xf32>
    %74 = arith.truncf %73 : vector<3x128xf32> to vector<3x128xbf16>
    %cst_35 = arith.constant dense<0.000000e+00> : vector<3x128xf32>
    %75 = tpu.matmul %74, %11, %cst_35 {dimension_numbers = #tpu.dot_dimension_numbers<[1], [0], [0], [1], [0, 0, 1, 1], [], []>} : vector<3x128xbf16>, vector<128x128xbf16>, vector<3x128xf32> -> vector<3x128xf32>
    %76 = vector.broadcast %6 : vector<1x128xf32> to vector<3x128xf32>
    %77 = arith.addf %75, %76 : vector<3x128xf32>
    %cst_36 = arith.constant 0.000000e+00 : f32
    %78 = vector.broadcast %cst_36 : f32 to vector<3x128xf32>
    %79 = arith.maximumf %77, %78 : vector<3x128xf32>
    %80 = arith.mulf %79, %79 : vector<3x128xf32>
    %cst_37 = arith.constant dense<0.000000e+00> : vector<3xf32>
    %81 = vector.multi_reduction <add>, %80, %cst_37 [1] : vector<3x128xf32> to vector<3xf32>
    %82 = vector.shape_cast %81 : vector<3xf32> to vector<3x1xf32>
    %83 = math.sqrt %82 : vector<3x1xf32>
    %cst_38 = arith.constant 9.99999996E-13 : f32
    %84 = vector.broadcast %cst_38 : f32 to vector<3x1xf32>
    %85 = arith.maximumf %83, %84 : vector<3x1xf32>
    %86 = vector.broadcast %85 : vector<3x1xf32> to vector<3x128xf32>
    %87 = arith.divf %79, %86 : vector<3x128xf32>
    %88 = arith.truncf %87 : vector<3x128xf32> to vector<3x128xbf16>
    %cst_39 = arith.constant dense<0.000000e+00> : vector<3x128xf32>
    %89 = tpu.matmul %88, %12, %cst_39 {dimension_numbers = #tpu.dot_dimension_numbers<[1], [0], [0], [1], [0, 0, 1, 1], [], []>} : vector<3x128xbf16>, vector<128x128xbf16>, vector<3x128xf32> -> vector<3x128xf32>
    %90 = vector.broadcast %13 : vector<1x128xf32> to vector<3x128xf32>
    %91 = arith.addf %89, %90 : vector<3x128xf32>
    %92 = arith.negf %91 : vector<3x128xf32>
    %93 = math.exp %92 : vector<3x128xf32>
    %cst_40 = arith.constant 1.000000e+00 : f32
    %94 = vector.broadcast %cst_40 : f32 to vector<3x128xf32>
    %95 = arith.addf %94, %93 : vector<3x128xf32>
    %96 = arith.divf %94, %95 : vector<3x128xf32>
    %97 = vector.extract_strided_slice %1 {offsets = [0, 0], sizes = [64, 128], strides = [1, 1]} : vector<192x128xf32> to vector<64x128xf32>
    %98 = vector.extract_strided_slice %27 {offsets = [64, 0], sizes = [64, 128], strides = [1, 1]} : vector<192x128xbf16> to vector<64x128xbf16>
    %99 = arith.extf %98 : vector<64x128xbf16> to vector<64x128xf32>
    %100 = vector.extract_strided_slice %27 {offsets = [128, 0], sizes = [64, 128], strides = [1, 1]} : vector<192x128xbf16> to vector<64x128xbf16>
    %101 = arith.extf %100 : vector<64x128xbf16> to vector<64x128xf32>
    %102 = arith.addf %99, %101 : vector<64x128xf32>
    %103 = vector.extract_strided_slice %96 {offsets = [0, 0], sizes = [1, 128], strides = [1, 1]} : vector<3x128xf32> to vector<1x128xf32>
    %104 = vector.broadcast %103 : vector<1x128xf32> to vector<64x128xf32>
    %105 = arith.mulf %102, %104 : vector<64x128xf32>
    %106 = arith.addf %97, %105 : vector<64x128xf32>
    %107 = arith.mulf %106, %106 : vector<64x128xf32>
    %cst_41 = arith.constant dense<0.000000e+00> : vector<64xf32>
    %108 = vector.multi_reduction <add>, %107, %cst_41 [1] : vector<64x128xf32> to vector<64xf32>
    %109 = vector.shape_cast %108 : vector<64xf32> to vector<64x1xf32>
    %110 = math.sqrt %109 : vector<64x1xf32>
    %cst_42 = arith.constant 9.99999996E-13 : f32
    %111 = vector.broadcast %cst_42 : f32 to vector<64x1xf32>
    %112 = arith.maximumf %110, %111 : vector<64x1xf32>
    %cst_43 = arith.constant 1.000000e+00 : f32
    %113 = vector.broadcast %cst_43 : f32 to vector<64x1xf32>
    %114 = arith.divf %113, %112 : vector<64x1xf32>
    %115 = vector.broadcast %114 : vector<64x1xf32> to vector<64x128xf32>
    %116 = arith.mulf %106, %115 : vector<64x128xf32>
    %117 = vector.extract_strided_slice %1 {offsets = [64, 0], sizes = [64, 128], strides = [1, 1]} : vector<192x128xf32> to vector<64x128xf32>
    %118 = vector.extract_strided_slice %27 {offsets = [128, 0], sizes = [64, 128], strides = [1, 1]} : vector<192x128xbf16> to vector<64x128xbf16>
    %119 = arith.extf %118 : vector<64x128xbf16> to vector<64x128xf32>
    %120 = vector.extract_strided_slice %27 {offsets = [0, 0], sizes = [64, 128], strides = [1, 1]} : vector<192x128xbf16> to vector<64x128xbf16>
    %121 = arith.extf %120 : vector<64x128xbf16> to vector<64x128xf32>
    %122 = arith.addf %119, %121 : vector<64x128xf32>
    %123 = vector.extract_strided_slice %96 {offsets = [1, 0], sizes = [1, 128], strides = [1, 1]} : vector<3x128xf32> to vector<1x128xf32>
    %124 = vector.broadcast %123 : vector<1x128xf32> to vector<64x128xf32>
    %125 = arith.mulf %122, %124 : vector<64x128xf32>
    %126 = arith.addf %117, %125 : vector<64x128xf32>
    %127 = arith.mulf %126, %126 : vector<64x128xf32>
    %cst_44 = arith.constant dense<0.000000e+00> : vector<64xf32>
    %128 = vector.multi_reduction <add>, %127, %cst_44 [1] : vector<64x128xf32> to vector<64xf32>
    %129 = vector.shape_cast %128 : vector<64xf32> to vector<64x1xf32>
    %130 = math.sqrt %129 : vector<64x1xf32>
    %cst_45 = arith.constant 9.99999996E-13 : f32
    %131 = vector.broadcast %cst_45 : f32 to vector<64x1xf32>
    %132 = arith.maximumf %130, %131 : vector<64x1xf32>
    %cst_46 = arith.constant 1.000000e+00 : f32
    %133 = vector.broadcast %cst_46 : f32 to vector<64x1xf32>
    %134 = arith.divf %133, %132 : vector<64x1xf32>
    %135 = vector.broadcast %134 : vector<64x1xf32> to vector<64x128xf32>
    %136 = arith.mulf %126, %135 : vector<64x128xf32>
    %137 = vector.extract_strided_slice %1 {offsets = [128, 0], sizes = [64, 128], strides = [1, 1]} : vector<192x128xf32> to vector<64x128xf32>
    %138 = vector.extract_strided_slice %27 {offsets = [0, 0], sizes = [64, 128], strides = [1, 1]} : vector<192x128xbf16> to vector<64x128xbf16>
    %139 = arith.extf %138 : vector<64x128xbf16> to vector<64x128xf32>
    %140 = vector.extract_strided_slice %27 {offsets = [64, 0], sizes = [64, 128], strides = [1, 1]} : vector<192x128xbf16> to vector<64x128xbf16>
    %141 = arith.extf %140 : vector<64x128xbf16> to vector<64x128xf32>
    %142 = arith.addf %139, %141 : vector<64x128xf32>
    %143 = vector.extract_strided_slice %96 {offsets = [2, 0], sizes = [1, 128], strides = [1, 1]} : vector<3x128xf32> to vector<1x128xf32>
    %144 = vector.broadcast %143 : vector<1x128xf32> to vector<64x128xf32>
    %145 = arith.mulf %142, %144 : vector<64x128xf32>
    %146 = arith.addf %137, %145 : vector<64x128xf32>
    %147 = arith.mulf %146, %146 : vector<64x128xf32>
    %cst_47 = arith.constant dense<0.000000e+00> : vector<64xf32>
    %148 = vector.multi_reduction <add>, %147, %cst_47 [1] : vector<64x128xf32> to vector<64xf32>
    %149 = vector.shape_cast %148 : vector<64xf32> to vector<64x1xf32>
    %150 = math.sqrt %149 : vector<64x1xf32>
    %cst_48 = arith.constant 9.99999996E-13 : f32
    %151 = vector.broadcast %cst_48 : f32 to vector<64x1xf32>
    %152 = arith.maximumf %150, %151 : vector<64x1xf32>
    %cst_49 = arith.constant 1.000000e+00 : f32
    %153 = vector.broadcast %cst_49 : f32 to vector<64x1xf32>
    %154 = arith.divf %153, %152 : vector<64x1xf32>
    %155 = vector.broadcast %154 : vector<64x1xf32> to vector<64x128xf32>
    %156 = arith.mulf %146, %155 : vector<64x128xf32>
    %c0_50 = arith.constant 0 : index
    %c0_51 = arith.constant 0 : index
    %157 = vector.load %arg12[%c0_50, %c0_51] : memref<192x128xf32, #tpu.memory_space<vmem>>, vector<64x128xf32>
    tpu.vector_store %arg12[%c0_50, %c0_51], %116 {strides = array<i32>} : memref<192x128xf32, #tpu.memory_space<vmem>>, vector<64x128xf32>,
    %c64 = arith.constant 64 : index
    %c0_52 = arith.constant 0 : index
    %158 = vector.load %arg12[%c64, %c0_52] : memref<192x128xf32, #tpu.memory_space<vmem>>, vector<64x128xf32>
    tpu.vector_store %arg12[%c64, %c0_52], %136 {strides = array<i32>} : memref<192x128xf32, #tpu.memory_space<vmem>>, vector<64x128xf32>,
    %c128 = arith.constant 128 : index
    %c0_53 = arith.constant 0 : index
    %159 = vector.load %arg12[%c128, %c0_53] : memref<192x128xf32, #tpu.memory_space<vmem>>, vector<64x128xf32>
    tpu.vector_store %arg12[%c128, %c0_53], %156 {strides = array<i32>} : memref<192x128xf32, #tpu.memory_space<vmem>>, vector<64x128xf32>,
    %c0_54 = arith.constant 0 : index
    %c0_55 = arith.constant 0 : index
    %160 = vector.load %arg12[%c0_54, %c0_55] : memref<192x128xf32, #tpu.memory_space<vmem>>, vector<192x128xf32>
    %161 = arith.truncf %160 : vector<192x128xf32> to vector<192x128xbf16>
    %cst_56 = arith.constant dense<0.000000e+00> : vector<192x128xf32>
    %162 = tpu.matmul %161, %7, %cst_56 {dimension_numbers = #tpu.dot_dimension_numbers<[1], [0], [0], [1], [0, 0, 1, 1], [], []>} : vector<192x128xbf16>, vector<128x128xbf16>, vector<192x128xf32> -> vector<192x128xf32>
    %163 = vector.broadcast %8 : vector<1x128xf32> to vector<192x128xf32>
    %164 = arith.addf %162, %163 : vector<192x128xf32>
    %cst_57 = arith.constant 0.000000e+00 : f32
    %165 = vector.broadcast %cst_57 : f32 to vector<192x128xf32>
    %166 = arith.maximumf %164, %165 : vector<192x128xf32>
    %167 = arith.truncf %166 : vector<192x128xf32> to vector<192x128xbf16>
    %cst_58 = arith.constant dense<0.000000e+00> : vector<192x1xf32>
    %168 = tpu.matmul %167, %4, %cst_58 {dimension_numbers = #tpu.dot_dimension_numbers<[1], [0], [0], [1], [0, 0, 1, 1], [], []>} : vector<192x128xbf16>, vector<128x1xbf16>, vector<192x1xf32> -> vector<192x1xf32>
    %cst_59 = arith.constant dense<0.000000e+00> : vector<192x128xf32>
    %169 = tpu.matmul %161, %9, %cst_59 {dimension_numbers = #tpu.dot_dimension_numbers<[1], [0], [0], [1], [0, 0, 1, 1], [], []>} : vector<192x128xbf16>, vector<128x128xbf16>, vector<192x128xf32> -> vector<192x128xf32>
    %170 = vector.broadcast %10 : vector<1x128xf32> to vector<192x128xf32>
    %171 = arith.addf %169, %170 : vector<192x128xf32>
    %cst_60 = arith.constant 0.000000e+00 : f32
    %172 = vector.broadcast %cst_60 : f32 to vector<192x128xf32>
    %173 = arith.maximumf %171, %172 : vector<192x128xf32>
    %174 = arith.truncf %173 : vector<192x128xf32> to vector<192x128xbf16>
    %175 = vector.extract_strided_slice %168 {offsets = [0, 0], sizes = [64, 1], strides = [1, 1]} : vector<192x1xf32> to vector<64x1xf32>
    %cst_61 = arith.constant dense<0xFF800000> : vector<1xf32>
    %176 = vector.multi_reduction <maximumf>, %175, %cst_61 [0] : vector<64x1xf32> to vector<1xf32>
    %177 = vector.shape_cast %176 : vector<1xf32> to vector<1x1xf32>
    %178 = vector.broadcast %177 : vector<1x1xf32> to vector<64x1xf32>
    %179 = arith.subf %175, %178 : vector<64x1xf32>
    %180 = math.exp %179 : vector<64x1xf32>
    %cst_62 = arith.constant dense<0.000000e+00> : vector<1xf32>
    %181 = vector.multi_reduction <add>, %180, %cst_62 [0] : vector<64x1xf32> to vector<1xf32>
    %182 = vector.shape_cast %181 : vector<1xf32> to vector<1x1xf32>
    %183 = vector.broadcast %182 : vector<1x1xf32> to vector<64x1xf32>
    %184 = arith.divf %180, %183 : vector<64x1xf32>
    %185 = vector.extract_strided_slice %160 {offsets = [0, 0], sizes = [64, 128], strides = [1, 1]} : vector<192x128xf32> to vector<64x128xf32>
    %186 = vector.broadcast %184 : vector<64x1xf32> to vector<64x128xf32>
    %187 = arith.mulf %186, %185 : vector<64x128xf32>
    %cst_63 = arith.constant dense<0.000000e+00> : vector<128xf32>
    %188 = vector.multi_reduction <add>, %187, %cst_63 [0] : vector<64x128xf32> to vector<128xf32>
    %189 = vector.shape_cast %188 : vector<128xf32> to vector<1x128xf32>
    %190 = vector.extract_strided_slice %168 {offsets = [64, 0], sizes = [64, 1], strides = [1, 1]} : vector<192x1xf32> to vector<64x1xf32>
    %cst_64 = arith.constant dense<0xFF800000> : vector<1xf32>
    %191 = vector.multi_reduction <maximumf>, %190, %cst_64 [0] : vector<64x1xf32> to vector<1xf32>
    %192 = vector.shape_cast %191 : vector<1xf32> to vector<1x1xf32>
    %193 = vector.broadcast %192 : vector<1x1xf32> to vector<64x1xf32>
    %194 = arith.subf %190, %193 : vector<64x1xf32>
    %195 = math.exp %194 : vector<64x1xf32>
    %cst_65 = arith.constant dense<0.000000e+00> : vector<1xf32>
    %196 = vector.multi_reduction <add>, %195, %cst_65 [0] : vector<64x1xf32> to vector<1xf32>
    %197 = vector.shape_cast %196 : vector<1xf32> to vector<1x1xf32>
    %198 = vector.broadcast %197 : vector<1x1xf32> to vector<64x1xf32>
    %199 = arith.divf %195, %198 : vector<64x1xf32>
    %200 = vector.extract_strided_slice %160 {offsets = [64, 0], sizes = [64, 128], strides = [1, 1]} : vector<192x128xf32> to vector<64x128xf32>
    %201 = vector.broadcast %199 : vector<64x1xf32> to vector<64x128xf32>
    %202 = arith.mulf %201, %200 : vector<64x128xf32>
    %cst_66 = arith.constant dense<0.000000e+00> : vector<128xf32>
    %203 = vector.multi_reduction <add>, %202, %cst_66 [0] : vector<64x128xf32> to vector<128xf32>
    %204 = vector.shape_cast %203 : vector<128xf32> to vector<1x128xf32>
    %205 = vector.extract_strided_slice %168 {offsets = [128, 0], sizes = [64, 1], strides = [1, 1]} : vector<192x1xf32> to vector<64x1xf32>
    %cst_67 = arith.constant dense<0xFF800000> : vector<1xf32>
    %206 = vector.multi_reduction <maximumf>, %205, %cst_67 [0] : vector<64x1xf32> to vector<1xf32>
    %207 = vector.shape_cast %206 : vector<1xf32> to vector<1x1xf32>
    %208 = vector.broadcast %207 : vector<1x1xf32> to vector<64x1xf32>
    %209 = arith.subf %205, %208 : vector<64x1xf32>
    %210 = math.exp %209 : vector<64x1xf32>
    %cst_68 = arith.constant dense<0.000000e+00> : vector<1xf32>
    %211 = vector.multi_reduction <add>, %210, %cst_68 [0] : vector<64x1xf32> to vector<1xf32>
    %212 = vector.shape_cast %211 : vector<1xf32> to vector<1x1xf32>
    %213 = vector.broadcast %212 : vector<1x1xf32> to vector<64x1xf32>
    %214 = arith.divf %210, %213 : vector<64x1xf32>
    %215 = vector.extract_strided_slice %160 {offsets = [128, 0], sizes = [64, 128], strides = [1, 1]} : vector<192x128xf32> to vector<64x128xf32>
    %216 = vector.broadcast %214 : vector<64x1xf32> to vector<64x128xf32>
    %217 = arith.mulf %216, %215 : vector<64x128xf32>
    %cst_69 = arith.constant dense<0.000000e+00> : vector<128xf32>
    %218 = vector.multi_reduction <add>, %217, %cst_69 [0] : vector<64x128xf32> to vector<128xf32>
    %219 = vector.shape_cast %218 : vector<128xf32> to vector<1x128xf32>
    %220 = tpu.concatenate %189, %204, %219 in 0 : vector<1x128xf32>, vector<1x128xf32>, vector<1x128xf32> -> vector<3x128xf32>
    %221 = arith.truncf %220 : vector<3x128xf32> to vector<3x128xbf16>
    %cst_70 = arith.constant dense<0.000000e+00> : vector<3x128xf32>
    %222 = tpu.matmul %221, %11, %cst_70 {dimension_numbers = #tpu.dot_dimension_numbers<[1], [0], [0], [1], [0, 0, 1, 1], [], []>} : vector<3x128xbf16>, vector<128x128xbf16>, vector<3x128xf32> -> vector<3x128xf32>
    %223 = vector.broadcast %6 : vector<1x128xf32> to vector<3x128xf32>
    %224 = arith.addf %222, %223 : vector<3x128xf32>
    %cst_71 = arith.constant 0.000000e+00 : f32
    %225 = vector.broadcast %cst_71 : f32 to vector<3x128xf32>
    %226 = arith.maximumf %224, %225 : vector<3x128xf32>
    %227 = arith.mulf %226, %226 : vector<3x128xf32>
    %cst_72 = arith.constant dense<0.000000e+00> : vector<3xf32>
    %228 = vector.multi_reduction <add>, %227, %cst_72 [1] : vector<3x128xf32> to vector<3xf32>
    %229 = vector.shape_cast %228 : vector<3xf32> to vector<3x1xf32>
    %230 = math.sqrt %229 : vector<3x1xf32>
    %cst_73 = arith.constant 9.99999996E-13 : f32
    %231 = vector.broadcast %cst_73 : f32 to vector<3x1xf32>
    %232 = arith.maximumf %230, %231 : vector<3x1xf32>
    %233 = vector.broadcast %232 : vector<3x1xf32> to vector<3x128xf32>
    %234 = arith.divf %226, %233 : vector<3x128xf32>
    %235 = arith.truncf %234 : vector<3x128xf32> to vector<3x128xbf16>
    %cst_74 = arith.constant dense<0.000000e+00> : vector<3x128xf32>
    %236 = tpu.matmul %235, %12, %cst_74 {dimension_numbers = #tpu.dot_dimension_numbers<[1], [0], [0], [1], [0, 0, 1, 1], [], []>} : vector<3x128xbf16>, vector<128x128xbf16>, vector<3x128xf32> -> vector<3x128xf32>
    %237 = vector.broadcast %13 : vector<1x128xf32> to vector<3x128xf32>
    %238 = arith.addf %236, %237 : vector<3x128xf32>
    %239 = arith.negf %238 : vector<3x128xf32>
    %240 = math.exp %239 : vector<3x128xf32>
    %cst_75 = arith.constant 1.000000e+00 : f32
    %241 = vector.broadcast %cst_75 : f32 to vector<3x128xf32>
    %242 = arith.addf %241, %240 : vector<3x128xf32>
    %243 = arith.divf %241, %242 : vector<3x128xf32>
    %244 = vector.extract_strided_slice %160 {offsets = [0, 0], sizes = [64, 128], strides = [1, 1]} : vector<192x128xf32> to vector<64x128xf32>
    %245 = vector.extract_strided_slice %174 {offsets = [64, 0], sizes = [64, 128], strides = [1, 1]} : vector<192x128xbf16> to vector<64x128xbf16>
    %246 = arith.extf %245 : vector<64x128xbf16> to vector<64x128xf32>
    %247 = vector.extract_strided_slice %174 {offsets = [128, 0], sizes = [64, 128], strides = [1, 1]} : vector<192x128xbf16> to vector<64x128xbf16>
    %248 = arith.extf %247 : vector<64x128xbf16> to vector<64x128xf32>
    %249 = arith.addf %246, %248 : vector<64x128xf32>
    %250 = vector.extract_strided_slice %243 {offsets = [0, 0], sizes = [1, 128], strides = [1, 1]} : vector<3x128xf32> to vector<1x128xf32>
    %251 = vector.broadcast %250 : vector<1x128xf32> to vector<64x128xf32>
    %252 = arith.mulf %249, %251 : vector<64x128xf32>
    %253 = arith.addf %244, %252 : vector<64x128xf32>
    %254 = arith.mulf %253, %253 : vector<64x128xf32>
    %cst_76 = arith.constant dense<0.000000e+00> : vector<64xf32>
    %255 = vector.multi_reduction <add>, %254, %cst_76 [1] : vector<64x128xf32> to vector<64xf32>
    %256 = vector.shape_cast %255 : vector<64xf32> to vector<64x1xf32>
    %257 = math.sqrt %256 : vector<64x1xf32>
    %cst_77 = arith.constant 9.99999996E-13 : f32
    %258 = vector.broadcast %cst_77 : f32 to vector<64x1xf32>
    %259 = arith.maximumf %257, %258 : vector<64x1xf32>
    %cst_78 = arith.constant 1.000000e+00 : f32
    %260 = vector.broadcast %cst_78 : f32 to vector<64x1xf32>
    %261 = arith.divf %260, %259 : vector<64x1xf32>
    %262 = vector.broadcast %261 : vector<64x1xf32> to vector<64x128xf32>
    %263 = arith.mulf %253, %262 : vector<64x128xf32>
    %264 = vector.extract_strided_slice %160 {offsets = [64, 0], sizes = [64, 128], strides = [1, 1]} : vector<192x128xf32> to vector<64x128xf32>
    %265 = vector.extract_strided_slice %174 {offsets = [128, 0], sizes = [64, 128], strides = [1, 1]} : vector<192x128xbf16> to vector<64x128xbf16>
    %266 = arith.extf %265 : vector<64x128xbf16> to vector<64x128xf32>
    %267 = vector.extract_strided_slice %174 {offsets = [0, 0], sizes = [64, 128], strides = [1, 1]} : vector<192x128xbf16> to vector<64x128xbf16>
    %268 = arith.extf %267 : vector<64x128xbf16> to vector<64x128xf32>
    %269 = arith.addf %266, %268 : vector<64x128xf32>
    %270 = vector.extract_strided_slice %243 {offsets = [1, 0], sizes = [1, 128], strides = [1, 1]} : vector<3x128xf32> to vector<1x128xf32>
    %271 = vector.broadcast %270 : vector<1x128xf32> to vector<64x128xf32>
    %272 = arith.mulf %269, %271 : vector<64x128xf32>
    %273 = arith.addf %264, %272 : vector<64x128xf32>
    %274 = arith.mulf %273, %273 : vector<64x128xf32>
    %cst_79 = arith.constant dense<0.000000e+00> : vector<64xf32>
    %275 = vector.multi_reduction <add>, %274, %cst_79 [1] : vector<64x128xf32> to vector<64xf32>
    %276 = vector.shape_cast %275 : vector<64xf32> to vector<64x1xf32>
    %277 = math.sqrt %276 : vector<64x1xf32>
    %cst_80 = arith.constant 9.99999996E-13 : f32
    %278 = vector.broadcast %cst_80 : f32 to vector<64x1xf32>
    %279 = arith.maximumf %277, %278 : vector<64x1xf32>
    %cst_81 = arith.constant 1.000000e+00 : f32
    %280 = vector.broadcast %cst_81 : f32 to vector<64x1xf32>
    %281 = arith.divf %280, %279 : vector<64x1xf32>
    %282 = vector.broadcast %281 : vector<64x1xf32> to vector<64x128xf32>
    %283 = arith.mulf %273, %282 : vector<64x128xf32>
    %284 = vector.extract_strided_slice %160 {offsets = [128, 0], sizes = [64, 128], strides = [1, 1]} : vector<192x128xf32> to vector<64x128xf32>
    %285 = vector.extract_strided_slice %174 {offsets = [0, 0], sizes = [64, 128], strides = [1, 1]} : vector<192x128xbf16> to vector<64x128xbf16>
    %286 = arith.extf %285 : vector<64x128xbf16> to vector<64x128xf32>
    %287 = vector.extract_strided_slice %174 {offsets = [64, 0], sizes = [64, 128], strides = [1, 1]} : vector<192x128xbf16> to vector<64x128xbf16>
    %288 = arith.extf %287 : vector<64x128xbf16> to vector<64x128xf32>
    %289 = arith.addf %286, %288 : vector<64x128xf32>
    %290 = vector.extract_strided_slice %243 {offsets = [2, 0], sizes = [1, 128], strides = [1, 1]} : vector<3x128xf32> to vector<1x128xf32>
    %291 = vector.broadcast %290 : vector<1x128xf32> to vector<64x128xf32>
    %292 = arith.mulf %289, %291 : vector<64x128xf32>
    %293 = arith.addf %284, %292 : vector<64x128xf32>
    %294 = arith.mulf %293, %293 : vector<64x128xf32>
    %cst_82 = arith.constant dense<0.000000e+00> : vector<64xf32>
    %295 = vector.multi_reduction <add>, %294, %cst_82 [1] : vector<64x128xf32> to vector<64xf32>
    %296 = vector.shape_cast %295 : vector<64xf32> to vector<64x1xf32>
    %297 = math.sqrt %296 : vector<64x1xf32>
    %cst_83 = arith.constant 9.99999996E-13 : f32
    %298 = vector.broadcast %cst_83 : f32 to vector<64x1xf32>
    %299 = arith.maximumf %297, %298 : vector<64x1xf32>
    %cst_84 = arith.constant 1.000000e+00 : f32
    %300 = vector.broadcast %cst_84 : f32 to vector<64x1xf32>
    %301 = arith.divf %300, %299 : vector<64x1xf32>
    %302 = vector.broadcast %301 : vector<64x1xf32> to vector<64x128xf32>
    %303 = arith.mulf %293, %302 : vector<64x128xf32>
    %304 = arith.addf %263, %283 : vector<64x128xf32>
    %305 = arith.addf %304, %303 : vector<64x128xf32>
    %c0_85 = arith.constant 0 : index
    %c0_86 = arith.constant 0 : index
    %c0_87 = arith.constant 0 : index
    %306 = vector.load %arg11[%c0_85, %c0_86, %c0_87] : memref<1x64x128xf32, #tpu.memory_space<vmem>>, vector<1x64x128xf32>
    %307 = vector.shape_cast %306 : vector<1x64x128xf32> to vector<64x128xf32>
    %308 = vector.shape_cast %305 : vector<64x128xf32> to vector<1x64x128xf32>
    tpu.vector_store %arg11[%c0_85, %c0_86, %c0_87], %308 {strides = array<i32>} : memref<1x64x128xf32, #tpu.memory_space<vmem>>, vector<1x64x128xf32>,
    return
  }
  func.func @transform_0(%arg0: i32) -> (i32, i32, i32) {
    %c0_i32 = arith.constant 0 : i32
    %c0_i32_0 = arith.constant 0 : i32
    %c0_i32_1 = arith.constant 0 : i32
    return %arg0, %c0_i32, %c0_i32_0 : i32, i32, i32
  }
  func.func @transform_1(%arg0: i32) -> (i32, i32, i32) {
    %c0_i32 = arith.constant 0 : i32
    %c0_i32_0 = arith.constant 0 : i32
    %c0_i32_1 = arith.constant 0 : i32
    return %arg0, %c0_i32, %c0_i32_0 : i32, i32, i32
  }
  func.func @transform_2(%arg0: i32) -> (i32, i32, i32) {
    %c0_i32 = arith.constant 0 : i32
    %c0_i32_0 = arith.constant 0 : i32
    %c0_i32_1 = arith.constant 0 : i32
    return %arg0, %c0_i32, %c0_i32_0 : i32, i32, i32
  }
  func.func @transform_3(%arg0: i32) -> (i32, i32) {
    %c0_i32 = arith.constant 0 : i32
    %c0_i32_0 = arith.constant 0 : i32
    %c0_i32_1 = arith.constant 0 : i32
    return %c0_i32, %c0_i32_0 : i32, i32
  }
  func.func @transform_4(%arg0: i32) -> (i32, i32) {
    %c0_i32 = arith.constant 0 : i32
    %c0_i32_0 = arith.constant 0 : i32
    %c0_i32_1 = arith.constant 0 : i32
    return %c0_i32, %c0_i32_0 : i32, i32
  }
  func.func @transform_5(%arg0: i32) -> (i32, i32) {
    %c0_i32 = arith.constant 0 : i32
    %c0_i32_0 = arith.constant 0 : i32
    %c0_i32_1 = arith.constant 0 : i32
    return %c0_i32, %c0_i32_0 : i32, i32
  }
  func.func @transform_6(%arg0: i32) -> (i32, i32) {
    %c0_i32 = arith.constant 0 : i32
    %c0_i32_0 = arith.constant 0 : i32
    %c0_i32_1 = arith.constant 0 : i32
    return %c0_i32, %c0_i32_0 : i32, i32
  }
  func.func @transform_7(%arg0: i32) -> (i32, i32) {
    %c0_i32 = arith.constant 0 : i32
    %c0_i32_0 = arith.constant 0 : i32
    %c0_i32_1 = arith.constant 0 : i32
    return %c0_i32, %c0_i32_0 : i32, i32
  }
  func.func @transform_8(%arg0: i32) -> (i32, i32) {
    %c0_i32 = arith.constant 0 : i32
    %c0_i32_0 = arith.constant 0 : i32
    %c0_i32_1 = arith.constant 0 : i32
    return %c0_i32, %c0_i32_0 : i32, i32
  }
  func.func @transform_9(%arg0: i32) -> (i32, i32) {
    %c0_i32 = arith.constant 0 : i32
    %c0_i32_0 = arith.constant 0 : i32
    %c0_i32_1 = arith.constant 0 : i32
    return %c0_i32, %c0_i32_0 : i32, i32
  }
  func.func @transform_10(%arg0: i32) -> (i32, i32, i32) {
    %c0_i32 = arith.constant 0 : i32
    %c0_i32_0 = arith.constant 0 : i32
    %c0_i32_1 = arith.constant 0 : i32
    return %arg0, %c0_i32, %c0_i32_0 : i32, i32, i32
  }
}

</mosaic_0001>

<bundles_post_ra>
// kernel: tgfe_forward.1
= control target key start
LH: loop header
LB: loop body
LE: loop exit
PB: predicated region body
PF: predicated region fallthrough
CT: control target
= control target key end

     0   :  { %15 = vsyncpa [#allocation4], 0  ;;  %s7274_s0 = inlined_call_operand.vmem [shape: f32[2,192,128], index: 0, kind: input, shape index: {}]   ;;  %s7275_s1 = inlined_call_operand.vmem [shape: f32[2,128,1], index: 1, kind: input, shape index: {}]   ;;  %s7276_s2 = inlined_call_operand.vmem [shape: f32[2,1,128], index: 2, kind: input, shape index: {}]   ;;  %s7277_s3 = inlined_call_operand.vmem [shape: bf16[128,128], index: 3, kind: input, shape index: {}]   ;;  %s7278_s4 = inlined_call_operand.vmem [shape: f32[1,128], index: 4, kind: input, shape index: {}]   ;;  %s7279_s5 = inlined_call_operand.vmem [shape: bf16[128,128], index: 5, kind: input, shape index: {}]   ;;  %s7280_s6 = inlined_call_operand.vmem [shape: f32[1,128], index: 6, kind: input, shape index: {}]   ;;  %s7281_s7 = inlined_call_operand.vmem [shape: bf16[128,128], index: 7, kind: input, shape index: {}]   ;;  %s7282_s8 = inlined_call_operand.vmem [shape: bf16[128,128], index: 8, kind: input, shape index: {}]   ;;  %s7283_s9 = inlined_call_operand.vmem [shape: f32[1,128], index: 9, kind: input, shape index: {}]   ;;  %s7284_s10 = inlined_call_operand.hbm [shape: f32[2,64,128], index: 10, kind: output, shape index: {}]  }
   0x1   :  { %17 = vsyncpa [#allocation4 + $0x1], 0  ;;  %s4861_s13 = smov 0   ;;  %s4863_s14 = smov 0  }
   0x2   :  { %s4865_s15 = smov 0   ;;  %s4867_s16 = smov 0  }
   0x3 LB: > { %s4882_s17 = sadd.s32 4294967295, %s4798_s16   ;;  %s3754_s18 = sadd.s32 4294967294, %s4798_s16   ;;  %s4798_s16 = sphi %s4867_s16, %s7358_s16   ;;  %s4794_s15 = sphi %s4865_s15, %s7357_s15   ;;  %s4790_s14 = sphi %s4863_s14, %s7356_s14   ;;  %s4786_s13 = sphi %s4861_s13, %s7355_s13  }
   0x4   : > { %s4886_s19 = sadd.s32 1, %s4798_s16   ;;  %s255_s20 = sadd.s32 1, %s4794_s15 }
   0x5   : > { %s252_s21 = ssub.s32 %s4798_s16, %s4886_s19  ;;  %p265_p0 = scmp.ne.s32.totalorder %s4794_s15, %s4790_s14 }
   0x6   : > { %p253_p1 = scmp.eq.s32.totalorder %s252_s21, 0  ;;  %p266_p2 = scmp.eq.s32.totalorder %s4882_s17, 1 }
   0x7   : > { %p271_p3 = scmp.ne.s32.totalorder %s4790_s14, %s4786_s13  ;;  %p272_p4 = scmp.eq.s32.totalorder %s3754_s18, 1 }
   0x8   : > { %s4897_s22 = scalar_select %p253_p1, %s4794_s15, %s255_s20  }
   0x9   : > { %p4899_p5 = por %p266_p2, %p265_p0  ;;  %p4903_p6 = por %p272_p4, %p271_p3 }
   0xa   : > { %p3757_p7 = scmp.ge.s32.totalorder %s4798_s16, 1  ;;  %p333_p8 = scmp.lt.s32.totalorder %s4798_s16, 3 }
   0xc   : > { %p334_p9 = pnand %p3757_p7, %p333_p8 }
   0xe   : > { %337 = sbr.rel (%p334_p9) target bundleno = 3082 (0xc0a), region = 60 }
  0x13   : > { %v4330_v0 = vld [vmem:[%s7277_s3 + $0x38] sm:$0xff]   ;;  %p379_p10 = scmp.lt.s32.totalorder %s4882_s17, 1  ;;  %v4331_v1 = vld [vmem:[%s7277_s3 + $0x30] sm:$0xff]   ;;  %v4332_v2 = vld [vmem:[%s7277_s3 + $0x28] sm:$0xff]   ;;  %vm1088_vm0 = vcmask 7168   ;;  %vm4802_vm1 = vmmov 0  }
  0x14   : > { %3963 = vmatprep.subr.bf16.mxu0 %v4330_v0  ;;  %v4333_v3 = vld [vmem:[%s7277_s3 + $0x20] sm:$0xff]   ;;  %v4334_v7 = vld [vmem:[%s7277_s3 + $0x18] sm:$0xff]   ;;  %v4335_v8 = vld [vmem:[%s7277_s3 + $0x10] sm:$0xff]   ;;  %vm1497_vm2 = vcmask 1040384   ;;  %vm1499_vm3 = vcmask 1041408   ;;  %vm7301_vm4 = vcmask 1042432  }
  0x15   : > { %s4917_s29 = scalar_select %p379_p10, %s4882_s17, 1  ;;  %3964 = vmatpush3.bf16.msra.mxu0 %v4330_v0  ;;  %v4336_v17 = vld [vmem:[%s7277_s3 + $0x8] sm:$0xff]   ;;  %v4337_v21 = vld [vmem:[%s7277_s3] sm:$0xff]  }
  0x16   : > { %3965 = vmatprep.subr.bf16.mxu0 %v4331_v1  ;;  %s3806_s26 = sshll.u32 %s4882_s17, 10 }
  0x17   : > { %s4283_s12 = smul.u32 192, %s4917_s29  ;;  %s3805_s27 = sshll.u32 %s4917_s29, 7 }
  0x18   : > { %s4943_s18 = scalar_lea.vmem %s7275_s1, %s3805_s27  ;;  %s5517_s28 = scalar_lea.vmem %s7276_s2, %s4917_s29 }
  0x19   : > { %s4926_s21 = scalar_lea.vmem %s7274_s0, %s4283_s12  ;;  %3966 = vmatpush3.bf16.msra.mxu0 %v4331_v1  ;;  %v431_v9 = vld [vmem:[%s4943_s18 + $0x70] sm:$0xff]  ;;  %v432_v10 = vld [vmem:[%s4943_s18 + $0x78] sm:$0xff]  ;;  %v429_v11 = vld [vmem:[%s4943_s18 + $0x60] sm:$0xff] }
  0x1a   : > { %3967 = vmatprep.subr.bf16.mxu0 %v4332_v2  ;;  %v393_v4 = vld [vmem:[%s4926_s21] sm:$0xff]  ;;  %v394_v5 = vld [vmem:[%s4926_s21 + $0x8] sm:$0xff]  ;;  %v4951_v12 = vpack.c.bf16 %v432_v10, %v431_v9  ;;  %v427_v15 = vld [vmem:[%s4943_s18 + $0x50] sm:$0xff] }
  0x1b   : > { %v4933_v6 = vpack.c.bf16 %v394_v5, %v393_v4  ;;  %v430_v13 = vld [vmem:[%s4943_s18 + $0x68] sm:$0xff]  ;;  %v428_v16 = vld [vmem:[%s4943_s18 + $0x58] sm:$0xff]  ;;  %v425_v18 = vld [vmem:[%s4943_s18 + $0x40] sm:$0xff] }
  0x1c   : > { %7319 = vst [vmem:[#allocation6_spill] sm:$0xff] %v4951_v12  ;;  %v4954_v14 = vpack.c.bf16 %v430_v13, %v429_v11  ;;  %4003 = vmatprep.subr.bf16.mxu1 %v4951_v12  ;;  %v426_v19 = vld [vmem:[%s4943_s18 + $0x48] sm:$0xff]  ;;  %v4966_v20 = vpack.c.bf16 %v428_v16, %v427_v15  ;;  %v423_v22 = vld [vmem:[%s4943_s18 + $0x30] sm:$0xff]  ;;  %v424_v23 = vld [vmem:[%s4943_s18 + $0x38] sm:$0xff] }
  0x1d   : > { %3968 = vmatpush3.bf16.msra.mxu0 %v4332_v2  ;;  %3979 = vmatprep.mubr.bf16.mxu0 %v4933_v6  ;;  %v395_v24 = vld [vmem:[%s4926_s21 + $0x10] sm:$0xff]  ;;  %v396_v25 = vld [vmem:[%s4926_s21 + $0x18] sm:$0xff]  ;;  %v4977_v26 = vpack.c.bf16 %v426_v19, %v425_v18  ;;  %v397_v27 = vld [vmem:[%s4926_s21 + $0x20] sm:$0xff]  ;;  %v4983_v29 = vpack.c.bf16 %v424_v23, %v423_v22 }
  0x1e   : > { %3969 = vmatprep.subr.bf16.mxu0 %v4333_v3  ;;  %7320 = vst [vmem:[#allocation7_spill] sm:$0xff] %v4954_v14  ;;  %4004 = vmatpush3.bf16.msra.mxu1 %v4951_v12  ;;  %7321 = vst [vmem:[#allocation8_spill] sm:$0xff] %v4966_v20  ;;  %v398_v28 = vld [vmem:[%s4926_s21 + $0x28] sm:$0xff]  ;;  %v4985_v30 = vpack.c.bf16 %v396_v25, %v395_v24  ;;  %v4994_v32 = vld [vmem:[%s4926_s21 + $0x30] sm:$0xff] }
  0x1f   : > { %4005 = vmatprep.subr.bf16.mxu1 %v4954_v14  ;;  %7322 = vst [vmem:[#allocation9_spill] sm:$0xff] %v4977_v26  ;;  %7323 = vst [vmem:[#allocation10_spill] sm:$0xff] %v4983_v29  ;;  %v4987_v31 = vpack.c.bf16 %v398_v28, %v397_v27  ;;  %v400_v33 = vld [vmem:[%s4926_s21 + $0x38] sm:$0xff]  ;;  %v4998_v34 = vld [vmem:[%s4926_s21 + $0x40] sm:$0xff] }
  0x20   : > { %v5001_v35 = vld [vmem:[%s4926_s21 + $0x48] sm:$0xff]  ;;  %v5005_v36 = vpack.c.bf16 %v400_v33, %v4994_v32  ;;  %v5014_v38 = vld [vmem:[%s4926_s21 + $0x50] sm:$0xff]  ;;  %v5017_v39 = vld [vmem:[%s4926_s21 + $0x58] sm:$0xff] }
  0x21   : > { %3970 = vmatpush3.bf16.msra.mxu0 %v4333_v3  ;;  %v5009_v37 = vpack.c.bf16 %v5001_v35, %v4998_v34  ;;  %v5020_v40 = vld [vmem:[%s4926_s21 + $0x60] sm:$0xff]  ;;  %v406_v41 = vld [vmem:[%s4926_s21 + $0x68] sm:$0xff]  ;;  %v5025_v42 = vpack.c.bf16 %v5017_v39, %v5014_v38  ;;  %v407_v44 = vld [vmem:[%s4926_s21 + $0x70] sm:$0xff] }
  0x22   : > { %3971 = vmatprep.subr.bf16.mxu0 %v4334_v7  ;;  %4006 = vmatpush3.bf16.msra.mxu1 %v4954_v14  ;;  %v5028_v43 = vpack.c.bf16 %v406_v41, %v5020_v40  ;;  %v408_v45 = vld [vmem:[%s4926_s21 + $0x78] sm:$0xff]  ;;  %v5035_v46 = vld [vmem:[%s4926_s21 + $0x80] sm:$0xff]  ;;  %v5038_v47 = vld [vmem:[%s4926_s21 + $0x88] sm:$0xff] }
  0x23   : > { %4007 = vmatprep.subr.bf16.mxu1 %v4966_v20  ;;  %v5040_v48 = vpack.c.bf16 %v408_v45, %v407_v44  ;;  %v5044_v49 = vpack.c.bf16 %v5038_v47, %v5035_v46  ;;  %v5049_v50 = vld [vmem:[%s4926_s21 + $0x90] sm:$0xff]  ;;  %v5052_v51 = vld [vmem:[%s4926_s21 + $0x98] sm:$0xff]  ;;  %v5055_v52 = vld [vmem:[%s4926_s21 + $0xa0] sm:$0xff] }
  0x24   : > { %v414_v53 = vld [vmem:[%s4926_s21 + $0xa8] sm:$0xff]  ;;  %v5060_v54 = vpack.c.bf16 %v5052_v51, %v5049_v50  ;;  %v5068_v56 = vld [vmem:[%s4926_s21 + $0xb0] sm:$0xff]  ;;  %v416_v57 = vld [vmem:[%s4926_s21 + $0xb8] sm:$0xff] }
  0x25   : > { %3972 = vmatpush3.bf16.msra.mxu0 %v4334_v7  ;;  %v5063_v55 = vpack.c.bf16 %v414_v53, %v5055_v52  ;;  %v5072_v58 = vpack.c.bf16 %v416_v57, %v5068_v56  ;;  %v421_v59 = vld [vmem:[%s4943_s18 + $0x20] sm:$0xff]  ;;  %v422_v60 = vld [vmem:[%s4943_s18 + $0x28] sm:$0xff]  ;;  %v419_v62 = vld [vmem:[%s4943_s18 + $0x10] sm:$0xff] }
  0x26   : > { %3973 = vmatprep.subr.bf16.mxu0 %v4335_v8  ;;  %4008 = vmatpush3.bf16.msra.mxu1 %v4966_v20  ;;  %v5078_v61 = vpack.c.bf16 %v422_v60, %v421_v59  ;;  %v420_v63 = vld [vmem:[%s4943_s18 + $0x18] sm:$0xff]  ;;  %v417_v1 = vld [vmem:[%s4943_s18] sm:$0xff]  ;;  %v418_v2 = vld [vmem:[%s4943_s18 + $0x8] sm:$0xff]  ;;  %s376_s18 = sand.u32 1, %s4790_s14  }
  0x27   : > { %4009 = vmatprep.subr.bf16.mxu1 %v4977_v26  ;;  %v5084_v0 = vpack.c.bf16 %v420_v63, %v419_v62  ;;  %v5090_v3 = vpack.c.bf16 %v418_v2, %v417_v1  ;;  %s3758_s20 = sshll.u32 %s376_s18, 6  ;;  %s7234_s17 = scalar_lea.sflag [#allocation4], %s376_s18 }
  0x28   : > { %7324 = vst [vmem:[#allocation11_spill] sm:$0xff] %v5078_v61  ;;  %s7184_s25 = scalar_lea.vmem [#allocation3], %s3758_s20 }
  0x29   : > { %3974 = vmatpush3.bf16.msra.mxu0 %v4335_v8  ;;  %7325 = vst [vmem:[#allocation12_spill] sm:$0xff] %v5084_v0  ;;  %7326 = vst [vmem:[#allocation13_spill] sm:$0xff] %v5090_v3  ;;  %s3671_s27 = sshll.u32 %s7184_s25, 4  ;;  %s7228_s27 = int_to_ptr.vmem [resolvable:$true] %s3671_s27 }
  0x2a   : > { %3975 = vmatprep.subr.bf16.mxu0 %v4336_v17  ;;  %4010 = vmatpush3.bf16.msra.mxu1 %v4977_v26  ;;  %s4738_s29 = scalar_lea.vmem %s7228_s27, 1024 }
  0x2b   : > { %4011 = vmatprep.subr.bf16.mxu1 %v4983_v29  ;;  %p4739_p11 = scmp.ne.s32.totalorder %s7228_s27, %s4738_s29 }
  0x2d   : > { %3976 = vmatpush3.bf16.msra.mxu0 %v4336_v17  ;;  %p4740_p12 = pnand %p4739_p11, %p4899_p5 }
  0x2e   : > { %3977 = vmatprep.subr.bf16.mxu0 %v4337_v21  ;;  %4012 = vmatpush3.bf16.msra.mxu1 %v4983_v29 }
  0x2f   : > { %4013 = vmatprep.subr.bf16.mxu1 %v5078_v61  ;;  %p4741_p13 = pneg %p4740_p12 }
  0x31   : > { %3978 = vmatpush3.bf16.msra.mxu0 %v4337_v21 }
  0x32   : > { %4014 = vmatpush3.bf16.msra.mxu1 %v5078_v61 }
  0x33   : > { %4015 = vmatprep.subr.bf16.mxu1 %v5084_v0 }
  0x34   : > { %3980 = vmatmul.mubr.bf16.vlgmr.msra.gmra.mxu0 %v4985_v30 }
  0x35   : > { %3983 = vmatprep.mubr.bf16.mxu0 %v4987_v31 }
  0x36   : > { %4016 = vmatpush3.bf16.msra.mxu1 %v5084_v0 }
  0x37   : > { %4017 = vmatprep.subr.bf16.mxu1 %v5090_v3 }
  0x3a   : > { %4018 = vmatpush3.bf16.msra.mxu1 %v5090_v3 }
  0x3c   : > { %3984 = vmatmul.mubr.bf16.gmra.mxu0 %v5005_v36 }
  0x3d   : > { %3987 = vmatprep.mubr.bf16.mxu0 %v5009_v37 }
  0x44   : > { %3988 = vmatmul.mubr.bf16.gmra.mxu0 %v5025_v42 }
  0x45   : > { %3991 = vmatprep.mubr.bf16.mxu0 %v5028_v43 }
  0x4c   : > { %3992 = vmatmul.mubr.bf16.gmra.mxu0 %v5040_v48 }
  0x4d   : > { %3995 = vmatprep.mubr.bf16.mxu0 %v5044_v49 }
  0x54   : > { %3996 = vmatmul.mubr.bf16.gmra.mxu0 %v5060_v54 }
  0x55   : > { %3999 = vmatprep.mubr.bf16.mxu0 %v5063_v55 }
  0x5c   : > { %4000 = vmatmul.mubr.bf16.gmra.mxu0 %v5072_v58 }
  0x5d   : > { %4059 = vmatprep.mubr.bf16.mxu0 %v4933_v6  ;;  %v5097_v6 = vld [vmem:[%s7278_s4] ss:$0 sm:$0xff] }
  0xf4   : > { %v3981_v4 = vpop.f32.mrf.mxu0 }
  0xf5   : > { %v618_v10 = vadd.f32 %v3981_v4, %v5097_v6 }
  0xf6   : > { %v609_v5 = vpop.f32.mrf.mxu0 }
  0xf7   : > { %v610_v8 = vadd.f32 %v5097_v6, %v609_v5  ;;  %v706_v19 = vmax.f32 %v618_v10, 0.0 }
  0xf8   : > { %v3982_v7 = vpop.f32.mrf.mxu0 }
  0xf9   : > { %v621_v9 = vadd.f32 %v3982_v7, %v5097_v6  ;;  %v704_v17 = vmax.f32 %v610_v8, 0.0 }
  0xfa   : > { %v612_v11 = vpop.f32.mrf.mxu0 }
  0xfb   : > { %v613_v13 = vadd.f32 %v5097_v6, %v612_v11  ;;  %v707_v15 = vmax.f32 %v621_v9, 0.0 }
  0xfc   : > { %v3985_v16 = vpop.f32.mrf.mxu0 }
  0xfd   : > { %v705_v18 = vmax.f32 %v613_v13, 0.0  ;;  %v729_v23 = vpack.c.bf16 %v707_v15, %v706_v19  ;;  %v634_v28 = vadd.f32 %v3985_v16, %v5097_v6 }
  0xfe   : > { %v625_v21 = vpop.f32.mrf.mxu0 }
  0xff   : > { %v728_v22 = vpack.c.bf16 %v705_v18, %v704_v17  ;;  %v626_v25 = vadd.f32 %v5097_v6, %v625_v21  ;;  %v710_v59 = vmax.f32 %v634_v28, 0.0 }
 0x100   : > { %v3986_v24 = vpop.f32.mrf.mxu0 }
 0x101   : > { %v637_v27 = vadd.f32 %v3986_v24, %v5097_v6  ;;  %4019 = vmatprep.mubr.bf16.mxu1 %v728_v22  ;;  %v708_v53 = vmax.f32 %v626_v25, 0.0 }
 0x102   : > { %v628_v33 = vpop.f32.mrf.mxu0  ;;  %4020 = vmatmul.mubr.bf16.vlgmr.msra.gmra.mxu1 %v729_v23 }
 0x103   : > { %v629_v41 = vadd.f32 %v5097_v6, %v628_v33  ;;  %v711_v44 = vmax.f32 %v637_v27, 0.0 }
 0x104   : > { %v3989_v45 = vpop.f32.mrf.mxu0 }
 0x105   : > { %v709_v57 = vmax.f32 %v629_v41, 0.0  ;;  %v731_v63 = vpack.c.bf16 %v711_v44, %v710_v59  ;;  %v650_v5 = vadd.f32 %v3989_v45, %v5097_v6 }
 0x106   : > { %v641_v60 = vpop.f32.mrf.mxu0 }
 0x107   : > { %v730_v62 = vpack.c.bf16 %v709_v57, %v708_v53  ;;  %v642_v2 = vadd.f32 %v5097_v6, %v641_v60  ;;  %v714_v15 = vmax.f32 %v650_v5, 0.0 }
 0x108   : > { %v3990_v1 = vpop.f32.mrf.mxu0 }
 0x109   : > { %v653_v4 = vadd.f32 %v3990_v1, %v5097_v6  ;;  %4023 = vmatprep.mubr.bf16.mxu1 %v730_v62  ;;  %v712_v11 = vmax.f32 %v642_v2, 0.0 }
 0x10a   : > { %v644_v7 = vpop.f32.mrf.mxu0  ;;  %4024 = vmatmul.mubr.bf16.gmra.mxu1 %v731_v63 }
 0x10b   : > { %v645_v8 = vadd.f32 %v5097_v6, %v644_v7  ;;  %v715_v9 = vmax.f32 %v653_v4, 0.0 }
 0x10c   : > { %v3993_v10 = vpop.f32.mrf.mxu0 }
 0x10d   : > { %v713_v13 = vmax.f32 %v645_v8, 0.0  ;;  %v733_v18 = vpack.c.bf16 %v715_v9, %v714_v15  ;;  %v666_v23 = vadd.f32 %v3993_v10, %v5097_v6 }
 0x10e   : > { %v657_v16 = vpop.f32.mrf.mxu0 }
 0x10f   : > { %v732_v17 = vpack.c.bf16 %v713_v13, %v712_v11  ;;  %v658_v21 = vadd.f32 %v5097_v6, %v657_v16  ;;  %v718_v44 = vmax.f32 %v666_v23, 0.0 }
 0x110   : > { %v3994_v19 = vpop.f32.mrf.mxu0 }
 0x111   : > { %v669_v22 = vadd.f32 %v3994_v19, %v5097_v6  ;;  %4027 = vmatprep.mubr.bf16.mxu1 %v732_v17  ;;  %v716_v33 = vmax.f32 %v658_v21, 0.0 }
 0x112   : > { %v660_v24 = vpop.f32.mrf.mxu0  ;;  %4028 = vmatmul.mubr.bf16.gmra.mxu1 %v733_v18 }
 0x113   : > { %v661_v25 = vadd.f32 %v5097_v6, %v660_v24  ;;  %v719_v27 = vmax.f32 %v669_v22, 0.0 }
 0x114   : > { %v3997_v28 = vpop.f32.mrf.mxu0 }
 0x115   : > { %v717_v41 = vmax.f32 %v661_v25, 0.0  ;;  %v735_v57 = vpack.c.bf16 %v719_v27, %v718_v44  ;;  %v682_v63 = vadd.f32 %v3997_v28, %v5097_v6 }
 0x116   : > { %v673_v45 = vpop.f32.mrf.mxu0 }
 0x117   : > { %v734_v53 = vpack.c.bf16 %v717_v41, %v716_v33  ;;  %v674_v60 = vadd.f32 %v5097_v6, %v673_v45  ;;  %v722_v9 = vmax.f32 %v682_v63, 0.0  ;;  %v4800_v33 = vmov 0  }
 0x118   : > { %v3998_v59 = vpop.f32.mrf.mxu0  ;;  %4329 = vset.pattern.permute.xlu1 %v4800_v33  ;;  %4328 = vset.pattern.permute.xlu0 %v4800_v33 }
 0x119   : > { %v685_v62 = vadd.f32 %v3998_v59, %v5097_v6  ;;  %4031 = vmatprep.mubr.bf16.mxu1 %v734_v53  ;;  %v720_v7 = vmax.f32 %v674_v60, 0.0 }
 0x11a   : > { %v676_v1 = vpop.f32.mrf.mxu0  ;;  %4032 = vmatmul.mubr.bf16.gmra.mxu1 %v735_v57 }
 0x11b   : > { %v677_v2 = vadd.f32 %v5097_v6, %v676_v1  ;;  %v723_v4 = vmax.f32 %v685_v62, 0.0 }
 0x11c   : > { %v4001_v5 = vpop.f32.mrf.mxu0 }
 0x11d   : > { %v721_v8 = vmax.f32 %v677_v2, 0.0  ;;  %v737_v13 = vpack.c.bf16 %v723_v4, %v722_v9  ;;  %v698_v18 = vadd.f32 %v4001_v5, %v5097_v6 }
 0x11e   : > { %v689_v10 = vpop.f32.mrf.mxu0 }
 0x11f   : > { %v736_v11 = vpack.c.bf16 %v721_v8, %v720_v7  ;;  %v690_v16 = vadd.f32 %v5097_v6, %v689_v10  ;;  %v726_v25 = vmax.f32 %v698_v18, 0.0 }
 0x120   : > { %v4002_v15 = vpop.f32.mrf.mxu0 }
 0x121   : > { %v701_v17 = vadd.f32 %v4002_v15, %v5097_v6  ;;  %4035 = vmatprep.mubr.bf16.mxu1 %v736_v11  ;;  %v724_v23 = vmax.f32 %v690_v16, 0.0 }
 0x122   : > { %v692_v19 = vpop.f32.mrf.mxu0  ;;  %4036 = vmatmul.mubr.bf16.gmra.mxu1 %v737_v13 }
 0x123   : > { %v693_v21 = vadd.f32 %v5097_v6, %v692_v19  ;;  %v727_v22 = vmax.f32 %v701_v17, 0.0 }
 0x125   : > { %v725_v24 = vmax.f32 %v693_v21, 0.0  ;;  %v739_v28 = vpack.c.bf16 %v727_v22, %v726_v25 }
 0x127   : > { %v738_v27 = vpack.c.bf16 %v725_v24, %v724_v23 }
 0x129   : > { %4039 = vmatprep.mubr.bf16.mxu1 %v738_v27 }
 0x12a   : > { %4040 = vmatmul.mubr.bf16.gmra.mxu1 %v739_v28 }
 0x1c2   : > { %v5123_v41 = vpop.f32.mrf.mxu1 }
 0x1c3   : > { %v1091_v5 = vsel %vm1088_vm0, %v5123_v41, -inf }
 0x1c4   : > { %v774_v44 = vpop.f32.mrf.mxu1 }
 0x1c5   : > { %v1089_v7 = vsel %vm1088_vm0, %v774_v44, -inf }
 0x1c6   : > { %v5125_v45 = vpop.f32.mrf.mxu1 }
 0x1c7   : > { %v1092_v60 = vsel %vm1088_vm0, %v5125_v45, -inf }
 0x1c8   : > { %v777_v53 = vpop.f32.mrf.mxu1 }
 0x1c9   : > { %v1090_v8 = vsel %vm1088_vm0, %v777_v53, -inf }
 0x1ca   : > { %v5127_v57 = vpop.f32.mrf.mxu1 }
 0x1cb   : > { %v1097_v62 = vsel %vm1088_vm0, %v5127_v57, -inf }
 0x1cc   : > { %v5129_v6 = vpop.f32.mrf.mxu1  ;;  %v1098_v10 = vmax.f32 %v1091_v5, %v1097_v62 }
 0x1cd   : > { %v1093_v63 = vsel %vm1088_vm0, %v5129_v6, -inf }
 0x1ce   : > { %v5131_v59 = vpop.f32.mrf.mxu1  ;;  %v1094_v11 = vmax.f32 %v1089_v7, %v1093_v63 }
 0x1cf   : > { %v1099_v1 = vsel %vm1088_vm0, %v5131_v59, -inf }
 0x1d0   : > { %v1100_v2 = vmax.f32 %v1092_v60, %v1099_v1  ;;  %v5141_v4 = vpop.f32.mrf.mxu1 }
 0x1d1   : > { %v1095_v9 = vsel %vm1088_vm0, %v5141_v4, -inf }
 0x1d2   : > { %v1096_v13 = vmax.f32 %v1090_v8, %v1095_v9  ;;  %v5149_v15 = vpop.f32.mrf.mxu1  ;;  %v1102_v16 = vmax.f32 %v1098_v10, %v1100_v2 }
 0x1d4   : > { %v1101_v17 = vmax.f32 %v1094_v11, %v1096_v13  ;;  %v5151_v18 = vpop.f32.mrf.mxu1  ;;  %v1227_v13 = vsel %vm1088_vm0, %v5149_v15, -inf }
 0x1d6   : > { %v1103_v19 = vmax.f32 %v1101_v17, %v1102_v16  ;;  %v5153_v21 = vpop.f32.mrf.mxu1  ;;  %v1225_v16 = vsel %vm1088_vm0, %v5151_v18, -inf }
 0x1d7   : > { %v1228_v1 = vsel %vm1088_vm0, %v5153_v21, -inf }
 0x1d8   : > { %v1104_v22 = vrot.slane %v1103_v19, 4  ;;  %v5155_v23 = vpop.f32.mrf.mxu1 }
 0x1d9   : > { %v1226_v8 = vsel %vm1088_vm0, %v5155_v23, -inf }
 0x1da   : > { %v1105_v24 = vmax.f32 %v1103_v19, %v1104_v22  ;;  %v5157_v25 = vpop.f32.mrf.mxu1 }
 0x1db   : > { %v1233_v2 = vsel %vm1088_vm0, %v5157_v25, -inf }
 0x1dc   : > { %v1106_v27 = vrot.slane %v1105_v24, 2  ;;  %v5159_v28 = vpop.f32.mrf.mxu1  ;;  %v1234_v22 = vmax.f32 %v1227_v13, %v1233_v2 }
 0x1dd   : > { %v1229_v5 = vsel %vm1088_vm0, %v5159_v28, -inf }
 0x1de   : > { %v1107_v33 = vmax.f32 %v1105_v24, %v1106_v27  ;;  %v5161_v60 = vpop.f32.mrf.mxu1  ;;  %v1230_v24 = vmax.f32 %v1225_v16, %v1229_v5 }
 0x1df   : > { %v1235_v62 = vsel %vm1088_vm0, %v5161_v60, -inf }
 0x1e0   : > { %v1108_v63 = vrot.slane %v1107_v33, 1  ;;  %v5171_v7 = vpop.f32.mrf.mxu1  ;;  %v1236_v9 = vmax.f32 %v1228_v1, %v1235_v62 }
 0x1e1   : > { %v1231_v10 = vsel %vm1088_vm0, %v5171_v7, -inf }
 0x1e2   : > { %v1109_v11 = vmax.f32 %v1107_v33, %v1108_v63  ;;  %v1232_v17 = vmax.f32 %v1226_v8, %v1231_v10  ;;  %v5181_v19 = vpop.f32.mrf.mxu1  ;;  %v1238_v1 = vmax.f32 %v1234_v22, %v1236_v9 }
 0x1e4   : > { %v1110_v27 = vsub.f32 %v774_v44, %v1109_v11  ;;  %v1111_v3 = vsub.f32 %v777_v53, %v1109_v11  ;;  %v1112_v0 = vsub.f32 %v5123_v41, %v1109_v11  ;;  %v5184_v62 = vpop.f32.mrf.mxu1  ;;  %v1237_v61 = vmax.f32 %v1230_v24, %v1232_v17 }
 0x1e5   : > { %v1113_v20 = vsub.f32 %v5125_v45, %v1109_v11  ;;  %v1114_v8 = vsub.f32 %v5129_v6, %v1109_v11  ;;  %v1115_v41 = vsub.f32 %v5141_v4, %v1109_v11  ;;  %v1116_v45 = vsub.f32 %v5127_v57, %v1109_v11 }
 0x1e6   : > { %v1118_v33 = vmul.f32 1.442695, %v1110_v27  ;;  %v1120_v63 = vmul.f32 1.442695, %v1111_v3  ;;  %v5186_v29 = vpop.f32.mrf.mxu1  ;;  %v1239_v26 = vmax.f32 %v1237_v61, %v1238_v1  ;;  %v1122_v10 = vmul.f32 1.442695, %v1112_v0 }
 0x1e7   : > { %v1124_v9 = vmul.f32 1.442695, %v1113_v20  ;;  %v1126_v3 = vmul.f32 1.442695, %v1114_v8  ;;  %v1128_v6 = vmul.f32 1.442695, %v1115_v41  ;;  %v1117_v22 = vsub.f32 %v5131_v59, %v1109_v11 }
 0x1e8   : > { %v5190_v2 = vpop.f32.mrf.mxu1  ;;  %4362 = vpow2.f32 %v1118_v33  ;;  %v1240_v44 = vrot.slane %v1239_v26, 4  ;;  %v1364_v0 = vsel %vm1088_vm0, %v5186_v29, -inf  ;;  %v1363_v57 = vsel %vm1088_vm0, %v5181_v19, -inf }
 0x1e9   : > { %4364 = vpow2.f32 %v1120_v63  ;;  %v1361_v33 = vsel %vm1088_vm0, %v5184_v62, -inf  ;;  %v1362_v63 = vsel %vm1088_vm0, %v5190_v2, -inf }
 0x1ea   : > { %v5193_v53 = vpop.f32.mrf.mxu1  ;;  %v1241_v5 = vmax.f32 %v1239_v26, %v1240_v44  ;;  %4366 = vpow2.f32 %v1122_v10  ;;  %v1130_v10 = vmul.f32 1.442695, %v1116_v45 }
 0x1eb   : > { %v1369_v16 = vsel %vm1088_vm0, %v5193_v53, -inf  ;;  %4368 = vpow2.f32 %v1124_v9 }
 0x1ec   : > { %v5195_v13 = vpop.f32.mrf.mxu1  ;;  %v1242_v61 = vrot.slane %v1241_v5, 2  ;;  %4370 = vpow2.f32 %v1126_v3  ;;  %v1370_v44 = vmax.f32 %v1363_v57, %v1369_v16 }
 0x1ed   : > { %v1365_v20 = vsel %vm1088_vm0, %v5195_v13, -inf  ;;  %4372 = vpow2.f32 %v1128_v6 }
 0x1ee   : > { %v5202_v4 = vpop.f32.mrf.mxu1  ;;  %v1243_v17 = vmax.f32 %v1241_v5, %v1242_v61  ;;  %v1366_v59 = vmax.f32 %v1361_v33, %v1365_v20  ;;  %v1132_v5 = vmul.f32 1.442695, %v1117_v22  ;;  %4374 = vpow2.f32 %v1130_v10 }
 0x1ef   : > { %v1371_v26 = vsel %vm1088_vm0, %v5202_v4, -inf }
 0x1f0   : > { %v1372_v24 = vmax.f32 %v1364_v0, %v1371_v26  ;;  %v5211_v27 = vpop.f32.mrf.mxu1  ;;  %v1244_v1 = vrot.slane %v1243_v17, 1  ;;  %4376 = vpow2.f32 %v1132_v5 }
 0x1f1   : > { %v1367_v8 = vsel %vm1088_vm0, %v5211_v27, -inf }
 0x1f2   : > { %v1368_v11 = vmax.f32 %v1362_v63, %v1367_v8  ;;  %v1245_v41 = vmax.f32 %v1243_v17, %v1244_v1  ;;  %v1374_v9 = vmax.f32 %v1370_v44, %v1372_v24 }
 0x1f4   : > { %v1373_v3 = vmax.f32 %v1366_v59, %v1368_v11  ;;  %v1246_v61 = vsub.f32 %v5151_v18, %v1245_v41  ;;  %v1247_v0 = vsub.f32 %v5155_v23, %v1245_v41  ;;  %v1248_v26 = vsub.f32 %v5149_v15, %v1245_v41 }
 0x1f5   : > { %v1249_v14 = vsub.f32 %v5153_v21, %v1245_v41  ;;  %v5223_v12 = vpop.eup %4362  ;;  %v1250_v45 = vsub.f32 %v5159_v28, %v1245_v41  ;;  %v1251_v18 = vsub.f32 %v5171_v7, %v1245_v41  ;;  %v1252_v15 = vsub.f32 %v5157_v25, %v1245_v41 }
 0x1f6   : > { %v5226_v16 = vpop.eup %4364  ;;  %v1254_v6 = vmul.f32 1.442695, %v1246_v61  ;;  %v1256_v17 = vmul.f32 1.442695, %v1247_v0  ;;  %v1258_v20 = vmul.f32 1.442695, %v1248_v26  ;;  %v1375_v22 = vmax.f32 %v1373_v3, %v1374_v9 }
 0x1f7   : > { %v1260_v57 = vmul.f32 1.442695, %v1249_v14  ;;  %v5229_v23 = vpop.eup %4366  ;;  %v1262_v24 = vmul.f32 1.442695, %v1250_v45  ;;  %v1134_v28 = vsel %vm1088_vm0, %v5223_v12, 0.0  ;;  %v1135_v1 = vsel %vm1088_vm0, %v5226_v16, 0.0 }
 0x1f8   : > { %4378 = vpow2.f32 %v1254_v6  ;;  %v1376_v21 = vrot.slane %v1375_v22, 4  ;;  %v1136_v63 = vadd.f32 %v1135_v1, %v1134_v28  ;;  %v5236_v8 = vpop.eup %4368  ;;  %v1253_v14 = vsub.f32 %v5161_v60, %v1245_v41 }
 0x1f9   : > { %4380 = vpow2.f32 %v1256_v17  ;;  %v1264_v7 = vmul.f32 1.442695, %v1251_v18  ;;  %v1137_v25 = vsel %vm1088_vm0, %v5229_v23, 0.0  ;;  %v5241_v10 = vpop.eup %4370  ;;  %v1266_v11 = vmul.f32 1.442695, %v1252_v15 }
 0x1fa   : > { %4382 = vpow2.f32 %v1258_v20  ;;  %v1377_v33 = vmax.f32 %v1375_v22, %v1376_v21  ;;  %v1138_v59 = vadd.f32 %v1137_v25, %v1136_v63  ;;  %v1139_v5 = vsel %vm1088_vm0, %v5236_v8, 0.0  ;;  %v5245_v61 = vpop.eup %4372 }
 0x1fb   : > { %4384 = vpow2.f32 %v1260_v57  ;;  %v1268_v60 = vmul.f32 1.442695, %v1253_v14  ;;  %v1141_v41 = vsel %vm1088_vm0, %v5241_v10, 0.0  ;;  %v5249_v45 = vpop.eup %4374  ;;  %v1143_v6 = vsel %vm1088_vm0, %v5245_v61, 0.0 }
 0x1fc   : > { %v1378_v44 = vrot.slane %v1377_v33, 2  ;;  %4386 = vpow2.f32 %v1262_v24  ;;  %v1140_v3 = vadd.f32 %v1139_v5, %v1138_v59  ;;  %v1145_v1 = vsel %vm1088_vm0, %v5249_v45, 0.0 }
 0x1fd   : > { %4388 = vpow2.f32 %v1264_v7  ;;  %v5253_v22 = vpop.eup %4376 }
 0x1fe   : > { %v1379_v9 = vmax.f32 %v1377_v33, %v1378_v44  ;;  %v1142_v26 = vadd.f32 %v1141_v41, %v1140_v3  ;;  %4390 = vpow2.f32 %v1266_v11  ;;  %v1147_v41 = vsel %vm1088_vm0, %v5253_v22, 0.0 }
 0x1ff   : > { %4392 = vpow2.f32 %v1268_v60 }
 0x200   : > { %v1380_v0 = vrot.slane %v1379_v9, 1  ;;  %v1144_v20 = vadd.f32 %v1143_v6, %v1142_v26 }
 0x202   : > { %v1381_v17 = vmax.f32 %v1379_v9, %v1380_v0 }
 0x204   : > { %v1382_v18 = vsub.f32 %v5184_v62, %v1381_v17  ;;  %v1383_v57 = vsub.f32 %v5190_v2, %v1381_v17  ;;  %v1384_v15 = vsub.f32 %v5181_v19, %v1381_v17  ;;  %v1385_v21 = vsub.f32 %v5186_v29, %v1381_v17 }
 0x205   : > { %v5259_v24 = vpop.eup %4378  ;;  %v1386_v28 = vsub.f32 %v5195_v13, %v1381_v17  ;;  %v1387_v62 = vsub.f32 %v5211_v27, %v1381_v17  ;;  %v1146_v13 = vadd.f32 %v1145_v1, %v1144_v20  ;;  %v1388_v5 = vsub.f32 %v5193_v53, %v1381_v17 }
 0x206   : > { %v5264_v33 = vpop.eup %4380  ;;  %v1270_v63 = vsel %vm1088_vm0, %v5259_v24, 0.0  ;;  %v1390_v14 = vmul.f32 1.442695, %v1382_v18  ;;  %v1392_v2 = vmul.f32 1.442695, %v1383_v57  ;;  %v1389_v60 = vsub.f32 %v5202_v4, %v1381_v17 }
 0x207   : > { %v5269_v7 = vpop.eup %4382  ;;  %v1271_v29 = vsel %vm1088_vm0, %v5264_v33, 0.0  ;;  %v1394_v19 = vmul.f32 1.442695, %v1384_v15  ;;  %v1396_v25 = vmul.f32 1.442695, %v1385_v21  ;;  %v1148_v6 = vadd.f32 %v1147_v41, %v1146_v13 }
 0x208   : > { %v5273_v44 = vpop.eup %4384  ;;  %v1272_v59 = vadd.f32 %v1271_v29, %v1270_v63  ;;  %4394 = vpow2.f32 %v1390_v14  ;;  %v1273_v11 = vsel %vm1088_vm0, %v5269_v7, 0.0  ;;  %v1398_v27 = vmul.f32 1.442695, %v1386_v28 }
 0x209   : > { %4396 = vpow2.f32 %v1392_v2  ;;  %v5278_v9 = vpop.eup %4386  ;;  %v1275_v0 = vsel %vm1088_vm0, %v5273_v44, 0.0  ;;  %v1400_v26 = vmul.f32 1.442695, %v1387_v62  ;;  %v1402_v57 = vmul.f32 1.442695, %v1388_v5 }
 0x20a   : > { %v1274_v3 = vadd.f32 %v1273_v11, %v1272_v59  ;;  %4398 = vpow2.f32 %v1394_v19  ;;  %v5285_v20 = vpop.eup %4388  ;;  %v1277_v18 = vsel %vm1088_vm0, %v5278_v9, 0.0  ;;  %v1149_v15 = vrot.slane %v1148_v6, 4 }
 0x20b   : > { %4400 = vpow2.f32 %v1396_v25  ;;  %v5289_v4 = vpop.eup %4390  ;;  %v1279_v21 = vsel %vm1088_vm0, %v5285_v20, 0.0  ;;  %v1404_v28 = vmul.f32 1.442695, %v1389_v60 }
 0x20c   : > { %v1276_v53 = vadd.f32 %v1275_v0, %v1274_v3  ;;  %4402 = vpow2.f32 %v1398_v27  ;;  %v1150_v1 = vadd.f32 %v1149_v15, %v1148_v6  ;;  %v5293_v63 = vpop.eup %4392  ;;  %v1281_v14 = vsel %vm1088_vm0, %v5289_v4, 0.0 }
 0x20d   : > { %4404 = vpow2.f32 %v1400_v26  ;;  %v1283_v19 = vsel %vm1088_vm0, %v5293_v63, 0.0 }
 0x20e   : > { %v1278_v17 = vadd.f32 %v1277_v18, %v1276_v53  ;;  %4406 = vpow2.f32 %v1402_v57  ;;  %v1151_v2 = vrot.slane %v1150_v1, 2 }
 0x20f   : > { %4408 = vpow2.f32 %v1404_v28 }
 0x210   : > { %v1280_v62 = vadd.f32 %v1279_v21, %v1278_v17  ;;  %v1152_v25 = vadd.f32 %v1151_v2, %v1150_v1 }
 0x212   : > { %v1282_v29 = vadd.f32 %v1281_v14, %v1280_v62  ;;  %v1153_v11 = vrot.slane %v1152_v25, 1 }
 0x214   : > { %v1284_v13 = vadd.f32 %v1283_v19, %v1282_v29  ;;  %v1154_v0 = vadd.f32 %v1153_v11, %v1152_v25 }
 0x215   : > { %v5299_v59 = vpop.eup %4394 }
 0x216   : > { %v5301_v5 = vpop.eup %4396  ;;  %v1285_v27 = vrot.slane %v1284_v13, 4  ;;  %v1406_v3 = vsel %vm1088_vm0, %v5299_v59, 0.0  ;;  %4410 = vrcp.f32 %v1154_v0 }
 0x217   : > { %v5305_v60 = vpop.eup %4398  ;;  %v1407_v41 = vsel %vm1088_vm0, %v5301_v5, 0.0 }
 0x218   : > { %v5309_v26 = vpop.eup %4400  ;;  %v1286_v6 = vadd.f32 %v1285_v27, %v1284_v13  ;;  %v1408_v53 = vadd.f32 %v1407_v41, %v1406_v3  ;;  %v1409_v18 = vsel %vm1088_vm0, %v5305_v60, 0.0 }
 0x219   : > { %v5313_v57 = vpop.eup %4402  ;;  %v1411_v21 = vsel %vm1088_vm0, %v5309_v26, 0.0 }
 0x21a   : > { %v1287_v15 = vrot.slane %v1286_v6, 2  ;;  %v1410_v17 = vadd.f32 %v1409_v18, %v1408_v53  ;;  %v5317_v28 = vpop.eup %4404  ;;  %v1413_v14 = vsel %vm1088_vm0, %v5313_v57, 0.0 }
 0x21b   : > { %v5321_v2 = vpop.eup %4406  ;;  %v1415_v25 = vsel %vm1088_vm0, %v5317_v28, 0.0 }
 0x21c   : > { %v1288_v1 = vadd.f32 %v1287_v15, %v1286_v6  ;;  %v1412_v62 = vadd.f32 %v1411_v21, %v1410_v17  ;;  %v5325_v13 = vpop.eup %4408  ;;  %v1417_v3 = vsel %vm1088_vm0, %v5321_v2, 0.0 }
 0x21d   : > { %v1419_v0 = vsel %vm1088_vm0, %v5325_v13, 0.0 }
 0x21e   : > { %v1289_v29 = vrot.slane %v1288_v1, 1  ;;  %v1414_v19 = vadd.f32 %v1413_v14, %v1412_v62 }
 0x220   : > { %v1290_v11 = vadd.f32 %v1289_v29, %v1288_v1  ;;  %v1416_v27 = vadd.f32 %v1415_v25, %v1414_v19 }
 0x222   : > { %4412 = vrcp.f32 %v1290_v11  ;;  %v1418_v41 = vadd.f32 %v1417_v3, %v1416_v27 }
 0x223   : > { %v4411_v53 = vpop.eup %4410 }
 0x224   : > { %v1420_v6 = vadd.f32 %v1419_v0, %v1418_v41  ;;  %v1159_v15 = vmul.f32 %v4411_v53, %v5236_v8  ;;  %v1156_v17 = vmul.f32 %v4411_v53, %v5223_v12  ;;  %v1161_v62 = vmul.f32 %v4411_v53, %v5245_v61 }
 0x225   : > { %v1157_v14 = vmul.f32 %v4411_v53, %v5226_v16  ;;  %v1163_v11 = vmul.f32 %v4411_v53, %v5253_v22  ;;  %v1158_v27 = vmul.f32 %v4411_v53, %v5229_v23  ;;  %v1160_v3 = vmul.f32 %v4411_v53, %v5241_v10 }
 0x226   : > { %v1421_v18 = vrot.slane %v1420_v6, 4  ;;  %1181 = vperm.xlu1 %4329, %v1159_v15   ;;  %1166 = vperm.xlu0 %4328, %v1156_v17   ;;  %v1162_v16 = vmul.f32 %v4411_v53, %v5249_v45 }
 0x228   : > { %v1422_v21 = vadd.f32 %v1421_v18, %v1420_v6 }
 0x22a   : > { %v1423_v1 = vrot.slane %v1422_v21, 2  ;;  %1191 = vperm.xlu1 %4329, %v1161_v62   ;;  %1171 = vperm.xlu0 %4328, %v1157_v14   ;;  %v5391_v14 = vld [vmem:[%s4926_s21 + $0x8] sm:$0xff] }
 0x22c   : > { %v1424_v29 = vadd.f32 %v1423_v1, %v1422_v21 }
 0x22e   : > { %v1425_v19 = vrot.slane %v1424_v29, 1  ;;  %1201 = vperm.xlu1 %4329, %v1163_v11   ;;  %1176 = vperm.xlu0 %4328, %v1158_v27   ;;  %v5399_v11 = vld [vmem:[%s4926_s21 + $0x10] sm:$0xff] }
 0x22f   : > { %v4413_v25 = vpop.eup %4412 }
 0x230   : > { %v1426_v8 = vadd.f32 %v1425_v19, %v1424_v29  ;;  %v1292_v12 = vmul.f32 %v4413_v25, %v5259_v24  ;;  %v1293_v61 = vmul.f32 %v4413_v25, %v5264_v33  ;;  %v1295_v22 = vmul.f32 %v4413_v25, %v5273_v44  ;;  %v4338_v33 = vld [vmem:[%s7281_s7 + $0x38] sm:$0xff]   ;;  %v5395_v19 = vld [vmem:[%s4926_s21] sm:$0xff] }
 0x231   : > { %v1294_v23 = vmul.f32 %v4413_v25, %v5269_v7  ;;  %v1297_v24 = vmul.f32 %v4413_v25, %v5285_v20  ;;  %v1296_v0 = vmul.f32 %v4413_v25, %v5278_v9  ;;  %v1298_v45 = vmul.f32 %v4413_v25, %v5289_v4  ;;  %v4339_v9 = vld [vmem:[%s7281_s7 + $0x30] sm:$0xff]  }
 0x232   : > { %4414 = vrcp.f32 %v1426_v8  ;;  %1186 = vperm.xlu0 %4328, %v1160_v3   ;;  %1302 = vperm.xlu1 %4329, %v1292_v12   ;;  %v4801_v7 = vmov 0.0   ;;  %v1299_v53 = vmul.f32 %v4413_v25, %v5293_v63  ;;  %v4344_v63 = vld [vmem:[%s7281_s7 + $0x8] sm:$0xff]  }
 0x233   : > { %4083 = vmatprep.subr.bf16.mxu1 %v4801_v7  ;;  %4099 = vmatprep.mubr.msk.bf16.mxu1 %vm4802_vm1, %v4801_v7 }
 0x234   : > { %4084 = vmatpush3.bf16.msra.mxu1 %v4338_v33 }
 0x235   : > { %4085 = vmatprep.subr.bf16.mxu1 %v4801_v7 }
 0x236   : > { %1196 = vperm.xlu0 %4328, %v1162_v16   ;;  %1307 = vperm.xlu1 %4329, %v1293_v61  }
 0x238   : > { %4086 = vmatpush3.bf16.msra.mxu1 %v4339_v9 }
 0x239   : > { %4087 = vmatprep.subr.bf16.mxu1 %v4801_v7 }
 0x23a   : > { %1317 = vperm.xlu0 %4328, %v1295_v22   ;;  %1312 = vperm.xlu1 %4329, %v1294_v23   ;;  %v5403_v23 = vld [vmem:[%s4926_s21 + $0x18] sm:$0xff] }
 0x23e   : > { %1327 = vperm.xlu0 %4328, %v1297_v24   ;;  %1322 = vperm.xlu1 %4329, %v1296_v0   ;;  %v5407_v0 = vld [vmem:[%s4926_s21 + $0x20] sm:$0xff] }
 0x23f   : > { %v4415_v41 = vpop.eup %4414 }
 0x240   : > { %v1428_v10 = vmul.f32 %v4415_v41, %v5299_v59  ;;  %v1429_v44 = vmul.f32 %v4415_v41, %v5301_v5  ;;  %v1430_v20 = vmul.f32 %v4415_v41, %v5305_v60  ;;  %v1431_v4 = vmul.f32 %v4415_v41, %v5309_v26  ;;  %v4340_v5 = vld [vmem:[%s7281_s7 + $0x28] sm:$0xff]   ;;  %v4341_v26 = vld [vmem:[%s7281_s7 + $0x20] sm:$0xff]  }
 0x241   : > { %v1432_v59 = vmul.f32 %v4415_v41, %v5313_v57  ;;  %v1433_v60 = vmul.f32 %v4415_v41, %v5317_v28  ;;  %v1434_v6 = vmul.f32 %v4415_v41, %v5321_v2  ;;  %4088 = vmatpush3.bf16.msra.mxu1 %v4340_v5  ;;  %v1435_v57 = vmul.f32 %v4415_v41, %v5325_v13  ;;  %v4342_v28 = vld [vmem:[%s7281_s7 + $0x18] sm:$0xff]   ;;  %v4343_v2 = vld [vmem:[%s7281_s7 + $0x10] sm:$0xff]   ;;  %v4345_v13 = vld [vmem:[%s7281_s7] sm:$0xff]  }
 0x242   : > { %1332 = vperm.xlu1 %4329, %v1298_v45   ;;  %1438 = vperm.xlu0 %4328, %v1428_v10  }
 0x243   : > { %4089 = vmatprep.subr.bf16.mxu1 %v4801_v7 }
 0x245   : > { %4090 = vmatpush3.bf16.msra.mxu1 %v4341_v26 }
 0x246   : > { %1443 = vperm.xlu1 %4329, %v1429_v44   ;;  %1448 = vperm.xlu0 %4328, %v1430_v20  }
 0x247   : > { %4091 = vmatprep.subr.bf16.mxu1 %v4801_v7 }
 0x249   : > { %4092 = vmatpush3.bf16.msra.mxu1 %v4342_v28 }
 0x24a   : > { %1453 = vperm.xlu1 %4329, %v1431_v4   ;;  %1458 = vperm.xlu0 %4328, %v1432_v59   ;;  %v5412_v59 = vld [vmem:[%s4926_s21 + $0x28] sm:$0xff] }
 0x24b   : > { %4093 = vmatprep.subr.bf16.mxu1 %v4801_v7 }
 0x24d   : > { %4094 = vmatpush3.bf16.msra.mxu1 %v4343_v2 }
 0x24e   : > { %1463 = vperm.xlu1 %4329, %v1433_v60   ;;  %1468 = vperm.xlu0 %4328, %v1434_v6  }
 0x24f   : > { %4095 = vmatprep.subr.bf16.mxu1 %v4801_v7 }
 0x251   : > { %4096 = vmatpush3.bf16.msra.mxu1 %v4344_v63 }
 0x252   : > { %1473 = vperm.xlu1 %4329, %v1435_v57   ;;  %1337 = vperm.xlu0 %4328, %v1299_v53  }
 0x253   : > { %4097 = vmatprep.subr.bf16.mxu1 %v4801_v7 }
 0x255   : > { %4098 = vmatpush3.bf16.msra.mxu1 %v4345_v13 }
 0x256   : > { %4103 = vmatprep.subr.bf16.mxu1 %v4801_v7 }
 0x2a1   : > { %v1182_v18 = vpop.permute.xlu1 %1181  ;;  %v1167_v15 = vpop.permute.xlu0 %1166 }
 0x2a2   : > { %v1204_v25 = vmul.f32 %v5395_v19, %v1167_v15  ;;  %v1207_v41 = vmul.f32 %v5403_v23, %v1182_v18  ;;  %v5420_v18 = vld [vmem:[%s4926_s21 + $0x38] sm:$0xff] }
 0x2a5   : > { %v1192_v17 = vpop.permute.xlu1 %1191  ;;  %v1172_v21 = vpop.permute.xlu0 %1171 }
 0x2a6   : > { %v1205_v29 = vmul.f32 %v5391_v14, %v1172_v21  ;;  %v1209_v5 = vmul.f32 %v5412_v59, %v1192_v17 }
 0x2a8   : > { %v1212_v3 = vadd.f32 %v1205_v29, %v1204_v25 }
 0x2a9   : > { %v1202_v1 = vpop.permute.xlu1 %1201  ;;  %v1177_v62 = vpop.permute.xlu0 %1176 }
 0x2aa   : > { %v1206_v27 = vmul.f32 %v5399_v11, %v1177_v62  ;;  %v1211_v15 = vmul.f32 %v5420_v18, %v1202_v1 }
 0x2ac   : > { %v1213_v16 = vadd.f32 %v1212_v3, %v1206_v27 }
 0x2ad   : > { %v1187_v8 = vpop.permute.xlu0 %1186  ;;  %v1303_v12 = vpop.permute.xlu1 %1302 }
 0x2ae   : > { %v1214_v24 = vadd.f32 %v1213_v16, %v1207_v41  ;;  %v1208_v10 = vmul.f32 %v5407_v0, %v1187_v8  ;;  %v1340_v60 = vmul.f32 %v1303_v12, %v4998_v34 }
 0x2b0   : > { %v1215_v44 = vadd.f32 %v1214_v24, %v1208_v10  ;;  %v5434_v24 = vld [vmem:[%s4926_s21 + $0x70] sm:$0xff] }
 0x2b1   : > { %v1197_v61 = vpop.permute.xlu0 %1196  ;;  %v1308_v22 = vpop.permute.xlu1 %1307 }
 0x2b2   : > { %v1341_v20 = vmul.f32 %v1308_v22, %v5001_v35  ;;  %v1216_v26 = vadd.f32 %v1215_v44, %v1209_v5  ;;  %v1210_v57 = vmul.f32 %v1197_v61, %v4994_v32  ;;  %v5429_v61 = vld [vmem:[%s4926_s21 + $0x68] sm:$0xff] }
 0x2b4   : > { %v1348_v53 = vadd.f32 %v1341_v20, %v1340_v60  ;;  %v1217_v13 = vadd.f32 %v1216_v26, %v1210_v57  ;;  %v5447_v57 = vld [vmem:[%s4926_s21 + $0x78] sm:$0xff] }
 0x2b5   : > { %v1318_v45 = vpop.permute.xlu0 %1317  ;;  %v1313_v33 = vpop.permute.xlu1 %1312 }
 0x2b6   : > { %v1342_v6 = vmul.f32 %v1313_v33, %v5014_v38  ;;  %v1343_v35 = vmul.f32 %v1318_v45, %v5017_v39  ;;  %v1218_v29 = vadd.f32 %v1217_v13, %v1211_v15  ;;  %v5438_v33 = vld [vmem:[%s4926_s21 + $0xa8] sm:$0xff] }
 0x2b8   : > { %v1349_v63 = vadd.f32 %v1348_v53, %v1342_v6  ;;  %v1219_v16 = vrot.slane %v1218_v29, 4  ;;  %v5443_v6 = vld [vmem:[%s4926_s21 + $0xb8] sm:$0xff] }
 0x2b9   : > { %v1328_v9 = vpop.permute.xlu0 %1327  ;;  %v1323_v4 = vpop.permute.xlu1 %1322 }
 0x2ba   : > { %v1350_v34 = vadd.f32 %v1349_v63, %v1343_v35  ;;  %v1344_v38 = vmul.f32 %v1323_v4, %v5020_v40  ;;  %v1345_v40 = vmul.f32 %v5429_v61, %v1328_v9  ;;  %v1220_v44 = vadd.f32 %v1219_v16, %v1218_v29  ;;  %v4346_v16 = vld [vmem:[%s7279_s5 + $0x38] sm:$0xff]  }
 0x2bb   : > { %4043 = vmatprep.subr.bf16.mxu0 %v4346_v16 }
 0x2bc   : > { %v1351_v12 = vadd.f32 %v1350_v34, %v1344_v38  ;;  %4044 = vmatpush3.bf16.msra.mxu0 %v4346_v16 }
 0x2bd   : > { %v1333_v28 = vpop.permute.xlu1 %1332  ;;  %v1439_v2 = vpop.permute.xlu0 %1438 }
 0x2be   : > { %v1476_v62 = vmul.f32 %v1439_v2, %v5035_v46  ;;  %v1346_v10 = vmul.f32 %v5434_v24, %v1333_v28  ;;  %v1221_v28 = vrot.slane %v1220_v44, 2 }
 0x2c0   : > { %v1222_v15 = vadd.f32 %v1221_v28, %v1220_v44  ;;  %v4692_v44 = vld [vmem:[%s7277_s3 + $0x28] sm:$0xff]   ;;  %v4359_v28 = vld [vmem:[%s7282_s8 + $0x10] sm:$0xff]  }
 0x2c1   : > { %v1444_v17 = vpop.permute.xlu1 %1443  ;;  %v1449_v21 = vpop.permute.xlu0 %1448 }
 0x2c2   : > { %v1477_v32 = vmul.f32 %v1444_v17, %v5038_v47  ;;  %v1478_v27 = vmul.f32 %v1449_v21, %v5049_v50  ;;  %v1352_v50 = vadd.f32 %v1351_v12, %v1345_v40  ;;  %v1223_v38 = vrot.slane %v1222_v15, 1  ;;  %v4347_v40 = vld [vmem:[%s7279_s5 + $0x30] sm:$0xff]  }
 0x2c3   : > { %4045 = vmatprep.subr.bf16.mxu0 %v4347_v40 }
 0x2c4   : > { %v1484_v25 = vadd.f32 %v1477_v32, %v1476_v62  ;;  %v1353_v5 = vadd.f32 %v1352_v50, %v1346_v10  ;;  %4046 = vmatpush3.bf16.msra.mxu0 %v4347_v40  ;;  %v4352_v50 = vld [vmem:[%s7279_s5 + $0x8] sm:$0xff]   ;;  %v4353_v10 = vld [vmem:[%s7279_s5] sm:$0xff]  }
 0x2c5   : > { %v1454_v39 = vpop.permute.xlu1 %1453  ;;  %v1459_v8 = vpop.permute.xlu0 %1458 }
 0x2c6   : > { %v1485_v1 = vadd.f32 %v1484_v25, %v1478_v27  ;;  %v1479_v3 = vmul.f32 %v1454_v39, %v5052_v51  ;;  %v1480_v47 = vmul.f32 %v1459_v8, %v5055_v52  ;;  %v1224_v27 = vadd.f32 %v1223_v38, %v1222_v15 }
 0x2c8   : > { %v1486_v46 = vadd.f32 %v1485_v1, %v1479_v3 }
 0x2c9   : > { %v1464_v22 = vpop.permute.xlu1 %1463  ;;  %v1469_v41 = vpop.permute.xlu0 %1468 }
 0x2ca   : > { %v1487_v45 = vadd.f32 %v1486_v46, %v1480_v47  ;;  %v1481_v51 = vmul.f32 %v5438_v33, %v1464_v22  ;;  %v1482_v9 = vmul.f32 %v1469_v41, %v5068_v56  ;;  %v4348_v46 = vld [vmem:[%s7279_s5 + $0x28] sm:$0xff]   ;;  %v4349_v47 = vld [vmem:[%s7279_s5 + $0x20] sm:$0xff]   ;;  %v4350_v22 = vld [vmem:[%s7279_s5 + $0x18] sm:$0xff]  }
 0x2cb   : > { %4047 = vmatprep.subr.bf16.mxu0 %v4348_v46  ;;  %v4351_v41 = vld [vmem:[%s7279_s5 + $0x10] sm:$0xff]  }
 0x2cc   : > { %v1488_v20 = vadd.f32 %v1487_v45, %v1481_v51  ;;  %4048 = vmatpush3.bf16.msra.mxu0 %v4348_v46  ;;  %v4690_v45 = vld [vmem:[%s7277_s3 + $0x38] sm:$0xff]   ;;  %v4691_v51 = vld [vmem:[%s7277_s3 + $0x30] sm:$0xff]  }
 0x2cd   : > { %v1474_v4 = vpop.permute.xlu1 %1473  ;;  %v1338_v52 = vpop.permute.xlu0 %1337  ;;  %4049 = vmatprep.subr.bf16.mxu0 %v4349_v47 }
 0x2ce   : > { %v1489_v60 = vadd.f32 %v1488_v20, %v1482_v9  ;;  %v1483_v26 = vmul.f32 %v5443_v6, %v1474_v4  ;;  %v1347_v53 = vmul.f32 %v5447_v57, %v1338_v52 }
 0x2d0   : > { %v1490_v2 = vadd.f32 %v1489_v60, %v1483_v26  ;;  %v1354_v63 = vadd.f32 %v1353_v5, %v1347_v53  ;;  %4050 = vmatpush3.bf16.msra.mxu0 %v4349_v47  ;;  %v4356_v60 = vld [vmem:[%s7282_s8 + $0x28] sm:$0xff]   ;;  %v4357_v26 = vld [vmem:[%s7282_s8 + $0x20] sm:$0xff]   ;;  %v4358_v53 = vld [vmem:[%s7282_s8 + $0x18] sm:$0xff]  }
 0x2d1   : > { %4051 = vmatprep.subr.bf16.mxu0 %v4350_v22 }
 0x2d2   : > { %v1491_v13 = vrot.slane %v1490_v2, 4  ;;  %v1355_v35 = vrot.slane %v1354_v63, 4 }
 0x2d4   : > { %v1492_v17 = vadd.f32 %v1491_v13, %v1490_v2  ;;  %v1356_v56 = vadd.f32 %v1355_v35, %v1354_v63  ;;  %4052 = vmatpush3.bf16.msra.mxu0 %v4350_v22  ;;  %v4360_v2 = vld [vmem:[%s7282_s8 + $0x8] sm:$0xff]   ;;  %v4361_v63 = vld [vmem:[%s7282_s8] sm:$0xff]  }
 0x2d5   : > { %4053 = vmatprep.subr.bf16.mxu0 %v4351_v41  ;;  %v7327_v13 = vld [vmem:[#allocation6_spill] sm:$0xff] }
 0x2d6   : > { %v1493_v21 = vrot.slane %v1492_v17, 2  ;;  %v1357_v34 = vrot.slane %v1356_v56, 2 }
 0x2d8   : > { %v1494_v62 = vadd.f32 %v1493_v21, %v1492_v17  ;;  %v1358_v32 = vadd.f32 %v1357_v34, %v1356_v56  ;;  %4054 = vmatpush3.bf16.msra.mxu0 %v4351_v41 }
 0x2d9   : > { %4055 = vmatprep.subr.bf16.mxu0 %v4352_v50 }
 0x2da   : > { %v1495_v29 = vrot.slane %v1494_v62, 1  ;;  %v1359_v25 = vrot.slane %v1358_v32, 1 }
 0x2dc   : > { %v1496_v39 = vadd.f32 %v1495_v29, %v1494_v62  ;;  %v1360_v8 = vadd.f32 %v1359_v25, %v1358_v32  ;;  %4056 = vmatpush3.bf16.msra.mxu0 %v4352_v50  ;;  %v7328_v25 = vld [vmem:[#allocation7_spill] sm:$0xff] }
 0x2dd   : > { %4057 = vmatprep.subr.bf16.mxu0 %v4353_v10 }
 0x2de   : > { %v1498_v12 = vsel %vm1497_vm2, %v1224_v27, %v1360_v8  ;;  %v7329_v27 = vld [vmem:[#allocation8_spill] sm:$0xff]  ;;  %v7331_v8 = vld [vmem:[#allocation10_spill] sm:$0xff] }
 0x2df   : > { %v1500_v1 = vsel %vm1499_vm3, %v1498_v12, %v1496_v39  ;;  %v7330_v39 = vld [vmem:[#allocation9_spill] sm:$0xff]  ;;  %v7332_v12 = vld [vmem:[#allocation11_spill] sm:$0xff] }
 0x2e0   : > { %v1501_v3 = vpack.c.bf16 %v1500_v1, %v1500_v1  ;;  %4058 = vmatpush3.bf16.msra.mxu0 %v4353_v10  ;;  %v7333_v1 = vld [vmem:[#allocation12_spill] sm:$0xff] }
 0x2e1   : > { %4123 = vmatprep.subr.bf16.mxu0 %v4690_v45 }
 0x2e2   : > { %4100 = vmatmul.mubr.bf16.vlgmr.msra.gmra.mxu1 %v1501_v3  ;;  %v7334_v3 = vld [vmem:[#allocation13_spill] sm:$0xff] }
 0x2e3   : > { %4119 = vmatprep.mubr.msk.bf16.mxu1 %vm4802_vm1, %v4801_v7  ;;  %4060 = vmatmul.mubr.bf16.vlgmr.msra.gmra.mxu0 %v4985_v30  ;;  %v4693_v30 = vld [vmem:[%s7277_s3 + $0x20] sm:$0xff]  }
 0x2e4   : > { %4063 = vmatprep.mubr.bf16.mxu0 %v4987_v31  ;;  %4124 = vmatpush3.bf16.msra.mxu0 %v4690_v45  ;;  %v4694_v31 = vld [vmem:[%s7277_s3 + $0x18] sm:$0xff]  }
 0x2e5   : > { %4125 = vmatprep.subr.bf16.mxu0 %v4691_v51 }
 0x2e8   : > { %4126 = vmatpush3.bf16.msra.mxu0 %v4691_v51 }
 0x2e9   : > { %4127 = vmatprep.subr.bf16.mxu0 %v4692_v44 }
 0x2eb   : > { %4064 = vmatmul.mubr.bf16.gmra.mxu0 %v5005_v36  ;;  %v4695_v36 = vld [vmem:[%s7277_s3 + $0x10] sm:$0xff]  }
 0x2ec   : > { %4067 = vmatprep.mubr.bf16.mxu0 %v5009_v37  ;;  %4128 = vmatpush3.bf16.msra.mxu0 %v4692_v44  ;;  %v4696_v37 = vld [vmem:[%s7277_s3 + $0x8] sm:$0xff]  }
 0x2ed   : > { %4129 = vmatprep.subr.bf16.mxu0 %v4693_v30 }
 0x2f0   : > { %4130 = vmatpush3.bf16.msra.mxu0 %v4693_v30 }
 0x2f1   : > { %4131 = vmatprep.subr.bf16.mxu0 %v4694_v31 }
 0x2f3   : > { %4068 = vmatmul.mubr.bf16.gmra.mxu0 %v5025_v42  ;;  %v4697_v42 = vld [vmem:[%s7277_s3] sm:$0xff]  }
 0x2f4   : > { %4071 = vmatprep.mubr.bf16.mxu0 %v5028_v43  ;;  %4132 = vmatpush3.bf16.msra.mxu0 %v4694_v31  ;;  %v3780_v43 = vld [vmem:[%s5517_s28] ss:$0 sm:$0xff] }
 0x2f5   : > { %4133 = vmatprep.subr.bf16.mxu0 %v4695_v36 }
 0x2f8   : > { %4134 = vmatpush3.bf16.msra.mxu0 %v4695_v36 }
 0x2f9   : > { %4135 = vmatprep.subr.bf16.mxu0 %v4696_v37 }
 0x2fb   : > { %4072 = vmatmul.mubr.bf16.gmra.mxu0 %v5040_v48 }
 0x2fc   : > { %4075 = vmatprep.mubr.bf16.mxu0 %v5044_v49  ;;  %4136 = vmatpush3.bf16.msra.mxu0 %v4696_v37 }
 0x2fd   : > { %4137 = vmatprep.subr.bf16.mxu0 %v4697_v42 }
 0x300   : > { %4138 = vmatpush3.bf16.msra.mxu0 %v4697_v42 }
 0x301   : > { %4203 = vmatprep.subr.bf16.mxu0 %v4346_v16 }
 0x303   : > { %4076 = vmatmul.mubr.bf16.gmra.mxu0 %v5060_v54 }
 0x304   : > { %4079 = vmatprep.mubr.bf16.mxu0 %v5063_v55  ;;  %v4354_v55 = vld [vmem:[%s7282_s8 + $0x38] sm:$0xff]  }
 0x305   : > { %4104 = vmatpush3.bf16.msra.mxu1 %v4354_v55 }
 0x306   : > { %4105 = vmatprep.subr.bf16.mxu1 %v4801_v7 }
 0x30b   : > { %4080 = vmatmul.mubr.bf16.gmra.mxu0 %v5072_v58  ;;  %v4355_v58 = vld [vmem:[%s7282_s8 + $0x30] sm:$0xff]  }
 0x30c   : > { %4106 = vmatpush3.bf16.msra.mxu1 %v4355_v58 }
 0x30d   : > { %4107 = vmatprep.subr.bf16.mxu1 %v4801_v7 }
 0x310   : > { %4108 = vmatpush3.bf16.msra.mxu1 %v4356_v60 }
 0x311   : > { %4109 = vmatprep.subr.bf16.mxu1 %v4801_v7 }
 0x314   : > { %4110 = vmatpush3.bf16.msra.mxu1 %v4357_v26  ;;  %v5583_v26 = vld [vmem:[%s7280_s6] ss:$0 sm:$0xff] }
 0x315   : > { %4111 = vmatprep.subr.bf16.mxu1 %v4801_v7 }
 0x318   : > { %4112 = vmatpush3.bf16.msra.mxu1 %v4358_v53 }
 0x319   : > { %4113 = vmatprep.subr.bf16.mxu1 %v4801_v7 }
 0x31c   : > { %4114 = vmatpush3.bf16.msra.mxu1 %v4359_v28 }
 0x31d   : > { %4115 = vmatprep.subr.bf16.mxu1 %v4801_v7 }
 0x320   : > { %4116 = vmatpush3.bf16.msra.mxu1 %v4360_v2 }
 0x321   : > { %4117 = vmatprep.subr.bf16.mxu1 %v4801_v7 }
 0x324   : > { %4118 = vmatpush3.bf16.msra.mxu1 %v4361_v63 }
 0x325   : > { %4163 = vmatprep.subr.bf16.mxu1 %v7327_v13 }
 0x3a2   : > { %v1590_v48 = vpop.f32.mrf.mxu1 }
 0x3a3   : > { %v1591_v49 = vadd.f32 %v3780_v43, %v1590_v48  ;;  %v4061_v16 = vpop.f32.mrf.mxu0 }
 0x3a4   : > { %v4101_v20 = vpop.f32.mrf.mxu1  ;;  %v5586_v28 = vadd.f32 %v4061_v16, %v5583_v26 }
 0x3a5   : > { %v1596_v9 = vmax.f32 %v1591_v49, 0.0  ;;  %v957_v40 = vpop.f32.mrf.mxu0  ;;  %v3789_v49 = vld [vmem:[%s7283_s9] ss:$0 sm:$0xff] }
 0x3a6   : > { %v1593_v4 = vpop.f32.mrf.mxu1 }
 0x3a7   : > { %v1597_v52 = vmul.f32 %v1596_v9, %v1596_v9  ;;  %v4062_v46 = vpop.f32.mrf.mxu0 }
 0x3a8   : > { %v4102_v5 = vpop.f32.mrf.mxu1 }
 0x3a9   : > { %v1599_v54 = vsel %vm7301_vm4, %v1597_v52, 0.0  ;;  %v960_v47 = vpop.f32.mrf.mxu0 }
 0x3aa   : > { %1600 = vadd.xlane.f32.xlu0 %v1599_v54 }
 0x3ab   : > { %v5569_v22 = vpop.f32.mrf.mxu0 }
 0x3ad   : > { %v5571_v41 = vpop.f32.mrf.mxu0 }
 0x3af   : > { %v5573_v50 = vpop.f32.mrf.mxu0 }
 0x3b1   : > { %v5575_v10 = vpop.f32.mrf.mxu0 }
 0x3b3   : > { %v4069_v45 = vpop.f32.mrf.mxu0 }
 0x3b5   : > { %v989_v51 = vpop.f32.mrf.mxu0 }
 0x3b7   : > { %v4070_v44 = vpop.f32.mrf.mxu0 }
 0x3b9   : > { %v992_v30 = vpop.f32.mrf.mxu0 }
 0x3bb   : > { %v4073_v31 = vpop.f32.mrf.mxu0 }
 0x3bd   : > { %v1005_v36 = vpop.f32.mrf.mxu0 }
 0x3be   : > { %v1006_v16 = vadd.f32 %v5583_v26, %v1005_v36 }
 0x3bf   : > { %v4074_v37 = vpop.f32.mrf.mxu0 }
 0x3c0   : > { %v1017_v36 = vadd.f32 %v4074_v37, %v5583_v26 }
 0x3c1   : > { %v1008_v42 = vpop.f32.mrf.mxu0 }
 0x3c3   : > { %v4077_v43 = vpop.f32.mrf.mxu0 }
 0x3c5   : > { %v1021_v48 = vpop.f32.mrf.mxu0 }
 0x433   : > { %v1601_v35 = vpop.xlane.xlu0 %1600 }
 0x434   : > { %4416 = vrsqrt.f32 %v1601_v35  ;;  %vm1604_vm5 = vcmp.eq.f32.partialorder %v1601_v35, inf  ;;  %v1607_v56 = vand.u32 2147483648, %v1601_v35  ;;  %vm1606_vm6 = vcmp.eq.f32.partialorder %v1601_v35, 0.0 }
 0x441   : > { %v4417_v15 = vpop.eup %4416 }
 0x442   : > { %v1603_v17 = vmul.f32 %v4417_v15, %v1601_v35  ;;  %v1001_v15 = vadd.f32 %v4070_v44, %v5583_v26 }
 0x444   : > { %v1605_v21 = vsel %vm1604_vm5, %v1601_v35, %v1603_v17  ;;  %v998_v35 = vadd.f32 %v4069_v45, %v5583_v26  ;;  %v961_v17 = vadd.f32 %v5583_v26, %v960_v47  ;;  %v1737_v47 = vlaneseq }
 0x445   : > { %v1608_v34 = vsel %vm1606_vm6, %v1607_v56, %v1605_v21  ;;  %v1054_v21 = vmax.f32 %v5586_v28, 0.0 }
 0x446   : > { %v1609_v38 = vmax.f32 %v1608_v34, 1e-12  ;;  %v990_v34 = vadd.f32 %v5583_v26, %v989_v51 }
 0x448   : > { %4418 = vrcp.f32 %v1609_v38  ;;  %v1030_v38 = vadd.f32 %v4077_v43, %v5583_v26  ;;  %v1060_v43 = vmax.f32 %v990_v34, 0.0 }
 0x44a   : > { %v1070_v45 = vmax.f32 %v1030_v38, 0.0 }
 0x455   : > { %v4419_v62 = vpop.eup %4418 }
 0x456   : > { %v1611_v32 = vmul.f32 %v4419_v62, %v1596_v9  ;;  %v4078_v9 = vpop.f32.mrf.mxu0 }
 0x457   : > { %v1033_v62 = vadd.f32 %v4078_v9, %v5583_v26 }
 0x458   : > { %v1612_v29 = vpack.c.bf16 %v1611_v32, %v1611_v32  ;;  %v1024_v55 = vpop.f32.mrf.mxu0  ;;  %v993_v32 = vadd.f32 %v5583_v26, %v992_v30 }
 0x459   : > { %v1071_v51 = vmax.f32 %v1033_v62, 0.0 }
 0x45a   : > { %4120 = vmatmul.mubr.bf16.vlgmr.msra.gmra.mxu1 %v1612_v29  ;;  %v4081_v60 = vpop.f32.mrf.mxu0  ;;  %v1022_v29 = vadd.f32 %v5583_v26, %v1021_v48  ;;  %v1061_v48 = vmax.f32 %v993_v32, 0.0 }
 0x45b   : > { %4164 = vmatpush3.bf16.msra.mxu1 %v7327_v13  ;;  %v958_v13 = vadd.f32 %v5583_v26, %v957_v40  ;;  %v1009_v40 = vadd.f32 %v5583_v26, %v1008_v42  ;;  %v1064_v42 = vmax.f32 %v1006_v16, 0.0 }
 0x45c   : > { %4165 = vmatprep.subr.bf16.mxu1 %v7328_v25  ;;  %v1037_v53 = vpop.f32.mrf.mxu0 }
 0x45d   : > { %v1038_v44 = vadd.f32 %v5583_v26, %v1037_v53 }
 0x45e   : > { %v4082_v2 = vpop.f32.mrf.mxu0 }
 0x45f   : > { %4166 = vmatpush3.bf16.msra.mxu1 %v7328_v25  ;;  %v1025_v25 = vadd.f32 %v5583_v26, %v1024_v55  ;;  %v1065_v55 = vmax.f32 %v1009_v40, 0.0  ;;  %v1072_v53 = vmax.f32 %v1038_v44, 0.0 }
 0x460   : > { %4167 = vmatprep.subr.bf16.mxu1 %v7329_v27 }
 0x463   : > { %4168 = vmatpush3.bf16.msra.mxu1 %v7329_v27  ;;  %v1040_v27 = vpop.f32.mrf.mxu0 }
 0x464   : > { %4169 = vmatprep.subr.bf16.mxu1 %v7330_v39  ;;  %v1041_v30 = vadd.f32 %v5583_v26, %v1040_v27 }
 0x467   : > { %4170 = vmatpush3.bf16.msra.mxu1 %v7330_v39  ;;  %v1052_v39 = vmax.f32 %v958_v13, 0.0 }
 0x468   : > { %4171 = vmatprep.subr.bf16.mxu1 %v7331_v8 }
 0x46b   : > { %4172 = vmatpush3.bf16.msra.mxu1 %v7331_v8  ;;  %v5600_v8 = vadd.f32 %v4062_v46, %v5583_v26 }
 0x46c   : > { %4173 = vmatprep.subr.bf16.mxu1 %v7332_v12 }
 0x46d   : > { %v1055_v46 = vmax.f32 %v5600_v8, 0.0 }
 0x46f   : > { %4174 = vmatpush3.bf16.msra.mxu1 %v7332_v12  ;;  %v1062_v12 = vmax.f32 %v998_v35, 0.0  ;;  %v5621_v35 = vadd.f32 %v5569_v22, %v5583_v26  ;;  %v5634_v22 = vpack.c.bf16 %v1065_v55, %v1064_v42 }
 0x470   : > { %4175 = vmatprep.subr.bf16.mxu1 %v7333_v1 }
 0x473   : > { %4176 = vmatpush3.bf16.msra.mxu1 %v7333_v1  ;;  %v1063_v1 = vmax.f32 %v1001_v15, 0.0 }
 0x474   : > { %4177 = vmatprep.subr.bf16.mxu1 %v7334_v3 }
 0x475   : > { %v5607_v9 = vpack.c.bf16 %v1063_v1, %v1062_v12 }
 0x477   : > { %4178 = vmatpush3.bf16.msra.mxu1 %v7334_v3  ;;  %v1053_v3 = vmax.f32 %v961_v17, 0.0  ;;  %v1067_v17 = vmax.f32 %v1017_v36, 0.0 }
 0x478   : > { %4243 = vmatprep.subr.bf16.mxu1 %v4801_v7 }
 0x479   : > { %v5617_v13 = vpack.c.bf16 %v1053_v3, %v1052_v39  ;;  %v5648_v3 = vadd.f32 %v5573_v50, %v5583_v26 }
 0x51a   : > { %v1701_v20 = vpop.f32.mrf.mxu1 }
 0x51b   : > { %v1702_v4 = vadd.f32 %v3789_v49, %v1701_v20  ;;  %v1068_v49 = vmax.f32 %v1022_v29, 0.0  ;;  %v1069_v20 = vmax.f32 %v1025_v25, 0.0 }
 0x51c   : > { %v4121_v52 = vpop.f32.mrf.mxu1 }
 0x51d   : > { %v3798_v5 = vmul.f32 -1.442695, %v1702_v4  ;;  %v1014_v4 = vadd.f32 %v4073_v31, %v5583_v26  ;;  %v1046_v52 = vadd.f32 %v4081_v60, %v5583_v26  ;;  %v5623_v31 = vpack.c.bf16 %v1061_v48, %v1060_v43 }
 0x51e   : > { %v1704_v54 = vpop.f32.mrf.mxu1  ;;  %v5625_v37 = vpack.c.bf16 %v1069_v20, %v1068_v49  ;;  %v5629_v60 = vadd.f32 %v5583_v26, %v5571_v41  ;;  %v1718_v43 = vunpack.c.h.bf16 %v5634_v22 }
 0x51f   : > { %4420 = vpow2.f32 %v3798_v5  ;;  %v1049_v5 = vadd.f32 %v4082_v2, %v5583_v26  ;;  %v5613_v54 = vshrl.u32 %v1737_v47, 7  ;;  %v1715_v2 = vunpack.c.l.bf16 %v5607_v9 }
 0x520   : > { %v4122_v58 = vpop.f32.mrf.mxu1  ;;  %v1066_v15 = vmax.f32 %v1014_v4, 0.0  ;;  %v1074_v34 = vmax.f32 %v1046_v52, 0.0  ;;  %v1713_v41 = vunpack.c.l.bf16 %v5623_v31  ;;  %v1714_v27 = vunpack.c.h.bf16 %v5623_v31 }
 0x521   : > { %7335 = vst [vmem:[#allocation6_spill] sm:$0xff] %v5613_v54  ;;  %v5615_v58 = vpack.c.bf16 %v1071_v51, %v1070_v45  ;;  %v1075_v38 = vmax.f32 %v1049_v5, 0.0  ;;  %v7304_v62 = vsub.s32 0, %v5613_v54  ;;  %v1721_v39 = vunpack.c.l.bf16 %v5625_v37 }
 0x522   : > { %v1722_v12 = vunpack.c.h.bf16 %v5625_v37  ;;  %v5650_v16 = vpack.c.bf16 %v1067_v17, %v1066_v15  ;;  %v977_v52 = vadd.f32 %v5583_v26, %v5575_v10  ;;  %v7303_v17 = vsub.s32 1, %v5613_v54 }
 0x523   : > { %v1723_v32 = vunpack.c.l.bf16 %v5615_v58  ;;  %v1724_v29 = vunpack.c.h.bf16 %v5615_v58  ;;  %v1729_v45 = vadd.f32 %v1721_v39, %v1713_v41  ;;  %v5664_v50 = vpack.c.bf16 %v1075_v38, %v1074_v34 }
 0x524   : > { %v1730_v51 = vadd.f32 %v1722_v12, %v1714_v27  ;;  %v1719_v5 = vunpack.c.l.bf16 %v5650_v16 }
 0x525   : > { %v1731_v40 = vadd.f32 %v1723_v32, %v1715_v2  ;;  %v1727_v37 = vunpack.c.l.bf16 %v5664_v50  ;;  %v1728_v26 = vunpack.c.h.bf16 %v5664_v50 }
 0x52c   : > { %v4421_v63 = vpop.eup %4420 }
 0x52d   : > { %v1710_v56 = vadd.f32 1.0, %v4421_v63  ;;  %v1073_v63 = vmax.f32 %v1041_v30, 0.0  ;;  %v1717_v30 = vunpack.c.l.bf16 %v5634_v22 }
 0x52f   : > { %4422 = vrcp.f32 %v1710_v56  ;;  %v1716_v56 = vunpack.c.h.bf16 %v5607_v9  ;;  %v5638_v25 = vpack.c.bf16 %v1073_v63, %v1072_v53  ;;  %v1720_v63 = vunpack.c.h.bf16 %v5650_v16 }
 0x531   : > { %v1732_v47 = vadd.f32 %v1724_v29, %v1716_v56  ;;  %v1725_v48 = vunpack.c.l.bf16 %v5638_v25  ;;  %v1726_v49 = vunpack.c.h.bf16 %v5638_v25 }
 0x533   : > { %v1733_v55 = vadd.f32 %v1725_v48, %v1717_v30  ;;  %v1734_v53 = vadd.f32 %v1726_v49, %v1718_v43 }
 0x53c   : > { %v5644_v1 = vpop.eup %4422 }
 0x53d   : > { %v1740_v44 = vrot.slane %v5644_v1, %v7304_v62 }
 0x53f   : > { %v1742_v20 = vmul.f32 %v1740_v44, %v1730_v51  ;;  %v1741_v4 = vmul.f32 %v1740_v44, %v1729_v45  ;;  %v1743_v36 = vmul.f32 %v1740_v44, %v1731_v40  ;;  %v1744_v42 = vmul.f32 %v1740_v44, %v1732_v47 }
 0x540   : > { %v1745_v34 = vmul.f32 %v1740_v44, %v1733_v55  ;;  %v1746_v38 = vmul.f32 %v1740_v44, %v1734_v53  ;;  %v1057_v51 = vmax.f32 %v977_v52, 0.0  ;;  %v1058_v55 = vmax.f32 %v5621_v35, 0.0 }
 0x541   : > { %v5687_v15 = vadd.f32 %v5391_v14, %v1742_v20  ;;  %v5690_v10 = vadd.f32 %v5395_v19, %v1741_v4  ;;  %v5699_v45 = vadd.f32 %v5399_v11, %v1743_v36  ;;  %v5702_v14 = vadd.f32 %v5403_v23, %v1744_v42 }
 0x542   : > { %v1056_v19 = vmax.f32 %v5629_v60, 0.0  ;;  %v1735_v20 = vadd.f32 %v1727_v37, %v1719_v5  ;;  %v1736_v4 = vadd.f32 %v1728_v26, %v1720_v63  ;;  %v5717_v11 = vpack.c.bf16 %v1055_v46, %v1054_v21 }
 0x543   : > { %v1758_v40 = vmul.f32 %v5687_v15, %v5687_v15  ;;  %v1757_v47 = vmul.f32 %v5690_v10, %v5690_v10  ;;  %v1869_v23 = vunpack.c.l.bf16 %v5617_v13  ;;  %v1870_v60 = vunpack.c.h.bf16 %v5617_v13 }
 0x544   : > { %v5724_v36 = vrot.slane %v5644_v1, %v7303_v17  ;;  %v1747_v42 = vmul.f32 %v1740_v44, %v1735_v20  ;;  %v1748_v52 = vmul.f32 %v1740_v44, %v1736_v4  ;;  %v1759_v28 = vmul.f32 %v5699_v45, %v5699_v45 }
 0x545   : > { %1767 = vadd.xlane.f32.xlu0 %v1758_v40  ;;  %1765 = vadd.xlane.f32.xlu1 %v1757_v47  ;;  %v1760_v21 = vmul.f32 %v5702_v14, %v5702_v14  ;;  %v5731_v8 = vadd.f32 %v5407_v0, %v1745_v34  ;;  %v5734_v46 = vadd.f32 %v5412_v59, %v1746_v38  ;;  %v1059_v53 = vmax.f32 %v5648_v3, 0.0  ;;  %v4698_v59 = vld [vmem:[%s4926_s21 + $0x30] sm:$0xff] }
 0x546   : > { %v5738_v40 = vpack.c.bf16 %v1057_v51, %v1056_v19  ;;  %v1871_v44 = vunpack.c.l.bf16 %v5717_v11  ;;  %v1872_v47 = vunpack.c.h.bf16 %v5717_v11  ;;  %v1877_v20 = vadd.f32 %v1869_v23, %v1721_v39 }
 0x547   : > { %v1878_v0 = vadd.f32 %v1870_v60, %v1722_v12  ;;  %v5747_v34 = vadd.f32 %v4698_v59, %v1747_v42  ;;  %v5750_v35 = vadd.f32 %v5420_v18, %v1748_v52  ;;  %v1761_v3 = vmul.f32 %v5731_v8, %v5731_v8 }
 0x548   : > { %v1762_v38 = vmul.f32 %v5734_v46, %v5734_v46  ;;  %v1889_v39 = vmul.f32 %v5724_v36, %v1877_v20  ;;  %v5758_v19 = vpack.c.bf16 %v1059_v53, %v1058_v55  ;;  %v1873_v51 = vunpack.c.l.bf16 %v5738_v40  ;;  %v4700_v53 = vld [vmem:[%s4926_s21 + $0x48] sm:$0xff] }
 0x549   : > { %1769 = vadd.xlane.f32.xlu0 %v1759_v28  ;;  %1771 = vadd.xlane.f32.xlu1 %v1760_v21  ;;  %v1890_v12 = vmul.f32 %v5724_v36, %v1878_v0  ;;  %v1874_v4 = vunpack.c.h.bf16 %v5738_v40  ;;  %v1879_v18 = vadd.f32 %v1871_v44, %v1723_v32  ;;  %v1880_v42 = vadd.f32 %v1872_v47, %v1724_v29  ;;  %v4699_v21 = vld [vmem:[%s4926_s21 + $0x40] sm:$0xff] }
 0x54a   : > { %v1763_v52 = vmul.f32 %v5747_v34, %v5747_v34  ;;  %v1764_v28 = vmul.f32 %v5750_v35, %v5750_v35  ;;  %v5775_v55 = vadd.f32 %v4699_v21, %v1889_v39  ;;  %v1875_v29 = vunpack.c.l.bf16 %v5758_v19  ;;  %v4708_v40 = vld [vmem:[%s4926_s21 + $0xa0] sm:$0xff] }
 0x54b   : > { %v5778_v20 = vadd.f32 %v4700_v53, %v1890_v12  ;;  %v1891_v58 = vmul.f32 %v5724_v36, %v1879_v18  ;;  %v1892_v32 = vmul.f32 %v5724_v36, %v1880_v42  ;;  %v1881_v0 = vadd.f32 %v1873_v51, %v1725_v48  ;;  %v4701_v48 = vld [vmem:[%s4926_s21 + $0x50] sm:$0xff]  ;;  %v4703_v53 = vld [vmem:[%s4926_s21 + $0x60] sm:$0xff] }
 0x54c   : > { %v1882_v59 = vadd.f32 %v1874_v4, %v1726_v49  ;;  %v1905_v18 = vmul.f32 %v5775_v55, %v5775_v55  ;;  %v4702_v49 = vld [vmem:[%s4926_s21 + $0x58] sm:$0xff]  ;;  %v2019_v13 = vadd.f32 %v1871_v44, %v1715_v2  ;;  %v4705_v2 = vld [vmem:[%s4926_s21 + $0x88] sm:$0xff]  ;;  %v2022_v11 = vadd.f32 %v1874_v4, %v1718_v43 }
 0x54d   : > { %1773 = vadd.xlane.f32.xlu0 %v1761_v3  ;;  %1775 = vadd.xlane.f32.xlu1 %v1762_v38  ;;  %v1876_v3 = vunpack.c.h.bf16 %v5758_v19  ;;  %v7302_v38 = vsub.s32 2, %v5613_v54  ;;  %v1893_v39 = vmul.f32 %v5724_v36, %v1881_v0  ;;  %v1906_v25 = vmul.f32 %v5778_v20, %v5778_v20 }
 0x54e   : > { %v1894_v12 = vmul.f32 %v5724_v36, %v1882_v59  ;;  %v5800_v42 = vadd.f32 %v4701_v48, %v1891_v58  ;;  %v5803_v19 = vadd.f32 %v4702_v49, %v1892_v32  ;;  %v2018_v59 = vadd.f32 %v1870_v60, %v1714_v27 }
 0x54f   : > { %v2028_v21 = vrot.slane %v5644_v1, %v7302_v38  ;;  %v5813_v0 = vadd.f32 %v4703_v53, %v1893_v39  ;;  %v2017_v1 = vadd.f32 %v1869_v23, %v1713_v41  ;;  %v2020_v27 = vadd.f32 %v1872_v47, %v1716_v56 }
 0x550   : > { %v1907_v32 = vmul.f32 %v5800_v42, %v5800_v42  ;;  %v5821_v50 = vadd.f32 %v5429_v61, %v1894_v12  ;;  %v4704_v12 = vld [vmem:[%s4926_s21 + $0x80] sm:$0xff]  ;;  %v2021_v56 = vadd.f32 %v1873_v51, %v1717_v30  ;;  %v4707_v30 = vld [vmem:[%s4926_s21 + $0x98] sm:$0xff]  ;;  %v2023_v22 = vadd.f32 %v1875_v29, %v1719_v5 }
 0x551   : > { %1777 = vadd.xlane.f32.xlu0 %v1763_v52  ;;  %1779 = vadd.xlane.f32.xlu1 %v1764_v28  ;;  %v1883_v52 = vadd.f32 %v1875_v29, %v1727_v37  ;;  %v1884_v28 = vadd.f32 %v1876_v3, %v1728_v26  ;;  %v1908_v37 = vmul.f32 %v5803_v19, %v5803_v19 }
 0x552   : > { %v1909_v61 = vmul.f32 %v5813_v0, %v5813_v0  ;;  %v2029_v31 = vmul.f32 %v2028_v21, %v2017_v1  ;;  %v2030_v23 = vmul.f32 %v2028_v21, %v2018_v59  ;;  %v2032_v9 = vmul.f32 %v2028_v21, %v2020_v27 }
 0x553   : > { %v1895_v58 = vmul.f32 %v5724_v36, %v1883_v52  ;;  %v1896_v26 = vmul.f32 %v5724_v36, %v1884_v28  ;;  %v1910_v36 = vmul.f32 %v5821_v50, %v5821_v50  ;;  %v2033_v47 = vmul.f32 %v2028_v21, %v2021_v56  ;;  %v4706_v52 = vld [vmem:[%s4926_s21 + $0x90] sm:$0xff] }
 0x554   : > { %v5858_v44 = vadd.f32 %v4705_v2, %v2030_v23  ;;  %v5876_v51 = vadd.f32 %v4707_v30, %v2032_v9  ;;  %v2024_v43 = vadd.f32 %v1876_v3, %v1720_v63  ;;  %v2035_v53 = vmul.f32 %v2028_v21, %v2023_v22  ;;  %v4709_v63 = vld [vmem:[%s4926_s21 + $0xb0] sm:$0xff]  ;;  %s7226_s21 = scalar_lea.hbm %s7284_s10, %s3806_s26 }
 0x555   : > { %1913 = vadd.xlane.f32.xlu0 %v1905_v18  ;;  %1915 = vadd.xlane.f32.xlu1 %v1906_v25  ;;  %v5835_v39 = vadd.f32 %v5434_v24, %v1895_v58  ;;  %v5840_v41 = vadd.f32 %v5447_v57, %v1896_v26  ;;  %v2031_v57 = vmul.f32 %v2028_v21, %v2019_v13 }
 0x556   : > { %v5855_v18 = vadd.f32 %v4704_v12, %v2029_v31  ;;  %v2034_v25 = vmul.f32 %v2028_v21, %v2022_v11  ;;  %v2046_v49 = vmul.f32 %v5858_v44, %v5858_v44  ;;  %v5883_v4 = vadd.f32 %v4708_v40, %v2033_v47 }
 0x557   : > { %v1911_v24 = vmul.f32 %v5835_v39, %v5835_v39  ;;  %v1912_v60 = vmul.f32 %v5840_v41, %v5840_v41  ;;  %v5873_v28 = vadd.f32 %v4706_v52, %v2031_v57  ;;  %v2036_v26 = vmul.f32 %v2028_v21, %v2024_v43 }
 0x558   : > { %v2045_v48 = vmul.f32 %v5855_v18, %v5855_v18  ;;  %v2049_v16 = vmul.f32 %v5883_v4, %v5883_v4  ;;  %v5897_v29 = vadd.f32 %v4709_v63, %v2035_v53 }
 0x559   : > { %1917 = vadd.xlane.f32.xlu0 %v1907_v32  ;;  %1919 = vadd.xlane.f32.xlu1 %v1908_v37  ;;  %v2047_v58 = vmul.f32 %v5873_v28, %v5873_v28  ;;  %v2048_v32 = vmul.f32 %v5876_v51, %v5876_v51  ;;  %v5890_v37 = vadd.f32 %v5438_v33, %v2034_v25 }
 0x55a   : > { %v5900_v3 = vadd.f32 %v5443_v6, %v2036_v26  ;;  %v2051_v33 = vmul.f32 %v5897_v29, %v5897_v29 }
 0x55b   : > { %v2050_v5 = vmul.f32 %v5890_v37, %v5890_v37 }
 0x55c   : > { %v2052_v21 = vmul.f32 %v5900_v3, %v5900_v3 }
 0x55d   : > { %1921 = vadd.xlane.f32.xlu0 %v1909_v61  ;;  %1923 = vadd.xlane.f32.xlu1 %v1910_v36 }
 0x561   : > { %1925 = vadd.xlane.f32.xlu0 %v1911_v24  ;;  %1927 = vadd.xlane.f32.xlu1 %v1912_v60 }
 0x565   : > { %2053 = vadd.xlane.f32.xlu0 %v2045_v48  ;;  %2055 = vadd.xlane.f32.xlu1 %v2046_v49 }
 0x569   : > { %2057 = vadd.xlane.f32.xlu0 %v2047_v58  ;;  %2059 = vadd.xlane.f32.xlu1 %v2048_v32 }
 0x56d   : > { %2061 = vadd.xlane.f32.xlu0 %v2049_v16  ;;  %2063 = vadd.xlane.f32.xlu1 %v2050_v5 }
 0x571   : > { %2065 = vadd.xlane.f32.xlu0 %v2051_v33  ;;  %2067 = vadd.xlane.f32.xlu1 %v2052_v21 }
 0x5ce   : > { %v1768_v1 = vpop.xlane.xlu0 %1767  ;;  %v1766_v59 = vpop.xlane.xlu1 %1765 }
 0x5cf   : > { %4424 = vrsqrt.f32 %v1768_v1  ;;  %vm1790_vm7 = vcmp.eq.f32.partialorder %v1768_v1, inf  ;;  %vm1792_vm8 = vcmp.eq.f32.partialorder %v1768_v1, 0.0  ;;  %v1793_v24 = vand.u32 2147483648, %v1768_v1 }
 0x5d0   : > { %4426 = vrsqrt.f32 %v1766_v59  ;;  %vm1783_vm9 = vcmp.eq.f32.partialorder %v1766_v59, inf  ;;  %vm1785_vm10 = vcmp.eq.f32.partialorder %v1766_v59, 0.0  ;;  %v1786_v12 = vand.u32 2147483648, %v1766_v59 }
 0x5d2   : > { %v1770_v61 = vpop.xlane.xlu0 %1769  ;;  %v1772_v36 = vpop.xlane.xlu1 %1771 }
 0x5d3   : > { %4428 = vrsqrt.f32 %v1770_v61  ;;  %vm1797_vm11 = vcmp.eq.f32.partialorder %v1770_v61, inf  ;;  %vm1799_vm12 = vcmp.eq.f32.partialorder %v1770_v61, 0.0  ;;  %v1800_v9 = vand.u32 2147483648, %v1770_v61 }
 0x5d4   : > { %4430 = vrsqrt.f32 %v1772_v36  ;;  %vm1804_vm13 = vcmp.eq.f32.partialorder %v1772_v36, inf  ;;  %vm1806_vm14 = vcmp.eq.f32.partialorder %v1772_v36, 0.0  ;;  %v1807_v25 = vand.u32 2147483648, %v1772_v36 }
 0x5d6   : > { %v5906_v6 = vpop.xlane.xlu0 %1773  ;;  %v5908_v31 = vpop.xlane.xlu1 %1775 }
 0x5d7   : > { %4432 = vrsqrt.f32 %v5906_v6  ;;  %vm1811_vm15 = vcmp.eq.f32.partialorder %v5906_v6, inf  ;;  %vm1813_vm5 = vcmp.eq.f32.partialorder %v5906_v6, 0.0  ;;  %v1814_v40 = vand.u32 2147483648, %v5906_v6 }
 0x5d8   : > { %4434 = vrsqrt.f32 %v5908_v31  ;;  %vm1818_vm6 = vcmp.eq.f32.partialorder %v5908_v31, inf  ;;  %v1821_v58 = vand.u32 2147483648, %v5908_v31 }
 0x5da   : > { %v5912_v23 = vpop.xlane.xlu0 %1777  ;;  %v5914_v13 = vpop.xlane.xlu1 %1779 }
 0x5db   : > { %4436 = vrsqrt.f32 %v5912_v23 }
 0x5dc   : > { %v4425_v27 = vpop.eup %4424  ;;  %4438 = vrsqrt.f32 %v5914_v13 }
 0x5dd   : > { %v4427_v57 = vpop.eup %4426  ;;  %v1789_v60 = vmul.f32 %v4425_v27, %v1768_v1 }
 0x5de   : > { %v1782_v2 = vmul.f32 %v4427_v57, %v1766_v59  ;;  %v5918_v56 = vpop.xlane.xlu0 %1913  ;;  %v5920_v11 = vpop.xlane.xlu1 %1915 }
 0x5df   : > { %v1791_v47 = vsel %vm1790_vm7, %v1768_v1, %v1789_v60  ;;  %4440 = vrsqrt.f32 %v5918_v56  ;;  %vm1820_vm7 = vcmp.eq.f32.partialorder %v5908_v31, 0.0 }
 0x5e0   : > { %v4429_v48 = vpop.eup %4428  ;;  %v1794_v49 = vsel %vm1792_vm8, %v1793_v24, %v1791_v47  ;;  %v1784_v52 = vsel %vm1783_vm9, %v1766_v59, %v1782_v2  ;;  %4442 = vrsqrt.f32 %v5920_v11  ;;  %vm1825_vm8 = vcmp.eq.f32.partialorder %v5912_v23, inf }
 0x5e1   : > { %v4431_v30 = vpop.eup %4430  ;;  %v1787_v22 = vsel %vm1785_vm10, %v1786_v12, %v1784_v52  ;;  %v1796_v43 = vmul.f32 %v4429_v48, %v1770_v61  ;;  %v1838_v16 = vmax.f32 %v1794_v49, 1e-12  ;;  %vm1827_vm9 = vcmp.eq.f32.partialorder %v5912_v23, 0.0 }
 0x5e2   : > { %v1803_v53 = vmul.f32 %v4431_v30, %v1772_v36  ;;  %v5934_v32 = vpop.xlane.xlu0 %1917  ;;  %v5936_v26 = vpop.xlane.xlu1 %1919  ;;  %v1837_v33 = vmax.f32 %v1787_v22, 1e-12  ;;  %v1828_v59 = vand.u32 2147483648, %v5912_v23  ;;  %vm1832_vm10 = vcmp.eq.f32.partialorder %v5914_v13, inf }
 0x5e3   : > { %v1798_v5 = vsel %vm1797_vm11, %v1770_v61, %v1796_v43  ;;  %4444 = vrsqrt.f32 %v5934_v32  ;;  %vm1834_vm11 = vcmp.eq.f32.partialorder %v5914_v13, 0.0  ;;  %v1835_v47 = vand.u32 2147483648, %v5914_v13 }
 0x5e4   : > { %v4433_v63 = vpop.eup %4432  ;;  %v1801_v21 = vsel %vm1799_vm12, %v1800_v9, %v1798_v5  ;;  %v1805_v1 = vsel %vm1804_vm13, %v1772_v36, %v1803_v53  ;;  %4446 = vrsqrt.f32 %v5936_v26  ;;  %vm1931_vm12 = vcmp.eq.f32.partialorder %v5918_v56, inf }
 0x5e5   : > { %v4435_v27 = vpop.eup %4434  ;;  %v1808_v24 = vsel %vm1806_vm14, %v1807_v25, %v1805_v1  ;;  %v1810_v57 = vmul.f32 %v4433_v63, %v5906_v6  ;;  %v1839_v60 = vmax.f32 %v1801_v21, 1e-12  ;;  %4448 = vrcp.f32 %v1838_v16 }
 0x5e6   : > { %v1817_v12 = vmul.f32 %v4435_v27, %v5908_v31  ;;  %v5951_v61 = vpop.xlane.xlu0 %1921  ;;  %v5953_v2 = vpop.xlane.xlu1 %1923  ;;  %v1840_v36 = vmax.f32 %v1808_v24, 1e-12  ;;  %4450 = vrcp.f32 %v1837_v33  ;;  %vm1933_vm13 = vcmp.eq.f32.partialorder %v5918_v56, 0.0 }
 0x5e7   : > { %v1812_v9 = vsel %vm1811_vm15, %v5906_v6, %v1810_v57  ;;  %4452 = vrsqrt.f32 %v5951_v61  ;;  %v1934_v6 = vand.u32 2147483648, %v5918_v56  ;;  %vm1938_vm14 = vcmp.eq.f32.partialorder %v5920_v11, inf }
 0x5e8   : > { %v4437_v25 = vpop.eup %4436  ;;  %v1815_v48 = vsel %vm1813_vm5, %v1814_v40, %v1812_v9  ;;  %v1819_v49 = vsel %vm1818_vm6, %v5908_v31, %v1817_v12  ;;  %4454 = vrcp.f32 %v1839_v60  ;;  %vm1940_vm15 = vcmp.eq.f32.partialorder %v5920_v11, 0.0 }
 0x5e9   : > { %v4439_v52 = vpop.eup %4438  ;;  %v1841_v30 = vmax.f32 %v1815_v48, 1e-12  ;;  %v1822_v22 = vsel %vm1820_vm7, %v1821_v58, %v1819_v49  ;;  %v1824_v43 = vmul.f32 %v4437_v25, %v5912_v23  ;;  %4456 = vrcp.f32 %v1840_v36 }
 0x5ea   : > { %v1831_v53 = vmul.f32 %v4439_v52, %v5914_v13  ;;  %v5972_v40 = vpop.xlane.xlu0 %1925  ;;  %v5974_v16 = vpop.xlane.xlu1 %1927  ;;  %v1842_v5 = vmax.f32 %v1822_v22, 1e-12  ;;  %vm1945_vm5 = vcmp.eq.f32.partialorder %v5934_v32, inf  ;;  %vm1947_vm6 = vcmp.eq.f32.partialorder %v5934_v32, 0.0 }
 0x5eb   : > { %v1826_v31 = vsel %vm1825_vm8, %v5912_v23, %v1824_v43  ;;  %4458 = vrcp.f32 %v1841_v30  ;;  %v1941_v23 = vand.u32 2147483648, %v5920_v11  ;;  %vm1952_vm7 = vcmp.eq.f32.partialorder %v5936_v26, inf }
 0x5ec   : > { %v4441_v58 = vpop.eup %4440  ;;  %v1829_v63 = vsel %vm1827_vm9, %v1828_v59, %v1826_v31  ;;  %v1833_v33 = vsel %vm1832_vm10, %v5914_v13, %v1831_v53  ;;  %4460 = vrsqrt.f32 %v5953_v2  ;;  %vm1954_vm8 = vcmp.eq.f32.partialorder %v5936_v26, 0.0 }
 0x5ed   : > { %v4443_v21 = vpop.eup %4442  ;;  %v1843_v1 = vmax.f32 %v1829_v63, 1e-12  ;;  %v1836_v27 = vsel %vm1834_vm11, %v1835_v47, %v1833_v33  ;;  %v1930_v24 = vmul.f32 %v4441_v58, %v5918_v56  ;;  %4462 = vrsqrt.f32 %v5972_v40 }
 0x5ee   : > { %v1937_v57 = vmul.f32 %v4443_v21, %v5920_v11  ;;  %v5994_v59 = vpop.xlane.xlu0 %2053  ;;  %v5996_v60 = vpop.xlane.xlu1 %2055  ;;  %4464 = vrcp.f32 %v1842_v5  ;;  %v1844_v12 = vmax.f32 %v1836_v27, 1e-12  ;;  %v1948_v47 = vand.u32 2147483648, %v5934_v32 }
 0x5ef   : > { %v1932_v13 = vsel %vm1931_vm12, %v5918_v56, %v1930_v24  ;;  %4466 = vrcp.f32 %v1843_v1  ;;  %v1955_v56 = vand.u32 2147483648, %v5936_v26  ;;  %vm1959_vm9 = vcmp.eq.f32.partialorder %v5951_v61, inf }
 0x5f0   : > { %v1935_v36 = vsel %vm1933_vm13, %v1934_v6, %v1932_v13  ;;  %v1939_v9 = vsel %vm1938_vm14, %v5920_v11, %v1937_v57  ;;  %4468 = vrsqrt.f32 %v5974_v16  ;;  %v4445_v49 = vpop.eup %4444  ;;  %vm1961_vm10 = vcmp.eq.f32.partialorder %v5951_v61, 0.0 }
 0x5f1   : > { %v1985_v25 = vmax.f32 %v1935_v36, 1e-12  ;;  %v1942_v48 = vsel %vm1940_vm15, %v1941_v23, %v1939_v9  ;;  %4470 = vrsqrt.f32 %v5994_v59  ;;  %v4447_v30 = vpop.eup %4446  ;;  %v1944_v11 = vmul.f32 %v4445_v49, %v5934_v32 }
 0x5f2   : > { %v6016_v52 = vpop.xlane.xlu0 %2057  ;;  %4472 = vrcp.f32 %v1844_v12  ;;  %v1986_v22 = vmax.f32 %v1942_v48, 1e-12  ;;  %v6020_v43 = vpop.xlane.xlu1 %2059  ;;  %v1951_v6 = vmul.f32 %v4447_v30, %v5936_v26  ;;  %v1962_v5 = vand.u32 2147483648, %v5951_v61 }
 0x5f3   : > { %v4449_v53 = vpop.eup %4448  ;;  %4474 = vrcp.f32 %v1985_v25  ;;  %vm1966_vm11 = vcmp.eq.f32.partialorder %v5953_v2, inf  ;;  %v1946_v58 = vsel %vm1945_vm5, %v5934_v32, %v1944_v11  ;;  %vm1968_vm12 = vcmp.eq.f32.partialorder %v5953_v2, 0.0 }
 0x5f4   : > { %v4451_v31 = vpop.eup %4450  ;;  %v1969_v63 = vand.u32 2147483648, %v5953_v2  ;;  %vm1973_vm13 = vcmp.eq.f32.partialorder %v5972_v40, inf  ;;  %4476 = vrsqrt.f32 %v5996_v60  ;;  %v1949_v21 = vsel %vm1947_vm6, %v1948_v47, %v1946_v58 }
 0x5f5   : > { %v4453_v33 = vpop.eup %4452  ;;  %v1953_v1 = vsel %vm1952_vm7, %v5936_v26, %v1951_v6  ;;  %vm1975_vm14 = vcmp.eq.f32.partialorder %v5972_v40, 0.0  ;;  %v1976_v27 = vand.u32 2147483648, %v5972_v40  ;;  %4478 = vrsqrt.f32 %v6016_v52 }
 0x5f6   : > { %v4455_v24 = vpop.eup %4454  ;;  %4480 = vrcp.f32 %v1986_v22  ;;  %v1987_v57 = vmax.f32 %v1949_v21, 1e-12  ;;  %v1956_v23 = vsel %vm1954_vm8, %v1955_v56, %v1953_v1  ;;  %v1958_v12 = vmul.f32 %v4453_v33, %v5951_v61  ;;  %v6043_v32 = vpop.xlane.xlu0 %2061 }
 0x5f7   : > { %v4457_v13 = vpop.eup %4456  ;;  %v1988_v36 = vmax.f32 %v1956_v23, 1e-12  ;;  %vm1980_vm15 = vcmp.eq.f32.partialorder %v5974_v16, inf  ;;  %v1983_v9 = vand.u32 2147483648, %v5974_v16  ;;  %4482 = vrsqrt.f32 %v6020_v43  ;;  %v6058_v48 = vpop.xlane.xlu1 %2063 }
 0x5f8   : > { %v6048_v47 = vpop.eup %4458  ;;  %4484 = vrcp.f32 %v1987_v57  ;;  %v1960_v26 = vsel %vm1959_vm9, %v5951_v61, %v1958_v12  ;;  %vm1982_vm5 = vcmp.eq.f32.partialorder %v5974_v16, 0.0  ;;  %vm2071_vm6 = vcmp.eq.f32.partialorder %v5994_v59, inf }
 0x5f9   : > { %v6056_v25 = vmul.f32 %v4451_v31, %v5690_v10  ;;  %v4461_v49 = vpop.eup %4460  ;;  %4486 = vrcp.f32 %v1988_v36  ;;  %v1963_v56 = vsel %vm1961_vm10, %v1962_v5, %v1960_v26  ;;  %vm2073_vm7 = vcmp.eq.f32.partialorder %v5994_v59, 0.0 }
 0x5fa   : > { %v6064_v30 = vmul.f32 %v4449_v53, %v5687_v15  ;;  %v4463_v22 = vpop.eup %4462  ;;  %v1989_v11 = vmax.f32 %v1963_v56, 1e-12  ;;  %v1965_v6 = vmul.f32 %v4461_v49, %v5953_v2  ;;  %v2074_v58 = vand.u32 2147483648, %v5994_v59  ;;  %v6086_v33 = vpop.xlane.xlu0 %2065 }
 0x5fb   : > { %4488 = vrsqrt.f32 %v6043_v32  ;;  %v6069_v10 = vpop.eup %4464  ;;  %v1972_v31 = vmul.f32 %v4463_v22, %v5972_v40  ;;  %vm2078_vm8 = vcmp.eq.f32.partialorder %v5996_v60, inf  ;;  %vm2080_vm9 = vcmp.eq.f32.partialorder %v5996_v60, 0.0 }
 0x5fc   : > { %v6075_v61 = vpack.c.bf16 %v6064_v30, %v6056_v25  ;;  %4490 = vrsqrt.f32 %v6058_v48  ;;  %v6078_v15 = vpop.eup %4466  ;;  %v1967_v53 = vsel %vm1966_vm11, %v5953_v2, %v1965_v6  ;;  %v2081_v5 = vand.u32 2147483648, %v5996_v60 }
 0x5fd   : > { %4492 = vrcp.f32 %v1989_v11  ;;  %vm2085_vm10 = vcmp.eq.f32.partialorder %v6016_v52, inf  ;;  %v4469_v21 = vpop.eup %4468  ;;  %v1970_v1 = vsel %vm1968_vm12, %v1969_v63, %v1967_v53  ;;  %v1974_v57 = vsel %vm1973_vm13, %v5972_v40, %v1972_v31 }
 0x5fe   : > { %vm2087_vm4 = vcmp.eq.f32.partialorder %v6016_v52, 0.0  ;;  %v2088_v23 = vand.u32 2147483648, %v6016_v52  ;;  %4139 = vmatprep.mubr.bf16.mxu0 %v6075_v61  ;;  %v6097_v12 = vmul.f32 %v4455_v24, %v5699_v45  ;;  %v4471_v36 = vpop.eup %4470  ;;  %v1990_v26 = vmax.f32 %v1970_v1, 1e-12  ;;  %v6109_v45 = vpop.xlane.xlu1 %2067 }
 0x5ff   : > { %v1977_v49 = vsel %vm1975_vm14, %v1976_v27, %v1974_v57  ;;  %v1979_v2 = vmul.f32 %v4469_v21, %v5974_v16  ;;  %vm2092_vm11 = vcmp.eq.f32.partialorder %v6020_v43, inf  ;;  %v6104_v63 = vmul.f32 %v4457_v13, %v5702_v14  ;;  %v4473_v56 = vpop.eup %4472 }
 0x600   : > { %v1991_v22 = vmax.f32 %v1977_v49, 1e-12  ;;  %v2070_v11 = vmul.f32 %v4471_v36, %v5994_v59  ;;  %vm2094_vm12 = vcmp.eq.f32.partialorder %v6020_v43, 0.0  ;;  %4494 = vrsqrt.f32 %v6086_v33  ;;  %v4475_v24 = vpop.eup %4474 }
 0x601   : > { %4496 = vrcp.f32 %v1990_v26  ;;  %v1981_v40 = vsel %vm1980_vm15, %v5974_v16, %v1979_v2  ;;  %v2095_v27 = vand.u32 2147483648, %v6020_v43  ;;  %v6117_v14 = vpack.c.bf16 %v6104_v63, %v6097_v12  ;;  %v4477_v13 = vpop.eup %4476 }
 0x602   : > { %v1984_v6 = vsel %vm1982_vm5, %v1983_v9, %v1981_v40  ;;  %v2072_v31 = vsel %vm2071_vm6, %v5994_v59, %v2070_v11  ;;  %vm2099_vm13 = vcmp.eq.f32.partialorder %v6043_v32, inf  ;;  %v2102_v53 = vand.u32 2147483648, %v6043_v32  ;;  %v4479_v21 = vpop.eup %4478  ;;  %v4710_v59 = vld [vmem:[%s7279_s5 + $0x38] sm:$0xff]  }
 0x603   : > { %v1992_v1 = vmax.f32 %v1984_v6, 1e-12  ;;  %v2075_v57 = vsel %vm2073_vm7, %v2074_v58, %v2072_v31  ;;  %v2077_v36 = vmul.f32 %v4477_v13, %v5996_v60  ;;  %vm2101_vm14 = vcmp.eq.f32.partialorder %v6043_v32, 0.0  ;;  %4140 = vmatmul.mubr.bf16.vlgmr.msra.gmra.mxu0 %v6117_v14  ;;  %v4481_v16 = vpop.eup %4480 }
 0x604   : > { %4498 = vrsqrt.f32 %v6109_v45  ;;  %v2125_v9 = vmax.f32 %v2075_v57, 1e-12  ;;  %v2084_v26 = vmul.f32 %v4479_v21, %v6016_v52  ;;  %vm2106_vm15 = vcmp.eq.f32.partialorder %v6058_v48, inf  ;;  %4204 = vmatpush3.bf16.msra.mxu0 %v4710_v59  ;;  %v4483_v58 = vpop.eup %4482 }
 0x605   : > { %4500 = vrcp.f32 %v1991_v22  ;;  %v2079_v49 = vsel %vm2078_vm8, %v5996_v60, %v2077_v36  ;;  %vm2108_vm5 = vcmp.eq.f32.partialorder %v6058_v48, 0.0  ;;  %v6143_v2 = vmul.f32 %v6048_v47, %v5731_v8  ;;  %v4711_v22 = vld [vmem:[%s7279_s5 + $0x30] sm:$0xff]   ;;  %v4485_v11 = vpop.eup %4484 }
 0x606   : > { %4502 = vrcp.f32 %v1992_v1  ;;  %4205 = vmatprep.subr.bf16.mxu0 %v4711_v22  ;;  %v2082_v40 = vsel %vm2080_vm9, %v2081_v5, %v2079_v49  ;;  %v2086_v13 = vsel %vm2085_vm10, %v6016_v52, %v2084_v26  ;;  %v2091_v6 = vmul.f32 %v4483_v58, %v6020_v43  ;;  %v4487_v31 = vpop.eup %4486 }
 0x607   : > { %4504 = vrcp.f32 %v2125_v9  ;;  %v2126_v21 = vmax.f32 %v2082_v40, 1e-12  ;;  %v2089_v8 = vsel %vm2087_vm4, %v2088_v23, %v2086_v13  ;;  %v6158_v47 = vmul.f32 %v6069_v10, %v5734_v46 }
 0x608   : > { %v6162_v1 = vmul.f32 %v6078_v15, %v5747_v34  ;;  %v4489_v60 = vpop.eup %4488  ;;  %v2127_v5 = vmax.f32 %v2089_v8, 1e-12  ;;  %v2093_v57 = vsel %vm2092_vm11, %v6020_v43, %v2091_v6  ;;  %v6168_v36 = vmul.f32 %v4473_v56, %v5750_v35  ;;  %4206 = vmatpush3.bf16.msra.mxu0 %v4711_v22  ;;  %v4712_v35 = vld [vmem:[%s7279_s5 + $0x28] sm:$0xff]  }
 0x609   : > { %v6171_v52 = vmul.f32 %v4475_v24, %v5775_v55  ;;  %v4491_v23 = vpop.eup %4490  ;;  %4506 = vrcp.f32 %v2126_v21  ;;  %v2096_v46 = vsel %vm2094_vm12, %v2095_v27, %v2093_v57  ;;  %v2098_v34 = vmul.f32 %v4489_v60, %v6043_v32  ;;  %4207 = vmatprep.subr.bf16.mxu0 %v4712_v35 }
 0x60a   : > { %v6178_v10 = vpack.c.bf16 %v6158_v47, %v6143_v2  ;;  %v4493_v15 = vpop.eup %4492  ;;  %v2128_v55 = vmax.f32 %v2096_v46, 1e-12  ;;  %v2105_v56 = vmul.f32 %v4491_v23, %v6058_v48  ;;  %v2109_v24 = vand.u32 2147483648, %v6058_v48 }
 0x60b   : > { %v6187_v43 = vpack.c.bf16 %v6168_v36, %v6162_v1  ;;  %4508 = vrcp.f32 %v2127_v5  ;;  %v2100_v27 = vsel %vm2099_vm13, %v6043_v32, %v2098_v34  ;;  %v6194_v9 = vmul.f32 %v4481_v16, %v5778_v20 }
 0x60c   : > { %4143 = vmatprep.mubr.bf16.mxu0 %v6178_v10  ;;  %v6197_v26 = vmul.f32 %v4485_v11, %v5800_v42  ;;  %4510 = vrcp.f32 %v2128_v55  ;;  %v2103_v59 = vsel %vm2101_vm14, %v2102_v53, %v2100_v27  ;;  %v2107_v58 = vsel %vm2106_vm15, %v6058_v48, %v2105_v56  ;;  %4208 = vmatpush3.bf16.msra.mxu0 %v4712_v35 }
 0x60d   : > { %4144 = vmatmul.mubr.bf16.gmra.mxu0 %v6187_v43  ;;  %v6206_v49 = vmul.f32 %v4487_v31, %v5803_v19  ;;  %v4495_v22 = vpop.eup %4494  ;;  %v2129_v40 = vmax.f32 %v2103_v59, 1e-12  ;;  %v2110_v20 = vsel %vm2108_vm5, %v2109_v24, %v2107_v58  ;;  %v6212_v42 = vpack.c.bf16 %v6194_v9, %v6171_v52  ;;  %v4713_v19 = vld [vmem:[%s7279_s5 + $0x20] sm:$0xff]  }
 0x60e   : > { %v6215_v32 = vmul.f32 %v4493_v15, %v5813_v0  ;;  %v4497_v53 = vpop.eup %4496  ;;  %v2130_v16 = vmax.f32 %v2110_v20, 1e-12  ;;  %v2112_v11 = vmul.f32 %v4495_v22, %v6086_v33  ;;  %4209 = vmatprep.subr.bf16.mxu0 %v4713_v19  ;;  %vm2113_vm4 = vcmp.eq.f32.partialorder %v6086_v33, inf  ;;  %v4716_v22 = vld [vmem:[%s7279_s5 + $0x8] sm:$0xff]  }
 0x60f   : > { %4512 = vrcp.f32 %v2129_v40  ;;  %v2116_v48 = vand.u32 2147483648, %v6086_v33  ;;  %4147 = vmatprep.mubr.bf16.mxu0 %v6212_v42  ;;  %v6225_v0 = vmul.f32 %v4497_v53, %v5821_v50  ;;  %vm2115_vm6 = vcmp.eq.f32.partialorder %v6086_v33, 0.0 }
 0x610   : > { %4514 = vrcp.f32 %v2130_v16  ;;  %v2114_v6 = vsel %vm2113_vm4, %v6086_v33, %v2112_v11  ;;  %v6231_v31 = vpack.c.bf16 %v6206_v49, %v6197_v26  ;;  %4210 = vmatpush3.bf16.msra.mxu0 %v4713_v19  ;;  %vm2120_vm7 = vcmp.eq.f32.partialorder %v6109_v45, inf  ;;  %v4714_v33 = vld [vmem:[%s7279_s5 + $0x18] sm:$0xff]   ;;  %v4717_v19 = vld [vmem:[%s7279_s5] sm:$0xff]  }
 0x611   : > { %v4499_v13 = vpop.eup %4498  ;;  %v2117_v8 = vsel %vm2115_vm6, %v2116_v48, %v2114_v6  ;;  %v6236_v5 = vpack.c.bf16 %v6225_v0, %v6215_v32  ;;  %v2123_v23 = vand.u32 2147483648, %v6109_v45  ;;  %4211 = vmatprep.subr.bf16.mxu0 %v4714_v33  ;;  %vm2122_vm8 = vcmp.eq.f32.partialorder %v6109_v45, 0.0 }
 0x612   : > { %v4501_v21 = vpop.eup %4500  ;;  %v2119_v60 = vmul.f32 %v4499_v13, %v6109_v45  ;;  %v2131_v57 = vmax.f32 %v2117_v8, 1e-12 }
 0x613   : > { %v4503_v50 = vpop.eup %4502  ;;  %v6247_v15 = vmul.f32 %v4501_v21, %v5835_v39  ;;  %v4718_v21 = vld [vmem:[%s7282_s8 + $0x38] sm:$0xff]  }
 0x614   : > { %v4505_v46 = vpop.eup %4504  ;;  %v2121_v34 = vsel %vm2120_vm7, %v6109_v45, %v2119_v60  ;;  %4516 = vrcp.f32 %v2131_v57  ;;  %v6250_v55 = vmul.f32 %v4503_v50, %v5840_v41  ;;  %4212 = vmatpush3.bf16.msra.mxu0 %v4714_v33  ;;  %v4715_v45 = vld [vmem:[%s7279_s5 + $0x10] sm:$0xff]  }
 0x615   : > { %v2124_v35 = vsel %vm2122_vm8, %v2123_v23, %v2121_v34  ;;  %4148 = vmatmul.mubr.bf16.gmra.mxu0 %v6231_v31  ;;  %v6254_v24 = vmul.f32 %v4505_v46, %v5855_v18  ;;  %4213 = vmatprep.subr.bf16.mxu0 %v4715_v45 }
 0x616   : > { %v2132_v56 = vmax.f32 %v2124_v35, 1e-12  ;;  %4151 = vmatprep.mubr.bf16.mxu0 %v6236_v5  ;;  %v4507_v27 = vpop.eup %4506  ;;  %v2212_v41 = vpack.c.bf16 %v6250_v55, %v6247_v15 }
 0x617   : > { %v6260_v39 = vmul.f32 %v4507_v27, %v5858_v44 }
 0x618   : > { %4518 = vrcp.f32 %v2132_v56  ;;  %v4509_v59 = vpop.eup %4508  ;;  %4214 = vmatpush3.bf16.msra.mxu0 %v4715_v45 }
 0x619   : > { %v4511_v58 = vpop.eup %4510  ;;  %v2213_v18 = vpack.c.bf16 %v6260_v39, %v6254_v24  ;;  %4215 = vmatprep.subr.bf16.mxu0 %v4716_v22  ;;  %v6270_v20 = vmul.f32 %v4509_v59, %v5873_v28 }
 0x61a   : > { %v6273_v44 = vmul.f32 %v4511_v58, %v5876_v51 }
 0x61c   : > { %v4513_v40 = vpop.eup %4512  ;;  %4216 = vmatpush3.bf16.msra.mxu0 %v4716_v22  ;;  %v2214_v28 = vpack.c.bf16 %v6273_v44, %v6270_v20 }
 0x61d   : > { %4152 = vmatmul.mubr.bf16.gmra.mxu0 %v2212_v41  ;;  %v4515_v53 = vpop.eup %4514  ;;  %v6276_v16 = vmul.f32 %v4513_v40, %v5883_v4  ;;  %4217 = vmatprep.subr.bf16.mxu0 %v4717_v19 }
 0x61e   : > { %4155 = vmatprep.mubr.bf16.mxu0 %v2213_v18  ;;  %v6279_v11 = vmul.f32 %v4515_v53, %v5890_v37 }
 0x620   : > { %v2215_v51 = vpack.c.bf16 %v6279_v11, %v6276_v16  ;;  %4218 = vmatpush3.bf16.msra.mxu0 %v4717_v19 }
 0x621   : > { %v4517_v48 = vpop.eup %4516  ;;  %4263 = vmatprep.subr.bf16.mxu0 %v4801_v7 }
 0x622   : > { %v6290_v37 = vmul.f32 %v4517_v48, %v5897_v29  ;;  %v4719_v29 = vld [vmem:[%s7282_s8 + $0x30] sm:$0xff]  }
 0x625   : > { %v4519_v4 = vpop.eup %4518  ;;  %4156 = vmatmul.mubr.bf16.gmra.mxu0 %v2214_v28 }
 0x626   : > { %4159 = vmatprep.mubr.bf16.mxu0 %v2215_v51  ;;  %v6293_v13 = vmul.f32 %v4519_v4, %v5900_v3  ;;  %v4720_v3 = vld [vmem:[%s7282_s8 + $0x28] sm:$0xff]  }
 0x628   : > { %v2216_v6 = vpack.c.bf16 %v6293_v13, %v6290_v37 }
 0x62d   : > { %4160 = vmatmul.mubr.bf16.gmra.mxu0 %v2216_v6 }
 0x62e   : > { %4219 = vmatprep.mubr.bf16.mxu0 %v6075_v61  ;;  %v4721_v61 = vld [vmem:[%s7282_s8 + $0x20] sm:$0xff]  }
 0x635   : > { %4220 = vmatmul.mubr.bf16.vlgmr.msra.gmra.mxu0 %v6117_v14  ;;  %v4722_v14 = vld [vmem:[%s7282_s8 + $0x18] sm:$0xff]  }
 0x636   : > { %4223 = vmatprep.mubr.bf16.mxu0 %v6178_v10  ;;  %4264 = vmatpush3.bf16.msra.mxu0 %v4718_v21  ;;  %v4723_v10 = vld [vmem:[%s7282_s8 + $0x10] sm:$0xff]  }
 0x637   : > { %4265 = vmatprep.subr.bf16.mxu0 %v4801_v7 }
 0x63a   : > { %4266 = vmatpush3.bf16.msra.mxu0 %v4719_v29 }
 0x63b   : > { %4267 = vmatprep.subr.bf16.mxu0 %v4801_v7 }
 0x63d   : > { %4224 = vmatmul.mubr.bf16.gmra.mxu0 %v6187_v43  ;;  %v4724_v43 = vld [vmem:[%s7282_s8 + $0x8] sm:$0xff]  }
 0x63e   : > { %4227 = vmatprep.mubr.bf16.mxu0 %v6212_v42  ;;  %4268 = vmatpush3.bf16.msra.mxu0 %v4720_v3  ;;  %v4725_v42 = vld [vmem:[%s7282_s8] sm:$0xff]  }
 0x63f   : > { %4269 = vmatprep.subr.bf16.mxu0 %v4801_v7 }
 0x642   : > { %4270 = vmatpush3.bf16.msra.mxu0 %v4721_v61  ;;  %v4728_v61 = vld [vmem:[%s7281_s7 + $0x30] sm:$0xff]  }
 0x643   : > { %4271 = vmatprep.subr.bf16.mxu0 %v4801_v7 }
 0x645   : > { %4228 = vmatmul.mubr.bf16.gmra.mxu0 %v6231_v31 }
 0x646   : > { %4231 = vmatprep.mubr.bf16.mxu0 %v6236_v5  ;;  %4272 = vmatpush3.bf16.msra.mxu0 %v4722_v14  ;;  %v6340_v5 = vld [vmem:[%s7278_s4] ss:$0 sm:$0xff] }
 0x647   : > { %4273 = vmatprep.subr.bf16.mxu0 %v4801_v7 }
 0x64a   : > { %4274 = vmatpush3.bf16.msra.mxu0 %v4723_v10 }
 0x64b   : > { %4275 = vmatprep.subr.bf16.mxu0 %v4801_v7 }
 0x64d   : > { %4232 = vmatmul.mubr.bf16.gmra.mxu0 %v2212_v41 }
 0x64e   : > { %4235 = vmatprep.mubr.bf16.mxu0 %v2213_v18  ;;  %4276 = vmatpush3.bf16.msra.mxu0 %v4724_v43 }
 0x64f   : > { %4277 = vmatprep.subr.bf16.mxu0 %v4801_v7 }
 0x652   : > { %4278 = vmatpush3.bf16.msra.mxu0 %v4725_v42 }
 0x655   : > { %4236 = vmatmul.mubr.bf16.gmra.mxu0 %v2214_v28  ;;  %v4727_v28 = vld [vmem:[%s7281_s7 + $0x38] sm:$0xff]  }
 0x656   : > { %4239 = vmatprep.mubr.bf16.mxu0 %v2215_v51 }
 0x65d   : > { %4240 = vmatmul.mubr.bf16.gmra.mxu0 %v2216_v6 }
 0x65e   : > { %4279 = vmatprep.mubr.msk.bf16.mxu0 %vm4802_vm1, %v4801_v7 }
 0x6c3   : > { %v4141_v31 = vpop.f32.mrf.mxu0 }
 0x6c4   : > { %v2260_v23 = vadd.f32 %v6340_v5, %v4141_v31 }
 0x6c5   : > { %v2251_v8 = vpop.f32.mrf.mxu0 }
 0x6c6   : > { %v2252_v50 = vadd.f32 %v6340_v5, %v2251_v8  ;;  %v2348_v45 = vmax.f32 %v2260_v23, 0.0 }
 0x6c7   : > { %v4142_v60 = vpop.f32.mrf.mxu0 }
 0x6c8   : > { %v2263_v57 = vadd.f32 %v6340_v5, %v4142_v60  ;;  %v2346_v35 = vmax.f32 %v2252_v50, 0.0 }
 0x6c9   : > { %v2254_v33 = vpop.f32.mrf.mxu0 }
 0x6ca   : > { %v2255_v46 = vadd.f32 %v6340_v5, %v2254_v33  ;;  %v2349_v34 = vmax.f32 %v2263_v57, 0.0  ;;  %v4729_v57 = vld [vmem:[%s7281_s7 + $0x28] sm:$0xff]  }
 0x6cc   : > { %v2347_v56 = vmax.f32 %v2255_v46, 0.0  ;;  %v2371_v58 = vpack.c.bf16 %v2349_v34, %v2348_v45  ;;  %v4730_v45 = vld [vmem:[%s7281_s7 + $0x20] sm:$0xff]  }
 0x6cd   : > { %v4145_v27 = vpop.f32.mrf.mxu0 }
 0x6ce   : > { %v2370_v59 = vpack.c.bf16 %v2347_v56, %v2346_v35  ;;  %v2276_v53 = vadd.f32 %v6340_v5, %v4145_v27 }
 0x6cf   : > { %v2267_v41 = vpop.f32.mrf.mxu0 }
 0x6d0   : > { %4179 = vmatprep.mubr.bf16.mxu1 %v2370_v59  ;;  %v2268_v22 = vadd.f32 %v6340_v5, %v2267_v41  ;;  %v2352_v29 = vmax.f32 %v2276_v53, 0.0 }
 0x6d1   : > { %v4146_v18 = vpop.f32.mrf.mxu0  ;;  %4180 = vmatmul.mubr.bf16.vlgmr.msra.gmra.mxu1 %v2371_v58 }
 0x6d2   : > { %v2279_v40 = vadd.f32 %v6340_v5, %v4146_v18  ;;  %4244 = vmatpush3.bf16.msra.mxu1 %v4727_v28  ;;  %v2350_v6 = vmax.f32 %v2268_v22, 0.0 }
 0x6d3   : > { %v2270_v19 = vpop.f32.mrf.mxu0  ;;  %4245 = vmatprep.subr.bf16.mxu1 %v4801_v7 }
 0x6d4   : > { %v2271_v48 = vadd.f32 %v6340_v5, %v2270_v19  ;;  %v2353_v51 = vmax.f32 %v2279_v40, 0.0  ;;  %v4731_v19 = vld [vmem:[%s7281_s7 + $0x18] sm:$0xff]  }
 0x6d5   : > { %v4149_v4 = vpop.f32.mrf.mxu0 }
 0x6d6   : > { %v2351_v21 = vmax.f32 %v2271_v48, 0.0  ;;  %4246 = vmatpush3.bf16.msra.mxu1 %v4728_v61  ;;  %v2373_v10 = vpack.c.bf16 %v2353_v51, %v2352_v29  ;;  %v2292_v8 = vadd.f32 %v6340_v5, %v4149_v4 }
 0x6d7   : > { %v2283_v3 = vpop.f32.mrf.mxu0  ;;  %4247 = vmatprep.subr.bf16.mxu1 %v4801_v7 }
 0x6d8   : > { %v2372_v14 = vpack.c.bf16 %v2351_v21, %v2350_v6  ;;  %v2284_v42 = vadd.f32 %v6340_v5, %v2283_v3  ;;  %v2356_v35 = vmax.f32 %v2292_v8, 0.0  ;;  %v4732_v3 = vld [vmem:[%s7281_s7 + $0x10] sm:$0xff]  }
 0x6d9   : > { %v4150_v43 = vpop.f32.mrf.mxu0 }
 0x6da   : > { %v2295_v31 = vadd.f32 %v6340_v5, %v4150_v43  ;;  %4183 = vmatprep.mubr.bf16.mxu1 %v2372_v14  ;;  %4248 = vmatpush3.bf16.msra.mxu1 %v4729_v57  ;;  %v2354_v46 = vmax.f32 %v2284_v42, 0.0 }
 0x6db   : > { %v2286_v60 = vpop.f32.mrf.mxu0  ;;  %4184 = vmatmul.mubr.bf16.gmra.mxu1 %v2373_v10  ;;  %4249 = vmatprep.subr.bf16.mxu1 %v4801_v7 }
 0x6dc   : > { %v2287_v50 = vadd.f32 %v6340_v5, %v2286_v60  ;;  %v2357_v23 = vmax.f32 %v2295_v31, 0.0  ;;  %v4733_v60 = vld [vmem:[%s7281_s7 + $0x8] sm:$0xff]  }
 0x6dd   : > { %v4153_v33 = vpop.f32.mrf.mxu0 }
 0x6de   : > { %v2355_v34 = vmax.f32 %v2287_v50, 0.0  ;;  %4250 = vmatpush3.bf16.msra.mxu1 %v4730_v45  ;;  %v2375_v59 = vpack.c.bf16 %v2357_v23, %v2356_v35  ;;  %v2308_v22 = vadd.f32 %v6340_v5, %v4153_v33 }
 0x6df   : > { %v2299_v56 = vpop.f32.mrf.mxu0  ;;  %4251 = vmatprep.subr.bf16.mxu1 %v4801_v7 }
 0x6e0   : > { %v2374_v27 = vpack.c.bf16 %v2355_v34, %v2354_v46  ;;  %v2300_v58 = vadd.f32 %v6340_v5, %v2299_v56  ;;  %v2360_v6 = vmax.f32 %v2308_v22, 0.0  ;;  %v4734_v56 = vld [vmem:[%s7281_s7] sm:$0xff]  }
 0x6e1   : > { %v4154_v41 = vpop.f32.mrf.mxu0 }
 0x6e2   : > { %v2311_v18 = vadd.f32 %v6340_v5, %v4154_v41  ;;  %4187 = vmatprep.mubr.bf16.mxu1 %v2374_v27  ;;  %4252 = vmatpush3.bf16.msra.mxu1 %v4731_v19  ;;  %v2358_v51 = vmax.f32 %v2300_v58, 0.0 }
 0x6e3   : > { %v2302_v40 = vpop.f32.mrf.mxu0  ;;  %4188 = vmatmul.mubr.bf16.gmra.mxu1 %v2375_v59  ;;  %4253 = vmatprep.subr.bf16.mxu1 %v4801_v7 }
 0x6e4   : > { %v2303_v53 = vadd.f32 %v6340_v5, %v2302_v40  ;;  %v2361_v28 = vmax.f32 %v2311_v18, 0.0 }
 0x6e5   : > { %v4157_v48 = vpop.f32.mrf.mxu0 }
 0x6e6   : > { %v2359_v4 = vmax.f32 %v2303_v53, 0.0  ;;  %4254 = vmatpush3.bf16.msra.mxu1 %v4732_v3  ;;  %v2377_v61 = vpack.c.bf16 %v2361_v28, %v2360_v6  ;;  %v2324_v42 = vadd.f32 %v6340_v5, %v4157_v48  ;;  %v6400_v6 = vld [vmem:[%s7280_s6] ss:$0 sm:$0xff] }
 0x6e7   : > { %v2315_v21 = vpop.f32.mrf.mxu0  ;;  %4255 = vmatprep.subr.bf16.mxu1 %v4801_v7  ;;  %7336 = vst [vmem:[#allocation7_spill] sm:$0xff] %v6400_v6 }
 0x6e8   : > { %v2376_v29 = vpack.c.bf16 %v2359_v4, %v2358_v51  ;;  %v2316_v10 = vadd.f32 %v6340_v5, %v2315_v21  ;;  %v2364_v46 = vmax.f32 %v2324_v42, 0.0 }
 0x6e9   : > { %v4158_v14 = vpop.f32.mrf.mxu0 }
 0x6ea   : > { %v2327_v43 = vadd.f32 %v6340_v5, %v4158_v14  ;;  %4191 = vmatprep.mubr.bf16.mxu1 %v2376_v29  ;;  %4256 = vmatpush3.bf16.msra.mxu1 %v4733_v60  ;;  %v2362_v23 = vmax.f32 %v2316_v10, 0.0 }
 0x6eb   : > { %v2318_v31 = vpop.f32.mrf.mxu0  ;;  %4192 = vmatmul.mubr.bf16.gmra.mxu1 %v2377_v61  ;;  %4257 = vmatprep.subr.bf16.mxu1 %v4801_v7 }
 0x6ec   : > { %v2319_v8 = vadd.f32 %v6340_v5, %v2318_v31  ;;  %v2365_v50 = vmax.f32 %v2327_v43, 0.0 }
 0x6ed   : > { %v4161_v57 = vpop.f32.mrf.mxu0 }
 0x6ee   : > { %v2363_v33 = vmax.f32 %v2319_v8, 0.0  ;;  %4258 = vmatpush3.bf16.msra.mxu1 %v4734_v56  ;;  %v2379_v27 = vpack.c.bf16 %v2365_v50, %v2364_v46  ;;  %v2340_v58 = vadd.f32 %v6340_v5, %v4161_v57 }
 0x6ef   : > { %v2331_v34 = vpop.f32.mrf.mxu0 }
 0x6f0   : > { %v2378_v35 = vpack.c.bf16 %v2363_v33, %v2362_v23  ;;  %v2332_v59 = vadd.f32 %v6340_v5, %v2331_v34  ;;  %v2368_v48 = vmax.f32 %v2340_v58, 0.0 }
 0x6f1   : > { %v4162_v45 = vpop.f32.mrf.mxu0 }
 0x6f2   : > { %v2343_v41 = vadd.f32 %v6340_v5, %v4162_v45  ;;  %4195 = vmatprep.mubr.bf16.mxu1 %v2378_v35  ;;  %v2366_v19 = vmax.f32 %v2332_v59, 0.0 }
 0x6f3   : > { %v2334_v18 = vpop.f32.mrf.mxu0  ;;  %4196 = vmatmul.mubr.bf16.gmra.mxu1 %v2379_v27 }
 0x6f4   : > { %v2335_v22 = vadd.f32 %v6340_v5, %v2334_v18  ;;  %v2369_v40 = vmax.f32 %v2343_v41, 0.0 }
 0x6f5   : > { %v4221_v53 = vpop.f32.mrf.mxu0 }
 0x6f6   : > { %v2367_v28 = vmax.f32 %v2335_v22, 0.0  ;;  %v2554_v21 = vadd.f32 %v6400_v6, %v4221_v53  ;;  %v2381_v29 = vpack.c.bf16 %v2369_v40, %v2368_v48 }
 0x6f7   : > { %v2545_v51 = vpop.f32.mrf.mxu0 }
 0x6f8   : > { %v2380_v4 = vpack.c.bf16 %v2367_v28, %v2366_v19  ;;  %v2546_v61 = vadd.f32 %v6400_v6, %v2545_v51  ;;  %v2642_v10 = vmax.f32 %v2554_v21, 0.0 }
 0x6f9   : > { %v4222_v3 = vpop.f32.mrf.mxu0 }
 0x6fa   : > { %v2557_v5 = vadd.f32 %v6400_v6, %v4222_v3  ;;  %4199 = vmatprep.mubr.bf16.mxu1 %v2380_v4  ;;  %v2640_v8 = vmax.f32 %v2546_v61, 0.0 }
 0x6fb   : > { %4200 = vmatmul.mubr.bf16.gmra.mxu1 %v2381_v29  ;;  %v2548_v14 = vpop.f32.mrf.mxu0 }
 0x6fc   : > { %v2643_v43 = vmax.f32 %v2557_v5, 0.0  ;;  %v2549_v42 = vadd.f32 %v6400_v6, %v2548_v14  ;;  %4259 = vmatprep.mubr.msk.bf16.mxu1 %vm4802_vm1, %v4801_v7 }
 0x6fd   : > { %v4225_v31 = vpop.f32.mrf.mxu0 }
 0x6fe   : > { %v6408_v60 = vpack.c.bf16 %v2643_v43, %v2642_v10  ;;  %v2641_v50 = vmax.f32 %v2549_v42, 0.0  ;;  %v2570_v33 = vadd.f32 %v6400_v6, %v4225_v31 }
 0x6ff   : > { %v2561_v57 = vpop.f32.mrf.mxu0 }
 0x700   : > { %7337 = vst [vmem:[#allocation8_spill] sm:$0xff] %v6408_v60  ;;  %v6410_v23 = vpack.c.bf16 %v2641_v50, %v2640_v8  ;;  %v2562_v34 = vadd.f32 %v6400_v6, %v2561_v57  ;;  %v2646_v27 = vmax.f32 %v2570_v33, 0.0 }
 0x701   : > { %v4226_v46 = vpop.f32.mrf.mxu0 }
 0x702   : > { %7338 = vst [vmem:[#allocation9_spill] sm:$0xff] %v6410_v23  ;;  %v2573_v35 = vadd.f32 %v6400_v6, %v4226_v46  ;;  %v2644_v59 = vmax.f32 %v2562_v34, 0.0 }
 0x703   : > { %v2564_v56 = vpop.f32.mrf.mxu0 }
 0x704   : > { %v2647_v45 = vmax.f32 %v2573_v35, 0.0  ;;  %v2565_v7 = vadd.f32 %v6400_v6, %v2564_v56 }
 0x706   : > { %v6416_v41 = vpack.c.bf16 %v2647_v45, %v2646_v27  ;;  %v2645_v58 = vmax.f32 %v2565_v7, 0.0 }
 0x708   : > { %7339 = vst [vmem:[#allocation10_spill] sm:$0xff] %v6416_v41  ;;  %v6418_v18 = vpack.c.bf16 %v2645_v58, %v2644_v59 }
 0x70a   : > { %7340 = vst [vmem:[#allocation11_spill] sm:$0xff] %v6418_v18 }
 0x791   : > { %v4181_v22 = vpop.f32.mrf.mxu1 }
 0x792   : > { %v2678_v14 = vsel %vm1088_vm0, %v4181_v22, -inf }
 0x793   : > { %v2416_v40 = vpop.f32.mrf.mxu1 }
 0x794   : > { %v2676_v10 = vsel %vm1088_vm0, %v2416_v40, -inf }
 0x795   : > { %v4182_v53 = vpop.f32.mrf.mxu1 }
 0x796   : > { %v2679_v4 = vsel %vm1088_vm0, %v4182_v53, -inf }
 0x797   : > { %v2419_v19 = vpop.f32.mrf.mxu1 }
 0x798   : > { %v2677_v43 = vsel %vm1088_vm0, %v2419_v19, -inf }
 0x79b   : > { %v6420_v28 = vpop.f32.mrf.mxu1 }
 0x79c   : > { %v2684_v21 = vsel %vm1088_vm0, %v6420_v28, -inf }
 0x79d   : > { %v6422_v48 = vpop.f32.mrf.mxu1  ;;  %v2685_v31 = vmax.f32 %v2678_v14, %v2684_v21 }
 0x79e   : > { %v2680_v29 = vsel %vm1088_vm0, %v6422_v48, -inf }
 0x79f   : > { %v6424_v51 = vpop.f32.mrf.mxu1  ;;  %v2681_v8 = vmax.f32 %v2676_v10, %v2680_v29 }
 0x7a0   : > { %v2686_v3 = vsel %vm1088_vm0, %v6424_v51, -inf }
 0x7a1   : > { %v2687_v61 = vmax.f32 %v2679_v4, %v2686_v3  ;;  %v6433_v5 = vpop.f32.mrf.mxu1 }
 0x7a2   : > { %v2682_v42 = vsel %vm1088_vm0, %v6433_v5, -inf }
 0x7a3   : > { %v2683_v50 = vmax.f32 %v2677_v43, %v2682_v42  ;;  %v6440_v57 = vpop.f32.mrf.mxu1  ;;  %v2689_v33 = vmax.f32 %v2685_v31, %v2687_v61 }
 0x7a5   : > { %v2688_v46 = vmax.f32 %v2681_v8, %v2683_v50  ;;  %v6442_v34 = vpop.f32.mrf.mxu1 }
 0x7a7   : > { %v2690_v35 = vmax.f32 %v2688_v46, %v2689_v33  ;;  %v6444_v56 = vpop.f32.mrf.mxu1  ;;  %v2814_v46 = vsel %vm1088_vm0, %v6440_v57, -inf }
 0x7a8   : > { %v2815_v14 = vsel %vm1088_vm0, %v6444_v56, -inf }
 0x7a9   : > { %v2691_v27 = vrot.slane %v2690_v35, 4  ;;  %v6446_v45 = vpop.f32.mrf.mxu1 }
 0x7aa   : > { %v2813_v31 = vsel %vm1088_vm0, %v6446_v45, -inf }
 0x7ab   : > { %v2692_v7 = vmax.f32 %v2690_v35, %v2691_v27  ;;  %v6448_v59 = vpop.f32.mrf.mxu1  ;;  %v2812_v35 = vsel %vm1088_vm0, %v6442_v34, -inf }
 0x7ac   : > { %v2820_v10 = vsel %vm1088_vm0, %v6448_v59, -inf }
 0x7ad   : > { %v2693_v58 = vrot.slane %v2692_v7, 2  ;;  %v6450_v4 = vpop.f32.mrf.mxu1 }
 0x7ae   : > { %v2816_v43 = vsel %vm1088_vm0, %v6450_v4, -inf }
 0x7af   : > { %v2694_v21 = vmax.f32 %v2692_v7, %v2693_v58  ;;  %v6452_v29 = vpop.f32.mrf.mxu1  ;;  %v2821_v58 = vmax.f32 %v2814_v46, %v2820_v10  ;;  %v2817_v38 = vmax.f32 %v2812_v35, %v2816_v43 }
 0x7b0   : > { %v2822_v3 = vsel %vm1088_vm0, %v6452_v29, -inf }
 0x7b1   : > { %v2695_v61 = vrot.slane %v2694_v21, 1  ;;  %v6462_v42 = vpop.f32.mrf.mxu1  ;;  %v2823_v8 = vmax.f32 %v2815_v14, %v2822_v3 }
 0x7b2   : > { %v2818_v50 = vsel %vm1088_vm0, %v6462_v42, -inf }
 0x7b3   : > { %v2696_v33 = vmax.f32 %v2694_v21, %v2695_v61  ;;  %v2819_v27 = vmax.f32 %v2813_v31, %v2818_v50  ;;  %v6472_v7 = vpop.f32.mrf.mxu1  ;;  %v2825_v21 = vmax.f32 %v2821_v58, %v2823_v8 }
 0x7b5   : > { %v2697_v17 = vsub.f32 %v2416_v40, %v2696_v33  ;;  %v2698_v62 = vsub.f32 %v2419_v19, %v2696_v33  ;;  %v2699_v41 = vsub.f32 %v4181_v22, %v2696_v33  ;;  %v2700_v18 = vsub.f32 %v4182_v53, %v2696_v33  ;;  %v6474_v3 = vpop.f32.mrf.mxu1 }
 0x7b6   : > { %v2701_v14 = vsub.f32 %v6422_v48, %v2696_v33  ;;  %v2824_v54 = vmax.f32 %v2817_v38, %v2819_v27  ;;  %v2702_v31 = vsub.f32 %v6433_v5, %v2696_v33  ;;  %v2703_v22 = vsub.f32 %v6420_v28, %v2696_v33 }
 0x7b7   : > { %v2705_v61 = vmul.f32 1.442695, %v2697_v17  ;;  %v2707_v60 = vmul.f32 1.442695, %v2698_v62  ;;  %v2709_v23 = vmul.f32 1.442695, %v2699_v41  ;;  %v6477_v6 = vpop.f32.mrf.mxu1  ;;  %v2704_v62 = vsub.f32 %v6424_v51, %v2696_v33 }
 0x7b8   : > { %v2711_v50 = vmul.f32 1.442695, %v2700_v18  ;;  %v2826_v10 = vmax.f32 %v2824_v54, %v2825_v21  ;;  %v2713_v53 = vmul.f32 1.442695, %v2701_v14  ;;  %v2715_v17 = vmul.f32 1.442695, %v2702_v31 }
 0x7b9   : > { %4520 = vpow2.f32 %v2705_v61  ;;  %v6480_v40 = vpop.f32.mrf.mxu1  ;;  %v2717_v18 = vmul.f32 1.442695, %v2703_v22  ;;  %v2719_v28 = vmul.f32 1.442695, %v2704_v62  ;;  %v2948_v8 = vsel %vm1088_vm0, %v6474_v3, -inf }
 0x7ba   : > { %4522 = vpow2.f32 %v2707_v60  ;;  %v2827_v19 = vrot.slane %v2826_v10, 4  ;;  %v2949_v33 = vsel %vm1088_vm0, %v6480_v40, -inf  ;;  %v2951_v27 = vsel %vm1088_vm0, %v6477_v6, -inf }
 0x7bb   : > { %4524 = vpow2.f32 %v2709_v23  ;;  %v6483_v48 = vpop.f32.mrf.mxu1 }
 0x7bc   : > { %4526 = vpow2.f32 %v2711_v50  ;;  %v2828_v38 = vmax.f32 %v2826_v10, %v2827_v19  ;;  %v2956_v58 = vsel %vm1088_vm0, %v6483_v48, -inf  ;;  %v2950_v50 = vsel %vm1088_vm0, %v6472_v7, -inf }
 0x7bd   : > { %v6486_v41 = vpop.f32.mrf.mxu1  ;;  %4528 = vpow2.f32 %v2713_v53  ;;  %v2957_v22 = vmax.f32 %v2950_v50, %v2956_v58 }
 0x7be   : > { %v2829_v54 = vrot.slane %v2828_v38, 2  ;;  %4530 = vpow2.f32 %v2715_v17  ;;  %v2952_v23 = vsel %vm1088_vm0, %v6486_v41, -inf }
 0x7bf   : > { %v6488_v5 = vpop.f32.mrf.mxu1  ;;  %4532 = vpow2.f32 %v2717_v18  ;;  %v2953_v21 = vmax.f32 %v2948_v8, %v2952_v23 }
 0x7c0   : > { %v2830_v60 = vmax.f32 %v2828_v38, %v2829_v54  ;;  %v2958_v43 = vsel %vm1088_vm0, %v6488_v5, -inf  ;;  %4534 = vpow2.f32 %v2719_v28 }
 0x7c1   : > { %v6494_v51 = vpop.f32.mrf.mxu1  ;;  %v2959_v61 = vmax.f32 %v2951_v27, %v2958_v43 }
 0x7c2   : > { %v2954_v46 = vsel %vm1088_vm0, %v6494_v51, -inf  ;;  %v2831_v35 = vrot.slane %v2830_v60, 1 }
 0x7c3   : > { %v2955_v14 = vmax.f32 %v2949_v33, %v2954_v46  ;;  %v2961_v23 = vmax.f32 %v2957_v22, %v2959_v61 }
 0x7c4   : > { %v2832_v31 = vmax.f32 %v2830_v60, %v2831_v35 }
 0x7c5   : > { %v2960_v53 = vmax.f32 %v2953_v21, %v2955_v14 }
 0x7c6   : > { %v6508_v10 = vpop.eup %4520  ;;  %v2833_v17 = vsub.f32 %v6442_v34, %v2832_v31  ;;  %v2834_v38 = vsub.f32 %v6446_v45, %v2832_v31  ;;  %v2835_v18 = vsub.f32 %v6440_v57, %v2832_v31  ;;  %v2836_v60 = vsub.f32 %v6444_v56, %v2832_v31 }
 0x7c7   : > { %v6510_v19 = vpop.eup %4522  ;;  %v2721_v62 = vsel %vm1088_vm0, %v6508_v10, 0.0  ;;  %v2837_v33 = vsub.f32 %v6450_v4, %v2832_v31  ;;  %v2962_v35 = vmax.f32 %v2960_v53, %v2961_v23  ;;  %v2838_v58 = vsub.f32 %v6462_v42, %v2832_v31 }
 0x7c8   : > { %v6517_v54 = vpop.eup %4524  ;;  %v2722_v28 = vsel %vm1088_vm0, %v6510_v19, 0.0  ;;  %v2841_v46 = vmul.f32 1.442695, %v2833_v17  ;;  %v2843_v45 = vmul.f32 1.442695, %v2834_v38  ;;  %v2839_v50 = vsub.f32 %v6448_v59, %v2832_v31 }
 0x7c9   : > { %v6522_v43 = vpop.eup %4526  ;;  %v2723_v8 = vadd.f32 %v2722_v28, %v2721_v62  ;;  %v2724_v34 = vsel %vm1088_vm0, %v6517_v54, 0.0  ;;  %v2845_v14 = vmul.f32 1.442695, %v2835_v18  ;;  %v2847_v21 = vmul.f32 1.442695, %v2836_v60 }
 0x7ca   : > { %v6527_v57 = vpop.eup %4528  ;;  %v2726_v56 = vsel %vm1088_vm0, %v6522_v43, 0.0  ;;  %4536 = vpow2.f32 %v2841_v46  ;;  %v2849_v22 = vmul.f32 1.442695, %v2837_v33  ;;  %v2963_v62 = vrot.slane %v2962_v35, 4 }
 0x7cb   : > { %v2725_v27 = vadd.f32 %v2724_v34, %v2723_v8  ;;  %v6532_v61 = vpop.eup %4530  ;;  %4538 = vpow2.f32 %v2843_v45  ;;  %v2728_v53 = vsel %vm1088_vm0, %v6527_v57, 0.0  ;;  %v2840_v38 = vsub.f32 %v6452_v29, %v2832_v31 }
 0x7cc   : > { %4540 = vpow2.f32 %v2845_v14  ;;  %v6537_v17 = vpop.eup %4532  ;;  %v2851_v18 = vmul.f32 1.442695, %v2838_v58  ;;  %v2730_v28 = vsel %vm1088_vm0, %v6532_v61, 0.0  ;;  %v2964_v60 = vmax.f32 %v2962_v35, %v2963_v62 }
 0x7cd   : > { %v2727_v4 = vadd.f32 %v2726_v56, %v2725_v27  ;;  %4542 = vpow2.f32 %v2847_v21  ;;  %v6542_v23 = vpop.eup %4534  ;;  %v2853_v8 = vmul.f32 1.442695, %v2839_v50  ;;  %v2732_v33 = vsel %vm1088_vm0, %v6537_v17, 0.0 }
 0x7ce   : > { %4544 = vpow2.f32 %v2849_v22  ;;  %v2965_v34 = vrot.slane %v2964_v60, 2  ;;  %v2855_v45 = vmul.f32 1.442695, %v2840_v38  ;;  %v2734_v29 = vsel %vm1088_vm0, %v6542_v23, 0.0 }
 0x7cf   : > { %v2729_v42 = vadd.f32 %v2728_v53, %v2727_v4  ;;  %4546 = vpow2.f32 %v2851_v18 }
 0x7d0   : > { %v2966_v31 = vmax.f32 %v2964_v60, %v2965_v34  ;;  %4548 = vpow2.f32 %v2853_v8 }
 0x7d1   : > { %v2731_v59 = vadd.f32 %v2730_v28, %v2729_v42  ;;  %4550 = vpow2.f32 %v2855_v45 }
 0x7d2   : > { %v2967_v58 = vrot.slane %v2966_v31, 1 }
 0x7d3   : > { %v2733_v46 = vadd.f32 %v2732_v33, %v2731_v59 }
 0x7d4   : > { %v2968_v14 = vmax.f32 %v2966_v31, %v2967_v58 }
 0x7d5   : > { %v2735_v27 = vadd.f32 %v2734_v29, %v2733_v46 }
 0x7d6   : > { %v2969_v22 = vsub.f32 %v6474_v3, %v2968_v14  ;;  %v2970_v53 = vsub.f32 %v6480_v40, %v2968_v14  ;;  %v2971_v62 = vsub.f32 %v6472_v7, %v2968_v14  ;;  %v2972_v28 = vsub.f32 %v6477_v6, %v2968_v14 }
 0x7d7   : > { %v2736_v35 = vrot.slane %v2735_v27, 4  ;;  %v6548_v21 = vpop.eup %4536  ;;  %v2973_v8 = vsub.f32 %v6486_v41, %v2968_v14  ;;  %v2974_v46 = vsub.f32 %v6494_v51, %v2968_v14 }
 0x7d8   : > { %v6550_v4 = vpop.eup %4538  ;;  %v2857_v50 = vsel %vm1088_vm0, %v6548_v21, 0.0  ;;  %v2977_v40 = vmul.f32 1.442695, %v2969_v22  ;;  %v2979_v45 = vmul.f32 1.442695, %v2970_v53 }
 0x7d9   : > { %v2737_v56 = vadd.f32 %v2736_v35, %v2735_v27  ;;  %v6557_v42 = vpop.eup %4540  ;;  %v2858_v18 = vsel %vm1088_vm0, %v6550_v4, 0.0  ;;  %v2981_v29 = vmul.f32 1.442695, %v2971_v62  ;;  %v2983_v27 = vmul.f32 1.442695, %v2972_v28 }
 0x7da   : > { %v6562_v60 = vpop.eup %4542  ;;  %v2859_v59 = vadd.f32 %v2858_v18, %v2857_v50  ;;  %v2860_v3 = vsel %vm1088_vm0, %v6557_v42, 0.0  ;;  %4552 = vpow2.f32 %v2977_v40  ;;  %v2975_v35 = vsub.f32 %v6483_v48, %v2968_v14 }
 0x7db   : > { %v2738_v38 = vrot.slane %v2737_v56, 2  ;;  %v6567_v34 = vpop.eup %4544  ;;  %v2862_v6 = vsel %vm1088_vm0, %v6562_v60, 0.0  ;;  %4554 = vpow2.f32 %v2979_v45  ;;  %v2976_v62 = vsub.f32 %v6488_v5, %v2968_v14 }
 0x7dc   : > { %v2861_v7 = vadd.f32 %v2860_v3, %v2859_v59  ;;  %v6572_v58 = vpop.eup %4546  ;;  %v2864_v22 = vsel %vm1088_vm0, %v6567_v34, 0.0  ;;  %4556 = vpow2.f32 %v2981_v29  ;;  %v2989_v59 = vmul.f32 1.442695, %v2975_v35 }
 0x7dd   : > { %v2739_v33 = vadd.f32 %v2738_v38, %v2737_v56  ;;  %v2985_v56 = vmul.f32 1.442695, %v2973_v8  ;;  %v6577_v51 = vpop.eup %4548  ;;  %4558 = vpow2.f32 %v2983_v27  ;;  %v2987_v38 = vmul.f32 1.442695, %v2974_v46 }
 0x7de   : > { %v2863_v41 = vadd.f32 %v2862_v6, %v2861_v7  ;;  %v2866_v18 = vsel %vm1088_vm0, %v6572_v58, 0.0  ;;  %v6582_v28 = vpop.eup %4550  ;;  %v2868_v8 = vsel %vm1088_vm0, %v6577_v51, 0.0  ;;  %v2991_v3 = vmul.f32 1.442695, %v2976_v62 }
 0x7df   : > { %v2740_v31 = vrot.slane %v2739_v33, 1  ;;  %v2870_v5 = vsel %vm1088_vm0, %v6582_v28, 0.0 }
 0x7e0   : > { %v2865_v53 = vadd.f32 %v2864_v22, %v2863_v41 }
 0x7e1   : > { %v2741_v50 = vadd.f32 %v2740_v31, %v2739_v33 }
 0x7e2   : > { %v2867_v48 = vadd.f32 %v2866_v18, %v2865_v53 }
 0x7e3   : > { %4560 = vrcp.f32 %v2741_v50 }
 0x7e4   : > { %4562 = vpow2.f32 %v2985_v56  ;;  %v2869_v33 = vadd.f32 %v2868_v8, %v2867_v48 }
 0x7e5   : > { %4564 = vpow2.f32 %v2987_v38 }
 0x7e6   : > { %v2871_v14 = vadd.f32 %v2870_v5, %v2869_v33  ;;  %4566 = vpow2.f32 %v2989_v59 }
 0x7e7   : > { %4568 = vpow2.f32 %v2991_v3  ;;  %v6588_v7 = vpop.eup %4552 }
 0x7e8   : > { %v2872_v40 = vrot.slane %v2871_v14, 4  ;;  %v6590_v45 = vpop.eup %4554  ;;  %v2993_v29 = vsel %vm1088_vm0, %v6588_v7, 0.0 }
 0x7e9   : > { %v6594_v31 = vpop.eup %4556  ;;  %v2994_v27 = vsel %vm1088_vm0, %v6590_v45, 0.0 }
 0x7ea   : > { %v2873_v46 = vadd.f32 %v2872_v40, %v2871_v14  ;;  %v6598_v41 = vpop.eup %4558  ;;  %v2995_v35 = vadd.f32 %v2994_v27, %v2993_v29  ;;  %v2996_v22 = vsel %vm1088_vm0, %v6594_v31, 0.0 }
 0x7eb   : > { %v2998_v59 = vsel %vm1088_vm0, %v6598_v41, 0.0 }
 0x7ec   : > { %v2874_v6 = vrot.slane %v2873_v46, 2  ;;  %v2997_v62 = vadd.f32 %v2996_v22, %v2995_v35 }
 0x7ee   : > { %v2875_v50 = vadd.f32 %v2874_v6, %v2873_v46  ;;  %v2999_v33 = vadd.f32 %v2998_v59, %v2997_v62 }
 0x7f0   : > { %v4561_v56 = vpop.eup %4560  ;;  %v2876_v48 = vrot.slane %v2875_v50, 1 }
 0x7f1   : > { %v6602_v53 = vpop.eup %4562  ;;  %v2744_v38 = vmul.f32 %v4561_v56, %v6510_v19  ;;  %v2743_v18 = vmul.f32 %v4561_v56, %v6508_v10  ;;  %v2745_v46 = vmul.f32 %v4561_v56, %v6517_v54  ;;  %v2746_v19 = vmul.f32 %v4561_v56, %v6522_v43 }
 0x7f2   : > { %v4565_v8 = vpop.eup %4564  ;;  %v2877_v3 = vadd.f32 %v2876_v48, %v2875_v50  ;;  %v3000_v5 = vsel %vm1088_vm0, %v6602_v53, 0.0  ;;  %v2747_v50 = vmul.f32 %v4561_v56, %v6527_v57  ;;  %v2748_v22 = vmul.f32 %v4561_v56, %v6532_v61 }
 0x7f3   : > { %2758 = vperm.xlu1 %4329, %v2744_v38   ;;  %2753 = vperm.xlu0 %4328, %v2743_v18   ;;  %v4567_v14 = vpop.eup %4566  ;;  %v3001_v40 = vadd.f32 %v3000_v5, %v2999_v33  ;;  %v3002_v10 = vsel %vm1088_vm0, %v4565_v8, 0.0  ;;  %v2749_v43 = vmul.f32 %v4561_v56, %v6537_v17  ;;  %v2750_v18 = vmul.f32 %v4561_v56, %v6542_v23 }
 0x7f4   : > { %4570 = vrcp.f32 %v2877_v3  ;;  %v4569_v29 = vpop.eup %4568  ;;  %v3004_v27 = vsel %vm1088_vm0, %v4567_v14, 0.0 }
 0x7f5   : > { %v3003_v6 = vadd.f32 %v3002_v10, %v3001_v40  ;;  %v3006_v62 = vsel %vm1088_vm0, %v4569_v29, 0.0  ;;  %vm7341_vm0 = vcmask 1042432  }
 0x7f7   : > { %2763 = vperm.xlu1 %4329, %v2745_v46   ;;  %2768 = vperm.xlu0 %4328, %v2746_v19   ;;  %v3005_v35 = vadd.f32 %v3004_v27, %v3003_v6 }
 0x7f9   : > { %v3007_v38 = vadd.f32 %v3006_v62, %v3005_v35 }
 0x7fb   : > { %2773 = vperm.xlu1 %4329, %v2747_v50   ;;  %2778 = vperm.xlu0 %4328, %v2748_v22   ;;  %v3008_v54 = vrot.slane %v3007_v38, 4 }
 0x7fd   : > { %v3009_v48 = vadd.f32 %v3008_v54, %v3007_v38 }
 0x7ff   : > { %2783 = vperm.xlu1 %4329, %v2749_v43   ;;  %2788 = vperm.xlu0 %4328, %v2750_v18   ;;  %v3010_v59 = vrot.slane %v3009_v48, 2 }
 0x801   : > { %v4571_v33 = vpop.eup %4570  ;;  %v3011_v3 = vadd.f32 %v3010_v59, %v3009_v48 }
 0x802   : > { %v2880_v57 = vmul.f32 %v4571_v33, %v6550_v4  ;;  %v2879_v61 = vmul.f32 %v4571_v33, %v6548_v21  ;;  %v2881_v46 = vmul.f32 %v4571_v33, %v6557_v42  ;;  %v2882_v17 = vmul.f32 %v4571_v33, %v6562_v60 }
 0x803   : > { %v3012_v5 = vrot.slane %v3011_v3, 1  ;;  %v2883_v23 = vmul.f32 %v4571_v33, %v6567_v34  ;;  %v2884_v56 = vmul.f32 %v4571_v33, %v6572_v58  ;;  %v2885_v4 = vmul.f32 %v4571_v33, %v6577_v51 }
 0x804   : > { %2894 = vperm.xlu0 %4328, %v2880_v57   ;;  %2889 = vperm.xlu1 %4329, %v2879_v61  }
 0x805   : > { %v3013_v40 = vadd.f32 %v3012_v5, %v3011_v3 }
 0x807   : > { %4572 = vrcp.f32 %v3013_v40 }
 0x808   : > { %2899 = vperm.xlu0 %4328, %v2881_v46   ;;  %2904 = vperm.xlu1 %4329, %v2882_v17  }
 0x80c   : > { %2909 = vperm.xlu0 %4328, %v2883_v23   ;;  %2914 = vperm.xlu1 %4329, %v2884_v56  }
 0x810   : > { %2919 = vperm.xlu0 %4328, %v2885_v4  }
 0x814   : > { %v4573_v21 = vpop.eup %4572 }
 0x815   : > { %v3016_v19 = vmul.f32 %v4573_v21, %v6590_v45  ;;  %v3015_v10 = vmul.f32 %v4573_v21, %v6588_v7  ;;  %v3018_v42 = vmul.f32 %v4573_v21, %v6598_v41  ;;  %v3017_v60 = vmul.f32 %v4573_v21, %v6594_v31 }
 0x816   : > { %v3020_v34 = vmul.f32 %v4573_v21, %v4565_v8  ;;  %v3019_v58 = vmul.f32 %v4573_v21, %v6602_v53  ;;  %v3022_v51 = vmul.f32 %v4573_v21, %v4569_v29  ;;  %v3021_v6 = vmul.f32 %v4573_v21, %v4567_v14 }
 0x817   : > { %3030 = vperm.xlu0 %4328, %v3016_v19   ;;  %3025 = vperm.xlu1 %4329, %v3015_v10   ;;  %v2886_v45 = vmul.f32 %v4571_v33, %v6582_v28 }
 0x81b   : > { %3040 = vperm.xlu0 %4328, %v3018_v42   ;;  %3035 = vperm.xlu1 %4329, %v3017_v60  }
 0x81f   : > { %3050 = vperm.xlu0 %4328, %v3020_v34   ;;  %3045 = vperm.xlu1 %4329, %v3019_v58  }
 0x823   : > { %3060 = vperm.xlu0 %4328, %v3022_v51   ;;  %3055 = vperm.xlu1 %4329, %v3021_v6  }
 0x827   : > { %2924 = vperm.xlu1 %4329, %v2886_v45  }
 0x86e   : > { %v2759_v7 = vpop.permute.xlu1 %2758  ;;  %v2754_v27 = vpop.permute.xlu0 %2753 }
 0x86f   : > { %v2792_v8 = vmul.f32 %v2759_v7, %v6064_v30  ;;  %v2791_v53 = vmul.f32 %v2754_v27, %v6056_v25 }
 0x871   : > { %v2799_v54 = vadd.f32 %v2792_v8, %v2791_v53 }
 0x872   : > { %v2764_v35 = vpop.permute.xlu1 %2763  ;;  %v2769_v41 = vpop.permute.xlu0 %2768 }
 0x873   : > { %v2793_v14 = vmul.f32 %v2764_v35, %v6097_v12  ;;  %v2794_v18 = vmul.f32 %v2769_v41, %v6104_v63 }
 0x875   : > { %v2800_v28 = vadd.f32 %v2799_v54, %v2793_v14 }
 0x876   : > { %v2779_v50 = vpop.permute.xlu0 %2778  ;;  %v2774_v31 = vpop.permute.xlu1 %2773 }
 0x877   : > { %v2801_v33 = vadd.f32 %v2800_v28, %v2794_v18  ;;  %v2795_v3 = vmul.f32 %v2774_v31, %v6143_v2  ;;  %v2796_v17 = vmul.f32 %v2779_v50, %v6158_v47 }
 0x879   : > { %v2802_v61 = vadd.f32 %v2801_v33, %v2795_v3 }
 0x87a   : > { %v2789_v22 = vpop.permute.xlu0 %2788  ;;  %v2784_v62 = vpop.permute.xlu1 %2783 }
 0x87b   : > { %v2803_v56 = vadd.f32 %v2802_v61, %v2796_v17  ;;  %v2797_v4 = vmul.f32 %v2784_v62, %v6162_v1  ;;  %v2798_v6 = vmul.f32 %v2789_v22, %v6168_v36 }
 0x87d   : > { %v2804_v58 = vadd.f32 %v2803_v56, %v2797_v4 }
 0x87f   : > { %v2895_v38 = vpop.permute.xlu0 %2894  ;;  %v2890_v29 = vpop.permute.xlu1 %2889  ;;  %v2805_v31 = vadd.f32 %v2804_v58, %v2798_v6 }
 0x880   : > { %v2928_v5 = vmul.f32 %v2895_v38, %v6194_v9  ;;  %v2927_v40 = vmul.f32 %v2890_v29, %v6171_v52 }
 0x882   : > { %v2935_v21 = vadd.f32 %v2928_v5, %v2927_v40 }
 0x883   : > { %v2900_v43 = vpop.permute.xlu0 %2899  ;;  %v2905_v59 = vpop.permute.xlu1 %2904 }
 0x884   : > { %v2929_v23 = vmul.f32 %v2900_v43, %v6197_v26  ;;  %v2930_v51 = vmul.f32 %v2905_v59, %v6206_v49  ;;  %v2806_v43 = vrot.slane %v2805_v31, 4 }
 0x886   : > { %v2936_v42 = vadd.f32 %v2935_v21, %v2929_v23  ;;  %v2807_v40 = vadd.f32 %v2806_v43, %v2805_v31 }
 0x887   : > { %v2910_v48 = vpop.permute.xlu0 %2909  ;;  %v2915_v46 = vpop.permute.xlu1 %2914 }
 0x888   : > { %v2937_v27 = vadd.f32 %v2936_v42, %v2930_v51  ;;  %v2931_v35 = vmul.f32 %v2910_v48, %v6215_v32  ;;  %v2932_v22 = vmul.f32 %v2915_v46, %v6225_v0 }
 0x88a   : > { %v2938_v14 = vadd.f32 %v2937_v27, %v2931_v35 }
 0x88b   : > { %v2920_v57 = vpop.permute.xlu0 %2919 }
 0x88c   : > { %v2939_v33 = vadd.f32 %v2938_v14, %v2932_v22  ;;  %v2933_v3 = vmul.f32 %v2920_v57, %v6247_v15 }
 0x88e   : > { %v2940_v4 = vadd.f32 %v2939_v33, %v2933_v3 }
 0x892   : > { %v3031_v19 = vpop.permute.xlu0 %3030  ;;  %v3026_v10 = vpop.permute.xlu1 %3025 }
 0x893   : > { %v3064_v60 = vmul.f32 %v3031_v19, %v6260_v39  ;;  %v3063_v34 = vmul.f32 %v3026_v10, %v6254_v24  ;;  %v2808_v19 = vrot.slane %v2807_v40, 2 }
 0x895   : > { %v3071_v41 = vadd.f32 %v3064_v60, %v3063_v34  ;;  %v2809_v58 = vadd.f32 %v2808_v19, %v2807_v40 }
 0x896   : > { %v3041_v45 = vpop.permute.xlu0 %3040  ;;  %v3036_v7 = vpop.permute.xlu1 %3035 }
 0x897   : > { %v3065_v50 = vmul.f32 %v3036_v7, %v6270_v20  ;;  %v3066_v62 = vmul.f32 %v3041_v45, %v6273_v44  ;;  %v2810_v7 = vrot.slane %v2809_v58, 1 }
 0x899   : > { %v3072_v8 = vadd.f32 %v3071_v41, %v3065_v50  ;;  %v2811_v50 = vadd.f32 %v2810_v7, %v2809_v58 }
 0x89a   : > { %v3051_v53 = vpop.permute.xlu0 %3050  ;;  %v3046_v38 = vpop.permute.xlu1 %3045 }
 0x89b   : > { %v3073_v29 = vadd.f32 %v3072_v8, %v3066_v62  ;;  %v3067_v54 = vmul.f32 %v3046_v38, %v6276_v16  ;;  %v3068_v28 = vmul.f32 %v3051_v53, %v6279_v11 }
 0x89d   : > { %v3074_v18 = vadd.f32 %v3073_v29, %v3067_v54  ;;  %v4736_v29 = vld [vmem:[%s5517_s28] ss:$0 sm:$0xff]  ;;  %s4803_s28 = smov [#allocation3]  }
 0x89e   : > { %v3061_v48 = vpop.permute.xlu0 %3060  ;;  %v3056_v59 = vpop.permute.xlu1 %3055  ;;  %s4742_s12 = sshll.u32 %s4803_s28, 4  ;;  %s4743_s12 = int_to_ptr.vmem [resolvable:$false] %s4742_s12 }
 0x89f   : > { %v3075_v61 = vadd.f32 %v3074_v18, %v3068_v28  ;;  %v3069_v5 = vmul.f32 %v3056_v59, %v6290_v37  ;;  %v3070_v17 = vmul.f32 %v3061_v48, %v6293_v13  ;;  %s4744_s20 = scalar_lea.vmem %s4743_s12, 2048  ;;  %p4745_p0 = scmp.lt.s32.totalorder %s7228_s27, %s4743_s12 }
 0x8a0   : > { %p4746_p1 = scmp.lt.s32.totalorder %s4744_s20, %s4738_s29 }
 0x8a1   : > { %v3076_v23 = vadd.f32 %v3075_v61, %v3069_v5 }
 0x8a2   : > { %v2925_v56 = vpop.permute.xlu1 %2924  ;;  %p4747_p2 = por %p4746_p1, %p4745_p0 }
 0x8a3   : > { %v3077_v21 = vadd.f32 %v3076_v23, %v3070_v17  ;;  %v2934_v46 = vmul.f32 %v2925_v56, %v6250_v55 }
 0x8a4   : > { %p4748_p3 = pnand %p4747_p2, %p4741_p13 }
 0x8a5   : > { %v3078_v10 = vrot.slane %v3077_v21, 4  ;;  %v2941_v42 = vadd.f32 %v2940_v4, %v2934_v46  ;;  %v4229_v46 = vpop.f32.mrf.mxu0 }
 0x8a7   : > { %v3079_v60 = vadd.f32 %v3078_v10, %v3077_v21  ;;  %v2942_v34 = vrot.slane %v2941_v42, 4  ;;  %v2577_v19 = vpop.f32.mrf.mxu0 }
 0x8a9   : > { %v3080_v51 = vrot.slane %v3079_v60, 2  ;;  %v2943_v57 = vadd.f32 %v2942_v34, %v2941_v42  ;;  %v4230_v10 = vpop.f32.mrf.mxu0 }
 0x8ab   : > { %v3081_v6 = vadd.f32 %v3080_v51, %v3079_v60  ;;  %v2944_v45 = vrot.slane %v2943_v57, 2  ;;  %v2580_v42 = vpop.f32.mrf.mxu0 }
 0x8ad   : > { %v2945_v27 = vadd.f32 %v2944_v45, %v2943_v57  ;;  %v3082_v35 = vrot.slane %v3081_v6, 1  ;;  %v4233_v60 = vpop.f32.mrf.mxu0 }
 0x8af   : > { %v2946_v41 = vrot.slane %v2945_v27, 1  ;;  %v3083_v62 = vadd.f32 %v3082_v35, %v3081_v6  ;;  %v2593_v34 = vpop.f32.mrf.mxu0 }
 0x8b1   : > { %v2947_v31 = vadd.f32 %v2946_v41, %v2945_v27  ;;  %v4234_v58 = vpop.f32.mrf.mxu0 }
 0x8b3   : > { %v3084_v8 = vsel %vm1497_vm2, %v2811_v50, %v2947_v31  ;;  %v2596_v51 = vpop.f32.mrf.mxu0 }
 0x8b4   : > { %v3085_v53 = vsel %vm1499_vm3, %v3084_v8, %v3083_v62  ;;  %v4737_v62 = vld [vmem:[%s7283_s9] ss:$0 sm:$0xff] }
 0x8b5   : > { %v3086_v38 = vpack.c.bf16 %v3085_v53, %v3085_v53  ;;  %v4237_v57 = vpop.f32.mrf.mxu0 }
 0x8b7   : > { %4260 = vmatmul.mubr.bf16.vlgmr.msra.gmra.mxu1 %v3086_v38  ;;  %v2609_v6 = vpop.f32.mrf.mxu0 }
 0x8b9   : > { %v4238_v45 = vpop.f32.mrf.mxu0 }
 0x8bb   : > { %v2612_v7 = vpop.f32.mrf.mxu0 }
 0x8bd   : > { %v4241_v27 = vpop.f32.mrf.mxu0 }
 0x8bf   : > { %v2625_v35 = vpop.f32.mrf.mxu0 }
 0x8c1   : > { %v4242_v41 = vpop.f32.mrf.mxu0 }
 0x8c3   : > { %v2628_v50 = vpop.f32.mrf.mxu0 }
 0x977   : > { %v3121_v14 = vpop.f32.mrf.mxu1 }
 0x978   : > { %v3122_v54 = vadd.f32 %v4736_v29, %v3121_v14 }
 0x979   : > { %v4261_v43 = vpop.f32.mrf.mxu1 }
 0x97a   : > { %v3127_v22 = vmax.f32 %v3122_v54, 0.0  ;;  %v7342_v43 = vld [vmem:[#allocation7_spill] sm:$0xff] }
 0x97b   : > { %v3124_v28 = vpop.f32.mrf.mxu1 }
 0x97c   : > { %v3128_v18 = vmul.f32 %v3127_v22, %v3127_v22  ;;  %v2613_v28 = vadd.f32 %v7342_v43, %v2612_v7 }
 0x97d   : > { %v4262_v48 = vpop.f32.mrf.mxu1 }
 0x97e   : > { %v3129_v59 = vsel %vm7341_vm0, %v3128_v18, 0.0  ;;  %v2629_v18 = vadd.f32 %v7342_v43, %v2628_v50 }
 0x97f   : > { %3130 = vadd.xlane.f32.xlu1 %v3129_v59  ;;  %v2589_v59 = vadd.f32 %v7342_v43, %v4230_v10  ;;  %v2657_v10 = vmax.f32 %v2613_v28, 0.0 }
 0xa08   : > { %v3131_v33 = vpop.xlane.xlu1 %3130 }
 0xa09   : > { %4574 = vrsqrt.f32 %v3131_v33  ;;  %vm3134_vm1 = vcmp.eq.f32.partialorder %v3131_v33, inf  ;;  %v3137_v5 = vand.u32 2147483648, %v3131_v33  ;;  %vm3136_vm2 = vcmp.eq.f32.partialorder %v3131_v33, 0.0 }
 0xa16   : > { %v4575_v3 = vpop.eup %4574 }
 0xa17   : > { %v3133_v61 = vmul.f32 %v4575_v3, %v3131_v33  ;;  %v2618_v3 = vadd.f32 %v7342_v43, %v4237_v57  ;;  %v2605_v57 = vadd.f32 %v7342_v43, %v4234_v58 }
 0xa19   : > { %v3135_v40 = vsel %vm3134_vm1, %v3131_v33, %v3133_v61  ;;  %v2581_v33 = vadd.f32 %v7342_v43, %v2580_v42  ;;  %v2597_v61 = vadd.f32 %v7342_v43, %v2596_v51  ;;  %v2661_v42 = vmax.f32 %v2629_v18, 0.0 }
 0xa1a   : > { %v3138_v17 = vsel %vm3136_vm2, %v3137_v5, %v3135_v40  ;;  %v2610_v5 = vadd.f32 %v7342_v43, %v2609_v6  ;;  %v2626_v40 = vadd.f32 %v7342_v43, %v2625_v35  ;;  %v2658_v51 = vmax.f32 %v2618_v3, 0.0 }
 0xa1b   : > { %v3139_v23 = vmax.f32 %v3138_v17, 1e-12  ;;  %v2586_v17 = vadd.f32 %v7342_v43, %v4229_v46  ;;  %v2634_v6 = vadd.f32 %v7342_v43, %v4241_v27  ;;  %v2649_v7 = vmax.f32 %v2581_v33, 0.0 }
 0xa1c   : > { %v2653_v35 = vmax.f32 %v2597_v61, 0.0  ;;  %v2656_v50 = vmax.f32 %v2610_v5, 0.0 }
 0xa1d   : > { %4576 = vrcp.f32 %v3139_v23  ;;  %v2650_v46 = vmax.f32 %v2586_v17, 0.0  ;;  %v2662_v27 = vmax.f32 %v2634_v6, 0.0 }
 0xa2a   : > { %v4577_v56 = vpop.eup %4576 }
 0xa2b   : > { %v3141_v4 = vmul.f32 %v4577_v56, %v3127_v22  ;;  %v2621_v22 = vadd.f32 %v7342_v43, %v4238_v45  ;;  %v2637_v56 = vadd.f32 %v7342_v43, %v4242_v41  ;;  %v2651_v45 = vmax.f32 %v2589_v59, 0.0 }
 0xa2d   : > { %v3142_v21 = vpack.c.bf16 %v3141_v4, %v3141_v4  ;;  %v2659_v23 = vmax.f32 %v2621_v22, 0.0  ;;  %v2578_v4 = vadd.f32 %v7342_v43, %v2577_v19  ;;  %v2663_v19 = vmax.f32 %v2637_v56, 0.0 }
 0xa2e   : > { %v6685_v58 = vpack.c.bf16 %v2651_v45, %v2650_v46 }
 0xa2f   : > { %4280 = vmatmul.mubr.bf16.vlgmr.msra.gmra.mxu0 %v3142_v21  ;;  %v2594_v21 = vadd.f32 %v7342_v43, %v2593_v34  ;;  %v6679_v41 = vpack.c.bf16 %v2659_v23, %v2658_v51 }
 0xa30   : > { %v3191_v59 = vunpack.c.l.bf16 %v6685_v58  ;;  %v7314_v51 = vunpack.c.h.bf16 %v6685_v58 }
 0xa31   : > { %v2652_v34 = vmax.f32 %v2594_v21, 0.0  ;;  %v3200_v17 = vunpack.c.h.bf16 %v6679_v41 }
 0xa33   : > { %v3208_v46 = vadd.f32 %v3200_v17, %v7314_v51 }
 0xaef   : > { %v3177_v31 = vpop.f32.mrf.mxu0 }
 0xaf0   : > { %v3178_v8 = vadd.f32 %v4737_v62, %v3177_v31  ;;  %v2660_v31 = vmax.f32 %v2626_v40, 0.0  ;;  %v2602_v62 = vadd.f32 %v7342_v43, %v4233_v60  ;;  %v3199_v60 = vunpack.c.l.bf16 %v6679_v41 }
 0xaf1   : > { %v4281_v53 = vpop.f32.mrf.mxu0  ;;  %v6692_v43 = vpack.c.bf16 %v2663_v19, %v2662_v27 }
 0xaf2   : > { %v3799_v38 = vmul.f32 -1.442695, %v3178_v8  ;;  %v2648_v8 = vmax.f32 %v2578_v4, 0.0  ;;  %v6681_v53 = vpack.c.bf16 %v2657_v10, %v2656_v50  ;;  %v2654_v22 = vmax.f32 %v2602_v62, 0.0 }
 0xaf3   : > { %v3180_v14 = vpop.f32.mrf.mxu0  ;;  %v3207_v23 = vadd.f32 %v3199_v60, %v3191_v59  ;;  %v3203_v56 = vunpack.c.l.bf16 %v6692_v43 }
 0xaf4   : > { %4578 = vpow2.f32 %v3799_v38  ;;  %v6683_v38 = vpack.c.bf16 %v2661_v42, %v2660_v31  ;;  %v2655_v14 = vmax.f32 %v2605_v57, 0.0  ;;  %v3197_v28 = vunpack.c.l.bf16 %v6681_v53  ;;  %v7343_v42 = vld [vmem:[#allocation6_spill] sm:$0xff] }
 0xaf5   : > { %v4282_v29 = vpop.f32.mrf.mxu0  ;;  %v3198_v18 = vunpack.c.h.bf16 %v6681_v53  ;;  %v7344_v45 = vsub.s32 0, %v7343_v42 }
 0xaf6   : > { %v6687_v29 = vpack.c.bf16 %v2649_v7, %v2648_v8  ;;  %v6698_v33 = vpack.c.bf16 %v2655_v14, %v2654_v22  ;;  %v3202_v19 = vunpack.c.h.bf16 %v6683_v38  ;;  %v7345_v8 = vld [vmem:[#allocation9_spill] sm:$0xff]  ;;  %v7346_v22 = vsub.s32 1, %v7343_v42 }
 0xaf8   : > { %v3189_v3 = vunpack.c.l.bf16 %v6687_v29  ;;  %v7316_v61 = vunpack.c.h.bf16 %v6687_v29  ;;  %v7313_v6 = vunpack.c.l.bf16 %v6698_v33 }
 0xafa   : > { %v3205_v4 = vadd.f32 %v3197_v28, %v3189_v3  ;;  %v3206_v21 = vadd.f32 %v3198_v18, %v7316_v61  ;;  %v3211_v62 = vadd.f32 %v3203_v56, %v7313_v6 }
 0xb01   : > { %v4579_v54 = vpop.eup %4578 }
 0xb02   : > { %v3186_v48 = vadd.f32 1.0, %v4579_v54  ;;  %v6689_v54 = vpack.c.bf16 %v2653_v35, %v2652_v34  ;;  %v3345_v34 = vunpack.c.l.bf16 %v7345_v8 }
 0xb04   : > { %4580 = vrcp.f32 %v3186_v48  ;;  %v3201_v48 = vunpack.c.l.bf16 %v6683_v38  ;;  %v3193_v5 = vunpack.c.l.bf16 %v6689_v54  ;;  %v7315_v27 = vunpack.c.h.bf16 %v6689_v54 }
 0xb06   : > { %v3209_v10 = vadd.f32 %v3201_v48, %v3193_v5 }
 0xb11   : > { %v6703_v40 = vpop.eup %4580 }
 0xb12   : > { %v3216_v57 = vrot.slane %v6703_v40, %v7344_v45  ;;  %v3353_v45 = vadd.f32 %v3345_v34, %v3197_v28 }
 0xb14   : > { %v3219_v7 = vmul.f32 %v3216_v57, %v3207_v23  ;;  %v3217_v35 = vmul.f32 %v3216_v57, %v3205_v4  ;;  %v3221_v50 = vmul.f32 %v3216_v57, %v3209_v10  ;;  %v3218_v31 = vmul.f32 %v3216_v57, %v3206_v21 }
 0xb15   : > { %v6740_v23 = vrot.slane %v6703_v40, %v7346_v22  ;;  %v3223_v4 = vmul.f32 %v3216_v57, %v3211_v62  ;;  %v3220_v21 = vmul.f32 %v3216_v57, %v3208_v46  ;;  %v7347_v46 = vld [vmem:[#allocation8_spill] sm:$0xff]  ;;  %v3196_v22 = vunpack.c.h.bf16 %v6698_v33 }
 0xb16   : > { %v6731_v53 = vadd.f32 %v3219_v7, %v6097_v12  ;;  %v6734_v14 = vadd.f32 %v3217_v35, %v6056_v25  ;;  %v6747_v12 = vadd.f32 %v3221_v50, %v6143_v2  ;;  %v6750_v25 = vadd.f32 %v3218_v31, %v6064_v30 }
 0xb17   : > { %v3210_v7 = vadd.f32 %v3202_v19, %v7315_v27  ;;  %v3204_v35 = vunpack.c.h.bf16 %v6692_v43  ;;  %v3347_v62 = vunpack.c.l.bf16 %v7347_v46  ;;  %v3365_v6 = vmul.f32 %v6740_v23, %v3353_v45  ;;  %v7348_v45 = vld [vmem:[#allocation11_spill] sm:$0xff] }
 0xb18   : > { %v3235_v38 = vmul.f32 %v6731_v53, %v6731_v53  ;;  %v3233_v10 = vmul.f32 %v6734_v14, %v6734_v14  ;;  %v3237_v2 = vmul.f32 %v6747_v12, %v6747_v12  ;;  %v3234_v30 = vmul.f32 %v6750_v25, %v6750_v25 }
 0xb19   : > { %v3222_v51 = vmul.f32 %v3216_v57, %v3210_v7  ;;  %v6763_v28 = vadd.f32 %v3223_v4, %v6162_v1  ;;  %v6766_v50 = vadd.f32 %v3220_v21, %v6104_v63  ;;  %v3355_v31 = vadd.f32 %v3347_v62, %v3199_v60 }
 0xb1a   : > { %3245 = vadd.xlane.f32.xlu1 %v3235_v38  ;;  %3241 = vadd.xlane.f32.xlu0 %v3233_v10  ;;  %v3212_v38 = vadd.f32 %v3204_v35, %v3196_v22  ;;  %v3346_v10 = vunpack.c.h.bf16 %v7345_v8  ;;  %v3349_v7 = vunpack.c.l.bf16 %v7348_v45  ;;  %v6773_v27 = vadd.f32 %v3365_v6, %v6171_v52  ;;  %v7349_v52 = vld [vmem:[#allocation10_spill] sm:$0xff] }
 0xb1b   : > { %v6776_v61 = vadd.f32 %v3222_v51, %v6158_v47  ;;  %v3239_v63 = vmul.f32 %v6763_v28, %v6763_v28  ;;  %v3236_v1 = vmul.f32 %v6766_v50, %v6766_v50  ;;  %v3367_v60 = vmul.f32 %v6740_v23, %v3355_v31 }
 0xb1c   : > { %v3224_v4 = vmul.f32 %v3216_v57, %v3212_v38  ;;  %v3354_v21 = vadd.f32 %v3346_v10, %v3198_v18  ;;  %v3348_v8 = vunpack.c.h.bf16 %v7347_v46  ;;  %v3351_v6 = vunpack.c.l.bf16 %v7349_v52 }
 0xb1d   : > { %v3381_v47 = vmul.f32 %v6773_v27, %v6773_v27  ;;  %v3238_v51 = vmul.f32 %v6776_v61, %v6776_v61  ;;  %v3350_v38 = vunpack.c.h.bf16 %v7348_v45 }
 0xb1e   : > { %3249 = vadd.xlane.f32.xlu1 %v3237_v2  ;;  %3243 = vadd.xlane.f32.xlu0 %v3234_v30  ;;  %v3357_v2 = vadd.f32 %v3349_v7, %v3201_v48  ;;  %v6790_v30 = vadd.f32 %v3367_v60, %v6197_v26  ;;  %v6793_v31 = vadd.f32 %v3224_v4, %v6168_v36  ;;  %v7350_v26 = vsub.s32 2, %v7343_v42 }
 0xb1f   : > { %v3366_v48 = vmul.f32 %v6740_v23, %v3354_v21  ;;  %v3356_v57 = vadd.f32 %v3348_v8, %v3200_v17  ;;  %v3359_v46 = vadd.f32 %v3351_v6, %v3203_v56  ;;  %v3493_v56 = vadd.f32 %v3345_v34, %v3189_v3 }
 0xb20   : > { %v3369_v18 = vmul.f32 %v6740_v23, %v3357_v2  ;;  %v3383_v60 = vmul.f32 %v6790_v30, %v6790_v30  ;;  %v3240_v41 = vmul.f32 %v6793_v31, %v6793_v31  ;;  %v3352_v42 = vunpack.c.h.bf16 %v7349_v52 }
 0xb21   : > { %v3371_v36 = vmul.f32 %v6740_v23, %v3359_v46  ;;  %v6815_v17 = vadd.f32 %v3366_v48, %v6194_v9 }
 0xb22   : > { %3253 = vadd.xlane.f32.xlu1 %v3239_v63  ;;  %3247 = vadd.xlane.f32.xlu0 %v3236_v1  ;;  %v3504_v63 = vrot.slane %v6703_v40, %v7350_v26  ;;  %v3368_v1 = vmul.f32 %v6740_v23, %v3356_v57  ;;  %v6812_v43 = vadd.f32 %v3369_v18, %v6215_v32 }
 0xb23   : > { %v3358_v40 = vadd.f32 %v3350_v38, %v3202_v19  ;;  %v6821_v45 = vadd.f32 %v3371_v36, %v6247_v15  ;;  %v3382_v32 = vmul.f32 %v6815_v17, %v6815_v17  ;;  %v3495_v19 = vadd.f32 %v3347_v62, %v3191_v59 }
 0xb24   : > { %v3505_v4 = vmul.f32 %v3504_v63, %v3493_v56  ;;  %v3385_v21 = vmul.f32 %v6812_v43, %v6812_v43  ;;  %v6828_v9 = vadd.f32 %v3368_v1, %v6206_v49  ;;  %v3360_v34 = vadd.f32 %v3352_v42, %v3204_v35 }
 0xb25   : > { %v3370_v3 = vmul.f32 %v6740_v23, %v3358_v40  ;;  %v3387_v15 = vmul.f32 %v6821_v45, %v6821_v45  ;;  %v3497_v59 = vadd.f32 %v3349_v7, %v3193_v5  ;;  %v7351_v35 = vunpack.c.h.bf16 %v6687_v29 }
 0xb26   : > { %3389 = vadd.xlane.f32.xlu1 %v3381_v47  ;;  %3251 = vadd.xlane.f32.xlu0 %v3238_v51  ;;  %v6836_v2 = vadd.f32 %v3505_v4, %v6254_v24  ;;  %v3384_v52 = vmul.f32 %v6828_v9, %v6828_v9  ;;  %v3507_v47 = vmul.f32 %v3504_v63, %v3495_v19  ;;  %v7352_v5 = vunpack.c.h.bf16 %v6685_v58 }
 0xb27   : > { %v6841_v49 = vadd.f32 %v3370_v3, %v6225_v0  ;;  %v3372_v51 = vmul.f32 %v6740_v23, %v3360_v34  ;;  %v3494_v62 = vadd.f32 %v3346_v10, %v7351_v35  ;;  %v3509_v18 = vmul.f32 %v3504_v63, %v3497_v59 }
 0xb28   : > { %v3521_v24 = vmul.f32 %v6836_v2, %v6836_v2  ;;  %v6853_v0 = vadd.f32 %v3507_v47, %v6270_v20  ;;  %v3496_v29 = vadd.f32 %v3348_v8, %v7352_v5  ;;  %v7353_v10 = vunpack.c.l.bf16 %v6698_v33 }
 0xb29   : > { %v3386_v48 = vmul.f32 %v6841_v49, %v6841_v49  ;;  %v6856_v23 = vadd.f32 %v3372_v51, %v6250_v55  ;;  %v3506_v57 = vmul.f32 %v3504_v63, %v3494_v62  ;;  %v6867_v55 = vadd.f32 %v3509_v18, %v6276_v16 }
 0xb2a   : > { %3393 = vadd.xlane.f32.xlu1 %v3383_v60  ;;  %3255 = vadd.xlane.f32.xlu0 %v3240_v41  ;;  %v3499_v7 = vadd.f32 %v3351_v6, %v7353_v10  ;;  %v3508_v26 = vmul.f32 %v3504_v63, %v3496_v29  ;;  %v3523_v36 = vmul.f32 %v6853_v0, %v6853_v0  ;;  %v7354_v58 = vunpack.c.h.bf16 %v6689_v54 }
 0xb2b   : > { %v3388_v20 = vmul.f32 %v6856_v23, %v6856_v23  ;;  %v6870_v1 = vadd.f32 %v3506_v57, %v6260_v39  ;;  %v3525_v60 = vmul.f32 %v6867_v55, %v6867_v55  ;;  %v3500_v39 = vadd.f32 %v3352_v42, %v3196_v22 }
 0xb2c   : > { %v3511_v46 = vmul.f32 %v3504_v63, %v3499_v7  ;;  %v3498_v8 = vadd.f32 %v3350_v38, %v7354_v58  ;;  %v6882_v16 = vadd.f32 %v3508_v26, %v6273_v44 }
 0xb2d   : > { %v3522_v41 = vmul.f32 %v6870_v1, %v6870_v1  ;;  %v3512_v4 = vmul.f32 %v3504_v63, %v3500_v39 }
 0xb2e   : > { %3397 = vadd.xlane.f32.xlu1 %v3385_v21  ;;  %3391 = vadd.xlane.f32.xlu0 %v3382_v32  ;;  %v3510_v6 = vmul.f32 %v3504_v63, %v3498_v8  ;;  %v6879_v56 = vadd.f32 %v3511_v46, %v6290_v37  ;;  %v3524_v38 = vmul.f32 %v6882_v16, %v6882_v16 }
 0xb2f   : > { %v6896_v37 = vadd.f32 %v3512_v4, %v6293_v13 }
 0xb30   : > { %v3527_v54 = vmul.f32 %v6879_v56, %v6879_v56  ;;  %v6891_v40 = vadd.f32 %v3510_v6, %v6279_v11 }
 0xb31   : > { %v3528_v33 = vmul.f32 %v6896_v37, %v6896_v37 }
 0xb32   : > { %3401 = vadd.xlane.f32.xlu1 %v3387_v15  ;;  %3395 = vadd.xlane.f32.xlu0 %v3384_v52  ;;  %v3526_v44 = vmul.f32 %v6891_v40, %v6891_v40 }
 0xb36   : > { %3529 = vadd.xlane.f32.xlu1 %v3521_v24  ;;  %3399 = vadd.xlane.f32.xlu0 %v3386_v48 }
 0xb3a   : > { %3533 = vadd.xlane.f32.xlu1 %v3523_v36  ;;  %3403 = vadd.xlane.f32.xlu0 %v3388_v20 }
 0xb3e   : > { %3537 = vadd.xlane.f32.xlu1 %v3525_v60  ;;  %3531 = vadd.xlane.f32.xlu0 %v3522_v41 }
 0xb42   : > { %3541 = vadd.xlane.f32.xlu1 %v3527_v54  ;;  %3535 = vadd.xlane.f32.xlu0 %v3524_v38 }
 0xb46   : > { %3539 = vadd.xlane.f32.xlu0 %v3526_v44 }
 0xb4a   : > { %3543 = vadd.xlane.f32.xlu0 %v3528_v33 }
 0xba3   : > { %v6900_v22 = vpop.xlane.xlu1 %3245  ;;  %v3242_v42 = vpop.xlane.xlu0 %3241 }
 0xba4   : > { %4582 = vrsqrt.f32 %v3242_v42  ;;  %vm3259_vm3 = vcmp.eq.f32.partialorder %v3242_v42, inf  ;;  %vm3273_vm9 = vcmp.eq.f32.partialorder %v6900_v22, inf  ;;  %vm3275_vm10 = vcmp.eq.f32.partialorder %v6900_v22, 0.0 }
 0xba5   : > { %4584 = vrsqrt.f32 %v6900_v22  ;;  %v3276_v48 = vand.u32 2147483648, %v6900_v22  ;;  %v3262_v57 = vand.u32 2147483648, %v3242_v42  ;;  %vm3261_vm11 = vcmp.eq.f32.partialorder %v3242_v42, 0.0 }
 0xba7   : > { %v6902_v11 = vpop.xlane.xlu1 %3249  ;;  %v6904_v63 = vpop.xlane.xlu0 %3243 }
 0xba8   : > { %4586 = vrsqrt.f32 %v6902_v11  ;;  %vm3287_vm12 = vcmp.eq.f32.partialorder %v6902_v11, inf  ;;  %vm3289_vm13 = vcmp.eq.f32.partialorder %v6902_v11, 0.0  ;;  %v3290_v7 = vand.u32 2147483648, %v6902_v11 }
 0xba9   : > { %4588 = vrsqrt.f32 %v6904_v63  ;;  %vm3266_vm14 = vcmp.eq.f32.partialorder %v6904_v63, inf  ;;  %vm3268_vm15 = vcmp.eq.f32.partialorder %v6904_v63, 0.0  ;;  %v3269_v8 = vand.u32 2147483648, %v6904_v63 }
 0xbab   : > { %v6909_v13 = vpop.xlane.xlu1 %3253  ;;  %v6911_v21 = vpop.xlane.xlu0 %3247 }
 0xbac   : > { %4590 = vrsqrt.f32 %v6909_v13  ;;  %vm3301_vm5 = vcmp.eq.f32.partialorder %v6909_v13, inf  ;;  %v3304_v41 = vand.u32 2147483648, %v6909_v13  ;;  %vm3280_vm4 = vcmp.eq.f32.partialorder %v6911_v21, inf }
 0xbad   : > { %4592 = vrsqrt.f32 %v6911_v21  ;;  %vm3303_vm6 = vcmp.eq.f32.partialorder %v6909_v13, 0.0  ;;  %vm3282_vm7 = vcmp.eq.f32.partialorder %v6911_v21, 0.0  ;;  %v3283_v54 = vand.u32 2147483648, %v6911_v21 }
 0xbaf   : > { %v6915_v32 = vpop.xlane.xlu1 %3389  ;;  %v6917_v3 = vpop.xlane.xlu0 %3251 }
 0xbb0   : > { %4594 = vrsqrt.f32 %v6915_v32  ;;  %vm3407_vm8 = vcmp.eq.f32.partialorder %v6915_v32, inf  ;;  %vm3409_vm0 = vcmp.eq.f32.partialorder %v6915_v32, 0.0  ;;  %vm3294_vm1 = vcmp.eq.f32.partialorder %v6917_v3, inf }
 0xbb1   : > { %v4583_v19 = vpop.eup %4582  ;;  %4596 = vrsqrt.f32 %v6917_v3 }
 0xbb2   : > { %v3258_v52 = vmul.f32 %v4583_v19, %v3242_v42  ;;  %v4585_v47 = vpop.eup %4584 }
 0xbb3   : > { %v6920_v34 = vpop.xlane.xlu1 %3393  ;;  %v6922_v15 = vpop.xlane.xlu0 %3255  ;;  %v3272_v24 = vmul.f32 %v4585_v47, %v6900_v22 }
 0xbb4   : > { %4598 = vrsqrt.f32 %v6920_v34  ;;  %v3260_v18 = vsel %vm3259_vm3, %v3242_v42, %v3258_v52  ;;  %vm3421_vm2 = vcmp.eq.f32.partialorder %v6920_v34, inf  ;;  %vm3296_vm3 = vcmp.eq.f32.partialorder %v6917_v3, 0.0 }
 0xbb5   : > { %v4587_v51 = vpop.eup %4586  ;;  %4600 = vrsqrt.f32 %v6922_v15  ;;  %v3263_v10 = vsel %vm3261_vm11, %v3262_v57, %v3260_v18  ;;  %v3274_v58 = vsel %vm3273_vm9, %v6900_v22, %v3272_v24  ;;  %vm3423_vm9 = vcmp.eq.f32.partialorder %v6920_v34, 0.0 }
 0xbb6   : > { %v4589_v62 = vpop.eup %4588  ;;  %v3286_v5 = vmul.f32 %v4587_v51, %v6902_v11  ;;  %v3313_v39 = vmax.f32 %v3263_v10, 1e-12  ;;  %v3277_v4 = vsel %vm3275_vm10, %v3276_v48, %v3274_v58  ;;  %v3410_v51 = vand.u32 2147483648, %v6915_v32 }
 0xbb7   : > { %v6927_v59 = vpop.xlane.xlu1 %3397  ;;  %v6929_v35 = vpop.xlane.xlu0 %3391  ;;  %v3265_v46 = vmul.f32 %v4589_v62, %v6904_v63  ;;  %v3297_v62 = vand.u32 2147483648, %v6917_v3  ;;  %v3315_v18 = vmax.f32 %v3277_v4, 1e-12  ;;  %vm3308_vm10 = vcmp.eq.f32.partialorder %v6922_v15, inf }
 0xbb8   : > { %4602 = vrsqrt.f32 %v6927_v59  ;;  %v3288_v60 = vsel %vm3287_vm12, %v6902_v11, %v3286_v5  ;;  %vm3310_vm11 = vcmp.eq.f32.partialorder %v6922_v15, 0.0  ;;  %vm3435_vm12 = vcmp.eq.f32.partialorder %v6927_v59, inf }
 0xbb9   : > { %v4591_v29 = vpop.eup %4590  ;;  %4604 = vrsqrt.f32 %v6929_v35  ;;  %v3267_v44 = vsel %vm3266_vm14, %v6904_v63, %v3265_v46  ;;  %v3291_v19 = vsel %vm3289_vm13, %v3290_v7, %v3288_v60  ;;  %vm3437_vm13 = vcmp.eq.f32.partialorder %v6927_v59, 0.0 }
 0xbba   : > { %v4593_v20 = vpop.eup %4592  ;;  %v3300_v52 = vmul.f32 %v4591_v29, %v6909_v13  ;;  %v3270_v11 = vsel %vm3268_vm15, %v3269_v8, %v3267_v44  ;;  %v3317_v5 = vmax.f32 %v3291_v19, 1e-12  ;;  %v3424_v29 = vand.u32 2147483648, %v6920_v34 }
 0xbbb   : > { %v6942_v26 = vpop.xlane.xlu1 %3401  ;;  %v6944_v36 = vpop.xlane.xlu0 %3395  ;;  %v3279_v22 = vmul.f32 %v4593_v20, %v6911_v21  ;;  %v3314_v58 = vmax.f32 %v3270_v11, 1e-12  ;;  %vm3414_vm14 = vcmp.eq.f32.partialorder %v6929_v35, inf  ;;  %vm3416_vm15 = vcmp.eq.f32.partialorder %v6929_v35, 0.0 }
 0xbbc   : > { %4606 = vrsqrt.f32 %v6942_v26  ;;  %v3302_v63 = vsel %vm3301_vm5, %v6909_v13, %v3300_v52  ;;  %vm3449_vm5 = vcmp.eq.f32.partialorder %v6942_v26, inf }
 0xbbd   : > { %v4595_v6 = vpop.eup %4594  ;;  %4608 = vrcp.f32 %v3313_v39  ;;  %v3281_v46 = vsel %vm3280_vm4, %v6911_v21, %v3279_v22  ;;  %v3311_v39 = vand.u32 2147483648, %v6922_v15  ;;  %v3305_v4 = vsel %vm3303_vm6, %v3304_v41, %v3302_v63 }
 0xbbe   : > { %v3406_v38 = vmul.f32 %v4595_v6, %v6915_v32  ;;  %v4597_v47 = vpop.eup %4596  ;;  %v3438_v41 = vand.u32 2147483648, %v6927_v59  ;;  %vm3451_vm4 = vcmp.eq.f32.partialorder %v6942_v26, 0.0  ;;  %vm3428_vm6 = vcmp.eq.f32.partialorder %v6944_v36, inf }
 0xbbf   : > { %v6969_v33 = vpop.xlane.xlu1 %3529  ;;  %v6971_v42 = vpop.xlane.xlu0 %3399  ;;  %v3293_v20 = vmul.f32 %v4597_v47, %v6917_v3 }
 0xbc0   : > { %v3408_v48 = vsel %vm3407_vm8, %v6915_v32, %v3406_v38  ;;  %4610 = vrsqrt.f32 %v6969_v33  ;;  %v3284_v32 = vsel %vm3282_vm7, %v3283_v54, %v3281_v46  ;;  %v3319_v54 = vmax.f32 %v3305_v4, 1e-12 }
 0xbc1   : > { %v4599_v24 = vpop.eup %4598  ;;  %v3411_v8 = vsel %vm3409_vm0, %v3410_v51, %v3408_v48  ;;  %4612 = vrsqrt.f32 %v6944_v36  ;;  %v3295_v52 = vsel %vm3294_vm1, %v6917_v3, %v3293_v20  ;;  %vm3547_vm7 = vcmp.eq.f32.partialorder %v6969_v33, inf }
 0xbc2   : > { %v4601_v57 = vpop.eup %4600  ;;  %v3420_v6 = vmul.f32 %v4599_v24, %v6920_v34  ;;  %4614 = vrcp.f32 %v3315_v18  ;;  %v3461_v19 = vmax.f32 %v3411_v8, 1e-12  ;;  %v3316_v24 = vmax.f32 %v3284_v32, 1e-12 }
 0xbc3   : > { %v6991_v10 = vpop.xlane.xlu1 %3533  ;;  %v6993_v7 = vpop.xlane.xlu0 %3403  ;;  %v3307_v60 = vmul.f32 %v4601_v57, %v6922_v15  ;;  %4616 = vrcp.f32 %v3317_v5  ;;  %v3298_v18 = vsel %vm3296_vm3, %v3297_v62, %v3295_v52  ;;  %v3417_v62 = vand.u32 2147483648, %v6929_v35 }
 0xbc4   : > { %4618 = vrsqrt.f32 %v6971_v42  ;;  %v3422_v21 = vsel %vm3421_vm2, %v6920_v34, %v3420_v6  ;;  %v3318_v46 = vmax.f32 %v3298_v18, 1e-12  ;;  %v3452_v34 = vand.u32 2147483648, %v6942_v26 }
 0xbc5   : > { %v4603_v38 = vpop.eup %4602  ;;  %4620 = vrcp.f32 %v3314_v58  ;;  %v3309_v51 = vsel %vm3308_vm10, %v6922_v15, %v3307_v60  ;;  %v3425_v57 = vsel %vm3423_vm9, %v3424_v29, %v3422_v21  ;;  %vm3549_vm8 = vcmp.eq.f32.partialorder %v6969_v33, 0.0 }
 0xbc6   : > { %v3434_v22 = vmul.f32 %v4603_v38, %v6927_v59  ;;  %v4605_v13 = vpop.eup %4604  ;;  %4622 = vrsqrt.f32 %v6991_v10  ;;  %v3312_v3 = vsel %vm3310_vm11, %v3311_v39, %v3309_v51  ;;  %v3463_v58 = vmax.f32 %v3425_v57, 1e-12 }
 0xbc7   : > { %v7015_v44 = vpop.xlane.xlu0 %3531  ;;  %v7022_v47 = vpop.xlane.xlu1 %3537  ;;  %4624 = vrsqrt.f32 %v6993_v7  ;;  %v3413_v63 = vmul.f32 %v4605_v13, %v6929_v35  ;;  %v3320_v60 = vmax.f32 %v3312_v3, 1e-12  ;;  %v3431_v38 = vand.u32 2147483648, %v6944_v36 }
 0xbc8   : > { %4626 = vrcp.f32 %v3461_v19  ;;  %v3436_v5 = vsel %vm3435_vm12, %v6927_v59, %v3434_v22  ;;  %v3550_v22 = vand.u32 2147483648, %v6969_v33  ;;  %vm3430_vm0 = vcmp.eq.f32.partialorder %v6944_v36, 0.0 }
 0xbc9   : > { %v4607_v48 = vpop.eup %4606  ;;  %4628 = vrsqrt.f32 %v7022_v47  ;;  %v3439_v15 = vsel %vm3437_vm13, %v3438_v41, %v3436_v5  ;;  %v3415_v39 = vsel %vm3414_vm14, %v6929_v35, %v3413_v63  ;;  %vm3442_vm1 = vcmp.eq.f32.partialorder %v6971_v42, inf }
 0xbca   : > { %4630 = vrcp.f32 %v3319_v54  ;;  %v4609_v20 = vpop.eup %4608  ;;  %v3448_v8 = vmul.f32 %v4607_v48, %v6942_v26  ;;  %v3465_v52 = vmax.f32 %v3439_v15, 1e-12  ;;  %v3418_v21 = vsel %vm3416_vm15, %v3417_v62, %v3415_v39 }
 0xbcb   : > { %v7038_v11 = vpop.xlane.xlu0 %3535  ;;  %v7053_v29 = vpop.xlane.xlu1 %3541  ;;  %4632 = vrcp.f32 %v3316_v24  ;;  %v7071_v19 = vmul.f32 %v4609_v20, %v6734_v14  ;;  %v3445_v24 = vand.u32 2147483648, %v6971_v42  ;;  %vm3561_vm2 = vcmp.eq.f32.partialorder %v6991_v10, inf }
 0xbcc   : > { %4634 = vrsqrt.f32 %v7015_v44  ;;  %v3450_v41 = vsel %vm3449_vm5, %v6942_v26, %v3448_v8  ;;  %vm3563_vm3 = vcmp.eq.f32.partialorder %v6991_v10, 0.0  ;;  %v3462_v5 = vmax.f32 %v3418_v21, 1e-12 }
 0xbcd   : > { %v4611_v6 = vpop.eup %4610  ;;  %4636 = vrsqrt.f32 %v7053_v29  ;;  %vm3444_vm9 = vcmp.eq.f32.partialorder %v6971_v42, 0.0  ;;  %v3564_v63 = vand.u32 2147483648, %v6991_v10  ;;  %vm3456_vm10 = vcmp.eq.f32.partialorder %v6993_v7, inf }
 0xbce   : > { %v3546_v32 = vmul.f32 %v4611_v6, %v6969_v33  ;;  %v4613_v59 = vpop.eup %4612  ;;  %4638 = vrcp.f32 %v3318_v46  ;;  %vm3458_vm11 = vcmp.eq.f32.partialorder %v6993_v7, 0.0  ;;  %v3459_v46 = vand.u32 2147483648, %v6993_v7 }
 0xbcf   : > { %v7064_v4 = vpop.xlane.xlu0 %3539  ;;  %v7074_v13 = vpop.eup %4614  ;;  %4640 = vrcp.f32 %v3463_v58  ;;  %v3427_v18 = vmul.f32 %v4613_v59, %v6944_v36  ;;  %vm3575_vm12 = vcmp.eq.f32.partialorder %v7022_v47, inf  ;;  %vm3577_vm13 = vcmp.eq.f32.partialorder %v7022_v47, 0.0 }
 0xbd0   : > { %v3548_v54 = vsel %vm3547_vm7, %v6969_v33, %v3546_v32  ;;  %v7084_v14 = vpop.eup %4616  ;;  %4642 = vrcp.f32 %v3320_v60  ;;  %v3453_v33 = vsel %vm3451_vm4, %v3452_v34, %v3450_v41  ;;  %v3578_v32 = vand.u32 2147483648, %v7022_v47 }
 0xbd1   : > { %v3551_v51 = vsel %vm3549_vm8, %v3550_v22, %v3548_v54  ;;  %v4619_v35 = vpop.eup %4618  ;;  %4644 = vrsqrt.f32 %v7038_v11  ;;  %v3467_v15 = vmax.f32 %v3453_v33, 1e-12  ;;  %v3429_v8 = vsel %vm3428_vm6, %v6944_v36, %v3427_v18 }
 0xbd2   : > { %v3601_v48 = vmax.f32 %v3551_v51, 1e-12  ;;  %v7093_v57 = vpop.eup %4620  ;;  %4646 = vrcp.f32 %v3465_v52  ;;  %v3441_v58 = vmul.f32 %v4619_v35, %v6971_v42  ;;  %vm3554_vm14 = vcmp.eq.f32.partialorder %v7015_v44, inf }
 0xbd3   : > { %v7099_v3 = vpop.xlane.xlu0 %3543  ;;  %v4623_v62 = vpop.eup %4622  ;;  %vm3556_vm15 = vcmp.eq.f32.partialorder %v7015_v44, 0.0  ;;  %v3432_v41 = vsel %vm3430_vm0, %v3431_v38, %v3429_v8  ;;  %vm3589_vm5 = vcmp.eq.f32.partialorder %v7053_v29, inf  ;;  %vm3591_vm4 = vcmp.eq.f32.partialorder %v7053_v29, 0.0 }
 0xbd4   : > { %4648 = vrcp.f32 %v3601_v48  ;;  %v4625_v20 = vpop.eup %4624  ;;  %v3560_v26 = vmul.f32 %v4623_v62, %v6991_v10  ;;  %v3443_v54 = vsel %vm3442_vm1, %v6971_v42, %v3441_v58  ;;  %vm3568_vm6 = vcmp.eq.f32.partialorder %v7038_v11, inf }
 0xbd5   : > { %4650 = vrsqrt.f32 %v7064_v4  ;;  %v4627_v34 = vpop.eup %4626  ;;  %v3455_v6 = vmul.f32 %v4625_v20, %v6993_v7  ;;  %v3446_v62 = vsel %vm3444_vm9, %v3445_v24, %v3443_v54  ;;  %vm3570_vm7 = vcmp.eq.f32.partialorder %v7038_v11, 0.0 }
 0xbd6   : > { %4652 = vrsqrt.f32 %v7099_v3  ;;  %v4629_v60 = vpop.eup %4628  ;;  %v3562_v39 = vsel %vm3561_vm2, %v6991_v10, %v3560_v26  ;;  %v3557_v10 = vand.u32 2147483648, %v7015_v44  ;;  %v3485_v18 = vmul.f32 %v4627_v34, %v6773_v27 }
 0xbd7   : > { %4654 = vrcp.f32 %v3462_v5  ;;  %v7118_v59 = vpop.eup %4630  ;;  %v3565_v52 = vsel %vm3563_vm3, %v3564_v63, %v3562_v39  ;;  %v3574_v22 = vmul.f32 %v4629_v60, %v7022_v47  ;;  %v3457_v48 = vsel %vm3456_vm10, %v6993_v7, %v3455_v6 }
 0xbd8   : > { %v7125_v21 = vpop.eup %4632  ;;  %v3603_v51 = vmax.f32 %v3565_v52, 1e-12  ;;  %4656 = vrcp.f32 %v3467_v15  ;;  %v3464_v27 = vmax.f32 %v3432_v41, 1e-12  ;;  %v3460_v34 = vsel %vm3458_vm11, %v3459_v46, %v3457_v48 }
 0xbd9   : > { %v4635_v35 = vpop.eup %4634  ;;  %v3576_v36 = vsel %vm3575_vm12, %v7022_v47, %v3574_v22  ;;  %v3592_v15 = vand.u32 2147483648, %v7053_v29  ;;  %v3633_v42 = vadd.f32 %v3485_v18, %v7071_v19  ;;  %v3466_v6 = vmax.f32 %v3446_v62, 1e-12 }
 0xbda   : > { %v4637_v38 = vpop.eup %4636  ;;  %4658 = vrcp.f32 %v3603_v51  ;;  %v3579_v5 = vsel %vm3577_vm13, %v3578_v32, %v3576_v36  ;;  %v3553_v33 = vmul.f32 %v4635_v35, %v7015_v44  ;;  %v3468_v52 = vmax.f32 %v3460_v34, 1e-12 }
 0xbdb   : > { %v7146_v63 = vpop.eup %4638  ;;  %v3605_v20 = vmax.f32 %v3579_v5, 1e-12  ;;  %v3588_v58 = vmul.f32 %v4637_v38, %v7053_v29  ;;  %vm3582_vm8 = vcmp.eq.f32.partialorder %v7064_v4, inf  ;;  %vm3584_vm0 = vcmp.eq.f32.partialorder %v7064_v4, 0.0 }
 0xbdc   : > { %v4641_v26 = vpop.eup %4640  ;;  %v3555_v47 = vsel %vm3554_vm14, %v7015_v44, %v3553_v33  ;;  %vm3596_vm1 = vcmp.eq.f32.partialorder %v7099_v3, inf  ;;  %vm3598_vm2 = vcmp.eq.f32.partialorder %v7099_v3, 0.0 }
 0xbdd   : > { %v7159_v8 = vpop.eup %4642  ;;  %4660 = vrcp.f32 %v3605_v20  ;;  %v3558_v24 = vsel %vm3556_vm15, %v3557_v10, %v3555_v47  ;;  %v3590_v7 = vsel %vm3589_vm5, %v7053_v29, %v3588_v58  ;;  %v3487_v41 = vmul.f32 %v4641_v26, %v6790_v30 }
 0xbde   : > { %v4645_v46 = vpop.eup %4644  ;;  %v3602_v60 = vmax.f32 %v3558_v24, 1e-12  ;;  %v3593_v39 = vsel %vm3591_vm4, %v3592_v15, %v3590_v7  ;;  %4662 = vrcp.f32 %v3464_v27  ;;  %v3571_v29 = vand.u32 2147483648, %v7038_v11 }
 0xbdf   : > { %v4647_v32 = vpop.eup %4646  ;;  %v3607_v19 = vmax.f32 %v3593_v39, 1e-12  ;;  %v3567_v22 = vmul.f32 %v4645_v46, %v7038_v11  ;;  %v3585_v30 = vand.u32 2147483648, %v7064_v4  ;;  %v3339_v58 = vmul.f32 %v7074_v13, %v6731_v53 }
 0xbe0   : > { %4664 = vrcp.f32 %v3602_v60  ;;  %v3489_v47 = vmul.f32 %v4647_v32, %v6812_v43  ;;  %v3341_v7 = vmul.f32 %v7084_v14, %v6747_v12  ;;  %v3338_v39 = vmul.f32 %v7093_v57, %v6750_v25 }
 0xbe1   : > { %v4649_v44 = vpop.eup %4648  ;;  %4666 = vrcp.f32 %v3607_v19  ;;  %v3569_v10 = vsel %vm3568_vm6, %v7038_v11, %v3567_v22  ;;  %v3599_v11 = vand.u32 2147483648, %v7099_v3  ;;  %v3343_v12 = vmul.f32 %v7118_v59, %v6763_v28 }
 0xbe2   : > { %v4651_v54 = vpop.eup %4650  ;;  %v3625_v51 = vmul.f32 %v4649_v44, %v6836_v2  ;;  %4668 = vrcp.f32 %v3466_v6  ;;  %v3572_v18 = vsel %vm3570_vm7, %v3571_v29, %v3569_v10  ;;  %v3637_v13 = vadd.f32 %v3489_v47, %v3341_v7 }
 0xbe3   : > { %v4653_v35 = vpop.eup %4652  ;;  %v3581_v48 = vmul.f32 %v4651_v54, %v7064_v4  ;;  %4670 = vrcp.f32 %v3468_v52  ;;  %v3604_v5 = vmax.f32 %v3572_v18, 1e-12  ;;  %v3340_v28 = vmul.f32 %v7125_v21, %v6766_v50 }
 0xbe4   : > { %v4655_v36 = vpop.eup %4654  ;;  %v3641_v38 = vadd.f32 %v3633_v42, %v3625_v51  ;;  %v3595_v33 = vmul.f32 %v4653_v35, %v7099_v3  ;;  %v3635_v42 = vadd.f32 %v3487_v41, %v3339_v58  ;;  %v3344_v50 = vmul.f32 %v7159_v8, %v6793_v31 }
 0xbe5   : > { %v3583_v2 = vsel %vm3582_vm8, %v7064_v4, %v3581_v48  ;;  %4672 = vrcp.f32 %v3604_v5  ;;  %v4657_v20 = vpop.eup %4656  ;;  %v3486_v46 = vmul.f32 %v4655_v36, %v6815_v17 }
 0xbe6   : > { %3649 = vst [vmem:[%s7184_s25] sm:$0xff] %v3641_v38  ;;  %v3586_v27 = vsel %vm3584_vm0, %v3585_v30, %v3583_v2  ;;  %v3597_v62 = vsel %vm3596_vm1, %v7099_v3, %v3595_v33  ;;  %v3491_v6 = vmul.f32 %v4657_v20, %v6821_v45 }
 0xbe7   : > { %v3606_v26 = vmax.f32 %v3586_v27, 1e-12  ;;  %v3600_v4 = vsel %vm3598_vm2, %v3599_v11, %v3597_v62  ;;  %v4659_v34 = vpop.eup %4658  ;;  %v3634_v17 = vadd.f32 %v3486_v46, %v3338_v39 }
 0xbe8   : > { %v3608_v15 = vmax.f32 %v3600_v4, 1e-12  ;;  %v3627_v24 = vmul.f32 %v4659_v34, %v6853_v0 }
 0xbe9   : > { %4674 = vrcp.f32 %v3606_v26 }
 0xbea   : > { %4676 = vrcp.f32 %v3608_v15  ;;  %v4661_v3 = vpop.eup %4660  ;;  %v3643_v53 = vadd.f32 %v3635_v42, %v3627_v24 }
 0xbeb   : > { %v3629_v60 = vmul.f32 %v4661_v3, %v6867_v55  ;;  %v4663_v43 = vpop.eup %4662  ;;  %v3639_v55 = vadd.f32 %v3491_v6, %v3343_v12 }
 0xbec   : > { %3651 = vst [vmem:[%s7184_s25 + $0x10] sm:$0xff] %v3643_v53  ;;  %v3488_v45 = vmul.f32 %v4663_v43, %v6828_v9 }
 0xbed   : > { %v4665_v0 = vpop.eup %4664  ;;  %v3645_v14 = vadd.f32 %v3637_v13, %v3629_v60 }
 0xbee   : > { %v4667_v32 = vpop.eup %4666  ;;  %v3626_v52 = vmul.f32 %v4665_v0, %v6870_v1  ;;  %v3636_v1 = vadd.f32 %v3488_v45, %v3340_v28 }
 0xbef   : > { %v4669_v19 = vpop.eup %4668  ;;  %3653 = vst [vmem:[%s7184_s25 + $0x20] sm:$0xff] %v3645_v14  ;;  %v3631_v22 = vmul.f32 %v4667_v32, %v6879_v56  ;;  %v3342_v56 = vmul.f32 %v7146_v63, %v6776_v61 }
 0xbf0   : > { %v4671_v25 = vpop.eup %4670  ;;  %v3642_v57 = vadd.f32 %v3634_v17, %v3626_v52  ;;  %v3490_v41 = vmul.f32 %v4669_v19, %v6841_v49 }
 0xbf1   : > { %v3647_v59 = vadd.f32 %v3639_v55, %v3631_v22  ;;  %v3492_v9 = vmul.f32 %v4671_v25, %v6856_v23 }
 0xbf2   : > { %v4673_v44 = vpop.eup %4672  ;;  %3650 = vst [vmem:[%s7184_s25 + $0x8] sm:$0xff] %v3642_v57  ;;  %v3638_v51 = vadd.f32 %v3490_v41, %v3342_v56 }
 0xbf3   : > { %3655 = vst [vmem:[%s7184_s25 + $0x30] sm:$0xff] %v3647_v59  ;;  %v3628_v29 = vmul.f32 %v4673_v44, %v6882_v16  ;;  %v3640_v16 = vadd.f32 %v3492_v9, %v3344_v50 }
 0xbf5   : > { %v3644_v21 = vadd.f32 %v3636_v1, %v3628_v29 }
 0xbf6   : > { %v4675_v54 = vpop.eup %4674 }
 0xbf7   : > { %v4677_v49 = vpop.eup %4676  ;;  %v3630_v23 = vmul.f32 %v4675_v54, %v6891_v40  ;;  %3652 = vst [vmem:[%s7184_s25 + $0x18] sm:$0xff] %v3644_v21 }
 0xbf8   : > { %v3632_v10 = vmul.f32 %v4677_v49, %v6896_v37 }
 0xbf9   : > { %v3646_v61 = vadd.f32 %v3638_v51, %v3630_v23 }
 0xbfa   : > { %v3648_v31 = vadd.f32 %v3640_v16, %v3632_v10 }
 0xbfb   : > { %3654 = vst [vmem:[%s7184_s25 + $0x28] sm:$0xff] %v3646_v61 }
 0xbfc   : > { %3656 = vst [vmem:[%s7184_s25 + $0x38] sm:$0xff] %v3648_v31 }
 0xbfd   : > { %4751 = shalt.err (!%p4748_p3)
}
 0xbfe   : > { %s4752_s18 = scalar_lea.hbm %s7226_s21, 1024  ;;  %s4756_s30 = scalar_lea.hbm %s7284_s10, 2048 }
 0xbff   : > { %p4753_p4 = scmp.ne.s32.totalorder %s7226_s21, %s4752_s18  ;;  %p4757_p9 = scmp.lt.s32.totalorder %s7226_s21, %s7284_s10 }
 0xc00   : > { %p4758_p10 = scmp.lt.s32.totalorder %s4756_s30, %s4752_s18 }
 0xc01   : > { %p4754_p7 = pnand %p4753_p4, %p4899_p5 }
 0xc02   : > { %p4759_p11 = por %p4758_p10, %p4757_p9 }
 0xc03   : > { %p4755_p8 = pneg %p4754_p7 }
 0xc05   : > { %p4760_p12 = pnand %p4759_p11, %p4755_p8 }
 0xc07   : > { %4763 = shalt.err (!%p4760_p12)
}
 0xc08   : > { %s4804_s29 = smov 128   ;;  %s4805_s12 = smov 8  }
 0xc09   : > { %4284 = dma.vmem_to_hbm [thread:$0]  (%p4899_p5), %s7228_s27, 1024, %s7226_s21, %s7234_s17, %s4804_s29, %s4804_s29, %s4805_s12  }
 0xc0a PF: > { %p4290_p13 = scmp.ge.s32.totalorder %s4798_s16, 2  ;;  %s3686_s20 = sand.u32 1, %s4786_s13  }
 0xc0b   : > { %s3687_s18 = scalar_lea.sflag [#allocation4], %s3686_s20 }
 0xc0c   : > { %p4287_p0 = pnand %p4290_p13, %p4903_p6 }
 0xc0e   : > { %p4288_p1 = pneg %p4287_p0 }
 0xc10   : > { %4781 = dma.done.wait (%p4288_p1), %s3687_s18, 1024  }
 0xc11   : > { %4783 = vsyncadd (%p4288_p1), %s3687_s18, 4294966272  ;;  %p20_p2 = scmp.ge.s32.totalorder %s4886_s19, 4   ;;  %s7355_s13 = smov %s4790_s14 }
 0xc12   : > { %s7356_s14 = smov %s4794_s15  ;;  %s7357_s15 = smov %s4897_s22 }
 0xc13   : > { %s7358_s16 = smov %s4886_s19  ;;  %22 = sbr.rel (!%p20_p2) target bundleno = 3 (0x3), region = 101 }
 0xc18   :  { %3692 = vsyncpa [#allocation4], 1 }
 0xc19   :  { %3694 = vsyncpa [#allocation4 + $0x1], 1 }

</bundles_post_ra>
